<compile_context>
chip_gen: v5e
topology: v5e:2x2
jax: 0.10.0
libtpu: 0.0.40
codegen_flags: <defaults>
</compile_context>

<pallas_src>
import functools

import jax
import jax.numpy as jnp
import numpy as np
from jax.experimental import pallas as pl
from jax.experimental.pallas import tpu as pltpu

NEG_SLOPE = 0.01  # PyTorch LeakyReLU default


def _leaky_relu(x):
    return jnp.where(x > 0, x, NEG_SLOPE * x)


def _round_up(v, m):
    return ((v + m - 1) // m) * m


def _vmem_limit(nbytes):
    # 2x headroom, floor 8 MiB, cap at v7x physical VMEM (64 MiB).
    return int(min(max(2 * nbytes, 8 * 1024 * 1024), 64 * 1024 * 1024))


def _encode(x, w0, b0):
    """First Linear + LeakyReLU, kept in plain JAX (K=3 matmul is not MXU work)."""
    return _leaky_relu(jnp.dot(x, w0, precision=jax.lax.Precision.HIGHEST) + b0)


# --------------------------------------------------------------------------- kernels
def gru_layer_kernel(h_all_ref, adj_ref, h_blk_ref, max_blk_ref,
                     wih_ref, whh_ref, brz_ref, bin_ref, bhn_ref,
                     h_out_ref, h_bf16_out_ref, max_out_ref, *, embedding_dim):
    """One Encoder_Block (GCN aggregation + 1-step GRU + running max) for a row block."""
    E = embedding_dim

    # GCN aggregation: (TM, N) bf16 @ (N, E) bf16 -> f32 (MXU, f32 accumulation).
    agg = jnp.dot(adj_ref[...], h_all_ref[...], preferred_element_type=jnp.float32)

    h_prev = h_blk_ref[...]                                          # f32 [TM, E]

    gi = jnp.dot(agg.astype(jnp.bfloat16), wih_ref[...],
                 preferred_element_type=jnp.float32)                 # [TM, 3E]
    gh = jnp.dot(h_prev.astype(jnp.bfloat16), whh_ref[...],
                 preferred_element_type=jnp.float32)                 # [TM, 3E]

    # PyTorch GRU gate order (r, z, n); r/z biases are pre-folded into brz.
    rz = jax.nn.sigmoid(gi[:, :2 * E] + gh[:, :2 * E] + brz_ref[...])
    r, z = rz[:, :E], rz[:, E:]
    n = jnp.tanh(gi[:, 2 * E:] + bin_ref[...] + r * (gh[:, 2 * E:] + bhn_ref[...]))
    h_new = (1.0 - z) * n + z * h_prev

    h_out_ref[...] = h_new
    h_bf16_out_ref[...] = h_new.astype(jnp.bfloat16)
    max_out_ref[...] = jnp.maximum(max_blk_ref[...], h_new)


def decoder_kernel(max_ref, wd1_ref, bd1_ref, wd2_ref, bd2_ref, out_ref):
    """Linear -> LeakyReLU -> Linear with hidden/output dims padded to 128 lanes."""
    d = jnp.dot(max_ref[...], wd1_ref[...], preferred_element_type=jnp.float32) + bd1_ref[...]
    d = _leaky_relu(d)
    out_ref[...] = jnp.dot(d, wd2_ref[...], preferred_element_type=jnp.float32) + bd2_ref[...]


# --------------------------------------------------------------------------- wrapper
def drbc_forward(x, norm_adj, params, *, layer_nums, embedding_dim, tm=128):
    assert layer_nums >= 1, "DrBC needs at least one encoder block (max over layers)"
    n = x.shape[0]
    E = embedding_dim
    n_pad = _round_up(max(n, tm), tm)
    n_blocks = n_pad // tm

    # Zero-pad nodes: padded rows/cols of the adjacency are zero, so padded nodes
    # never influence real nodes; their (finite) embeddings are sliced away at the end.
    x_pad = jnp.zeros((n_pad, x.shape[1]), jnp.float32).at[:n].set(x)
    adj_bf16 = jnp.zeros((n_pad, n_pad), jnp.bfloat16).at[:n, :n].set(
        norm_adj.astype(jnp.bfloat16))

    # ---- parameter prep: bf16 weights for the MXU, pre-folded r/z biases ----
    wih_bf16 = params["wih"].astype(jnp.bfloat16)                       # [L, E, 3E]
    whh_bf16 = params["whh"].astype(jnp.bfloat16)                       # [L, E, 3E]
    b_rz = params["bih"][:, :, :2 * E] + params["bhh"][:, :, :2 * E]    # [L, 1, 2E]
    b_in = params["bih"][:, :, 2 * E:]                                  # [L, 1, E]
    b_hn = params["bhh"][:, :, 2 * E:]                                  # [L, 1, E]

    # ---- encoder first Linear (plain JAX; see review) ----
    h = _encode(x_pad, params["w0"], params["b0"])                      # f32 [n_pad, E]
    h_bf16 = h.astype(jnp.bfloat16)
    max_out = jnp.full((n_pad, E), -jnp.inf, jnp.float32)

    # VMEM budget for a layer call (resident h + double-buffered streamed blocks).
    layer_bytes = (n_pad * E * 2                          # resident h_all (bf16)
                   + 2 * tm * n_pad * 2                   # adj row block (bf16, 2-buf)
                   + 2 * 2 * tm * E * 4                   # h_blk + max_blk inputs (2-buf)
                   + 2 * (2 * tm * E * 4 + tm * E * 2)    # f32 + bf16 outputs (2-buf)
                   + 2 * E * 3 * E * 2                    # W_ih / W_hh (bf16)
                   + 4 * E * 4 * 2)                       # biases (f32)
    layer_compiler_params = pltpu.CompilerParams(
        dimension_semantics=("parallel",),
        vmem_limit_bytes=_vmem_limit(layer_bytes),
    )

    row_blk = pl.BlockSpec((tm, E), lambda i: (i, 0))

    def full(shape):
        return pl.BlockSpec(shape, lambda i: (0, 0))

    layer_call = pl.pallas_call(
        functools.partial(gru_layer_kernel, embedding_dim=E),
        grid=(n_blocks,),
        in_specs=[
            full((n_pad, E)),                              # h_all (bf16), VMEM-resident
            pl.BlockSpec((tm, n_pad), lambda i: (i, 0)),   # streamed adjacency row block
            row_blk,                                       # h_prev row block (f32)
            row_blk,                                       # running max row block (f32)
            full((E, 3 * E)),                              # W_ih (bf16)
            full((E, 3 * E)),                              # W_hh (bf16)
            full((1, 2 * E)),                              # folded r/z bias
            full((1, E)),                                  # b_ih[n]
            full((1, E)),                                  # b_hh[n]
        ],
        out_specs=(row_blk, row_blk, row_blk),
        out_shape=(
            jax.ShapeDtypeStruct((n_pad, E), jnp.float32),     # h_new (f32)
            jax.ShapeDtypeStruct((n_pad, E), jnp.bfloat16),    # h_new (bf16, next layer)
            jax.ShapeDtypeStruct((n_pad, E), jnp.float32),     # running max
        ),
        compiler_params=layer_compiler_params,
    )

    for l in range(layer_nums):
        h, h_bf16, max_out = layer_call(
            h_bf16, adj_bf16, h, max_out,
            wih_bf16[l], whh_bf16[l], b_rz[l], b_in[l], b_hn[l])

    # ---- decoder: pad hidden 54 -> 128, lane-dense (n_pad, 128) output ----
    hidden = params["wd1"].shape[1]
    hp = _round_up(hidden, 128)
    wd1_pad = jnp.zeros((E, hp), jnp.float32).at[:, :hidden].set(params["wd1"])
    bd1_pad = jnp.zeros((1, hp), jnp.float32).at[:, :hidden].set(params["bd1"])
    wd2_pad = jnp.zeros((hp, 128), jnp.float32).at[:hidden, 0].set(params["wd2"][:, 0])
    bd2_pad = jnp.zeros((1, 128), jnp.float32).at[0, 0].set(params["bd2"][0, 0])

    dec_bytes = (2 * tm * E * 4 + E * hp * 4 + hp * 128 * 4
                 + (hp + 128) * 4 + 2 * tm * 128 * 4)
    out_pad = pl.pallas_call(
        decoder_kernel,
        grid=(n_blocks,),
        in_specs=[
            row_blk,
            full((E, hp)),
            full((1, hp)),
            full((hp, 128)),
            full((1, 128)),
        ],
        out_specs=pl.BlockSpec((tm, 128), lambda i: (i, 0)),
        out_shape=jax.ShapeDtypeStruct((n_pad, 128), jnp.float32),
        compiler_params=pltpu.CompilerParams(
            dimension_semantics=("parallel",),
            vmem_limit_bytes=_vmem_limit(dec_bytes),
        ),
    )(max_out, wd1_pad, bd1_pad, wd2_pad, bd2_pad)

    return out_pad[:n, :1]


# --------------------------------------------------------------------------- graph prep
def build_norm_adj(edge_index, num_nodes):
    """Dense normalized adjacency matching the GCNConv-with-self-loops semantics.

    out[i] = sum_{edges e with col[e]==i} deg^-0.5[row[e]] * deg^-0.5[col[e]] * x[row[e]]
    """
    row, col = edge_index[0], edge_index[1]
    loops = jnp.arange(num_nodes, dtype=row.dtype)
    row = jnp.concatenate([row, loops])
    col = jnp.concatenate([col, loops])
    deg = jnp.zeros((num_nodes,), jnp.float32).at[row].add(1.0)
    deg_inv_sqrt = deg ** -0.5
    norm = deg_inv_sqrt[row] * deg_inv_sqrt[col]
    adj = jnp.zeros((num_nodes, num_nodes), jnp.float32).at[col, row].add(norm)
    return adj


def init_params(key, input_dim, embedding_dim, hidden_dim, layer_nums):
    ks = jax.random.split(key, 12)
    s = 0.1
    return {
        "w0":  s * jax.random.normal(ks[0], (input_dim, embedding_dim), jnp.float32),
        "b0":  s * jax.random.normal(ks[1], (1, embedding_dim), jnp.float32),
        # GRU weights stored transposed: [L, in, 3*hidden] with gate order (r, z, n)
        "wih": s * jax.random.normal(ks[2], (layer_nums, embedding_dim, 3 * embedding_dim), jnp.float32),
        "whh": s * jax.random.normal(ks[3], (layer_nums, embedding_dim, 3 * embedding_dim), jnp.float32),
        "bih": s * jax.random.normal(ks[4], (layer_nums, 1, 3 * embedding_dim), jnp.float32),
        "bhh": s * jax.random.normal(ks[5], (layer_nums, 1, 3 * embedding_dim), jnp.float32),
        "wd1": s * jax.random.normal(ks[6], (embedding_dim, hidden_dim), jnp.float32),
        "bd1": s * jax.random.normal(ks[7], (1, hidden_dim), jnp.float32),
        "wd2": s * jax.random.normal(ks[8], (hidden_dim, 1), jnp.float32),
        "bd2": s * jax.random.normal(ks[9], (1, 1), jnp.float32),
    }


# --------------------------------------------------------------------------- reference
def drbc_ref(x, adj, params, *, layer_nums, embedding_dim):
    """Pure-f32 JAX reference mirroring the PyTorch module semantics."""
    E = embedding_dim
    dot = functools.partial(jnp.dot, precision=jax.lax.Precision.HIGHEST)
    h = _encode(x, params["w0"], params["b0"])
    max_out = jnp.full_like(h, -jnp.inf)
    for l in range(layer_nums):
        agg = dot(adj, h)
        gi = dot(agg, params["wih"][l]) + params["bih"][l]
        gh = dot(h, params["whh"][l]) + params["bhh"][l]
        r = jax.nn.sigmoid(gi[:, :E] + gh[:, :E])
        z = jax.nn.sigmoid(gi[:, E:2 * E] + gh[:, E:2 * E])
        n = jnp.tanh(gi[:, 2 * E:] + r * gh[:, 2 * E:])
        h = (1.0 - z) * n + z * h
        max_out = jnp.maximum(max_out, h)
    d = _leaky_relu(dot(max_out, params["wd1"]) + params["bd1"])
    return dot(d, params["wd2"]) + params["bd2"]


if __name__ == "__main__":
    INPUT_DIM = 3
    EMBEDDING_DIM = 128
    HIDDEN_DIM = 54
    LAYER_NUMS = 5
    N_NODES = 200        # not a multiple of 128 -> exercises padding + a 2-block grid

    key = jax.random.PRNGKey(0)
    k_x, k_e, k_p = jax.random.split(key, 3)

    # node features: [N, input_dim]
    x = jax.random.normal(k_x, (N_NODES, INPUT_DIM), jnp.float32)

    # deterministic small graph: directed ring + random chords, edge_index [2, E]
    ring_src = jnp.arange(N_NODES, dtype=jnp.int32)
    ring_dst = (ring_src + 1) % N_NODES
    chords = jax.random.randint(k_e, (2, 48), 0, N_NODES, dtype=jnp.int32)
    edge_index = jnp.concatenate([jnp.stack([ring_src, ring_dst]), chords], axis=1)

    norm_adj = build_norm_adj(edge_index, N_NODES)
    params = init_params(k_p, INPUT_DIM, EMBEDDING_DIM, HIDDEN_DIM, LAYER_NUMS)

    fwd = jax.jit(functools.partial(drbc_forward,
                                    layer_nums=LAYER_NUMS,
                                    embedding_dim=EMBEDDING_DIM))
    out = jax.block_until_ready(fwd(x, norm_adj, params))

    # Compare against the full-f32 reference.  The kernel runs its matmuls in
    # bf16 (f32 accumulation), so the tolerance is loosened accordingly.
    ref = drbc_ref(x, norm_adj, params,
                   layer_nums=LAYER_NUMS, embedding_dim=EMBEDDING_DIM)
    np.testing.assert_allclose(np.asarray(out), np.asarray(ref), rtol=5e-2, atol=2e-2)

    print("KERNEL_OK")
</pallas_src>

<mosaic_0001>
module attributes {stable_mosaic.version = 11 : i64} {
  func.func @gru_layer_kernel(%arg0: i32, %arg1: memref<256x128xbf16, #tpu.memory_space<vmem>>, %arg2: memref<128x256xbf16, #tpu.memory_space<vmem>>, %arg3: memref<128x128xf32, #tpu.memory_space<vmem>>, %arg4: memref<128x128xf32, #tpu.memory_space<vmem>>, %arg5: memref<128x384xbf16, #tpu.memory_space<vmem>>, %arg6: memref<128x384xbf16, #tpu.memory_space<vmem>>, %arg7: memref<1x256xf32, #tpu.memory_space<vmem>>, %arg8: memref<1x128xf32, #tpu.memory_space<vmem>>, %arg9: memref<1x128xf32, #tpu.memory_space<vmem>>, %arg10: memref<128x128xf32, #tpu.memory_space<vmem>>, %arg11: memref<128x128xbf16, #tpu.memory_space<vmem>>, %arg12: memref<128x128xf32, #tpu.memory_space<vmem>>) attributes {dimension_semantics = [#tpu.dimension_semantics<parallel>], iteration_bounds = array<i64: 2>, scalar_prefetch = 0 : i64, scratch_operands = 0 : i64, tpu.core_type = #tpu.core_type<tc>, window_params = [{pipeline_mode = #tpu.pipeline_mode<synchronous>, transform_indices = @transform_0, window_bounds = array<i64: 256, 128>}, {transform_indices = @transform_1, window_bounds = array<i64: 128, 256>}, {transform_indices = @transform_2, window_bounds = array<i64: 128, 128>}, {transform_indices = @transform_3, window_bounds = array<i64: 128, 128>}, {pipeline_mode = #tpu.pipeline_mode<synchronous>, transform_indices = @transform_4, window_bounds = array<i64: 128, 384>}, {pipeline_mode = #tpu.pipeline_mode<synchronous>, transform_indices = @transform_5, window_bounds = array<i64: 128, 384>}, {pipeline_mode = #tpu.pipeline_mode<synchronous>, transform_indices = @transform_6, window_bounds = array<i64: 1, 256>}, {pipeline_mode = #tpu.pipeline_mode<synchronous>, transform_indices = @transform_7, window_bounds = array<i64: 1, 128>}, {pipeline_mode = #tpu.pipeline_mode<synchronous>, transform_indices = @transform_8, window_bounds = array<i64: 1, 128>}, {transform_indices = @transform_9, window_bounds = array<i64: 128, 128>}, {transform_indices = @transform_10, window_bounds = array<i64: 128, 128>}, {transform_indices = @transform_11, window_bounds = array<i64: 128, 128>}]} {
    %c0 = arith.constant 0 : index
    %c0_0 = arith.constant 0 : index
    %0 = vector.load %arg2[%c0, %c0_0] : memref<128x256xbf16, #tpu.memory_space<vmem>>, vector<128x256xbf16>
    %c0_1 = arith.constant 0 : index
    %c0_2 = arith.constant 0 : index
    %1 = vector.load %arg1[%c0_1, %c0_2] : memref<256x128xbf16, #tpu.memory_space<vmem>>, vector<256x128xbf16>
    %cst = arith.constant dense<0.000000e+00> : vector<128x128xf32>
    %2 = tpu.matmul %0, %1, %cst {dimension_numbers = #tpu.dot_dimension_numbers<[1], [0], [0], [1], [0, 0, 1, 1], [], []>} : vector<128x256xbf16>, vector<256x128xbf16>, vector<128x128xf32> -> vector<128x128xf32>
    %c0_3 = arith.constant 0 : index
    %c0_4 = arith.constant 0 : index
    %3 = vector.load %arg3[%c0_3, %c0_4] : memref<128x128xf32, #tpu.memory_space<vmem>>, vector<128x128xf32>
    %4 = arith.truncf %2 : vector<128x128xf32> to vector<128x128xbf16>
    %c0_5 = arith.constant 0 : index
    %c0_6 = arith.constant 0 : index
    %5 = vector.load %arg5[%c0_5, %c0_6] : memref<128x384xbf16, #tpu.memory_space<vmem>>, vector<128x384xbf16>
    %cst_7 = arith.constant dense<0.000000e+00> : vector<128x384xf32>
    %6 = tpu.matmul %4, %5, %cst_7 {dimension_numbers = #tpu.dot_dimension_numbers<[1], [0], [0], [1], [0, 0, 1, 1], [], []>} : vector<128x128xbf16>, vector<128x384xbf16>, vector<128x384xf32> -> vector<128x384xf32>
    %7 = arith.truncf %3 : vector<128x128xf32> to vector<128x128xbf16>
    %c0_8 = arith.constant 0 : index
    %c0_9 = arith.constant 0 : index
    %8 = vector.load %arg6[%c0_8, %c0_9] : memref<128x384xbf16, #tpu.memory_space<vmem>>, vector<128x384xbf16>
    %cst_10 = arith.constant dense<0.000000e+00> : vector<128x384xf32>
    %9 = tpu.matmul %7, %8, %cst_10 {dimension_numbers = #tpu.dot_dimension_numbers<[1], [0], [0], [1], [0, 0, 1, 1], [], []>} : vector<128x128xbf16>, vector<128x384xbf16>, vector<128x384xf32> -> vector<128x384xf32>
    %10 = vector.extract_strided_slice %6 {offsets = [0, 0], sizes = [128, 256], strides = [1, 1]} : vector<128x384xf32> to vector<128x256xf32>
    %11 = vector.extract_strided_slice %9 {offsets = [0, 0], sizes = [128, 256], strides = [1, 1]} : vector<128x384xf32> to vector<128x256xf32>
    %12 = arith.addf %10, %11 : vector<128x256xf32>
    %c0_11 = arith.constant 0 : index
    %c0_12 = arith.constant 0 : index
    %13 = vector.load %arg7[%c0_11, %c0_12] : memref<1x256xf32, #tpu.memory_space<vmem>>, vector<1x256xf32>
    %14 = vector.broadcast %13 : vector<1x256xf32> to vector<128x256xf32>
    %15 = arith.addf %12, %14 : vector<128x256xf32>
    %16 = arith.negf %15 : vector<128x256xf32>
    %17 = math.exp %16 : vector<128x256xf32>
    %cst_13 = arith.constant 1.000000e+00 : f32
    %18 = vector.broadcast %cst_13 : f32 to vector<128x256xf32>
    %19 = arith.addf %18, %17 : vector<128x256xf32>
    %20 = arith.divf %18, %19 : vector<128x256xf32>
    %21 = vector.extract_strided_slice %20 {offsets = [0, 0], sizes = [128, 128], strides = [1, 1]} : vector<128x256xf32> to vector<128x128xf32>
    %22 = vector.extract_strided_slice %20 {offsets = [0, 128], sizes = [128, 128], strides = [1, 1]} : vector<128x256xf32> to vector<128x128xf32>
    %23 = vector.extract_strided_slice %6 {offsets = [0, 256], sizes = [128, 128], strides = [1, 1]} : vector<128x384xf32> to vector<128x128xf32>
    %c0_14 = arith.constant 0 : index
    %c0_15 = arith.constant 0 : index
    %24 = vector.load %arg8[%c0_14, %c0_15] : memref<1x128xf32, #tpu.memory_space<vmem>>, vector<1x128xf32>
    %25 = vector.broadcast %24 : vector<1x128xf32> to vector<128x128xf32>
    %26 = arith.addf %23, %25 : vector<128x128xf32>
    %27 = vector.extract_strided_slice %9 {offsets = [0, 256], sizes = [128, 128], strides = [1, 1]} : vector<128x384xf32> to vector<128x128xf32>
    %c0_16 = arith.constant 0 : index
    %c0_17 = arith.constant 0 : index
    %28 = vector.load %arg9[%c0_16, %c0_17] : memref<1x128xf32, #tpu.memory_space<vmem>>, vector<1x128xf32>
    %29 = vector.broadcast %28 : vector<1x128xf32> to vector<128x128xf32>
    %30 = arith.addf %27, %29 : vector<128x128xf32>
    %31 = arith.mulf %21, %30 : vector<128x128xf32>
    %32 = arith.addf %26, %31 : vector<128x128xf32>
    %33 = math.tanh %32 : vector<128x128xf32>
    %cst_18 = arith.constant 1.000000e+00 : f32
    %34 = vector.broadcast %cst_18 : f32 to vector<128x128xf32>
    %35 = arith.subf %34, %22 : vector<128x128xf32>
    %36 = arith.mulf %35, %33 : vector<128x128xf32>
    %37 = arith.mulf %22, %3 : vector<128x128xf32>
    %38 = arith.addf %36, %37 : vector<128x128xf32>
    %c0_19 = arith.constant 0 : index
    %c0_20 = arith.constant 0 : index
    %39 = vector.load %arg10[%c0_19, %c0_20] : memref<128x128xf32, #tpu.memory_space<vmem>>, vector<128x128xf32>
    tpu.vector_store %arg10[%c0_19, %c0_20], %38 {strides = array<i32>} : memref<128x128xf32, #tpu.memory_space<vmem>>, vector<128x128xf32>,
    %40 = arith.truncf %38 : vector<128x128xf32> to vector<128x128xbf16>
    %c0_21 = arith.constant 0 : index
    %c0_22 = arith.constant 0 : index
    %41 = vector.load %arg11[%c0_21, %c0_22] : memref<128x128xbf16, #tpu.memory_space<vmem>>, vector<128x128xbf16>
    tpu.vector_store %arg11[%c0_21, %c0_22], %40 {strides = array<i32>} : memref<128x128xbf16, #tpu.memory_space<vmem>>, vector<128x128xbf16>,
    %c0_23 = arith.constant 0 : index
    %c0_24 = arith.constant 0 : index
    %42 = vector.load %arg4[%c0_23, %c0_24] : memref<128x128xf32, #tpu.memory_space<vmem>>, vector<128x128xf32>
    %43 = arith.maximumf %42, %38 : vector<128x128xf32>
    %c0_25 = arith.constant 0 : index
    %c0_26 = arith.constant 0 : index
    %44 = vector.load %arg12[%c0_25, %c0_26] : memref<128x128xf32, #tpu.memory_space<vmem>>, vector<128x128xf32>
    tpu.vector_store %arg12[%c0_25, %c0_26], %43 {strides = array<i32>} : memref<128x128xf32, #tpu.memory_space<vmem>>, vector<128x128xf32>,
    return
  }
  func.func @transform_0(%arg0: i32) -> (i32, i32) {
    %c0_i32 = arith.constant 0 : i32
    %c0_i32_0 = arith.constant 0 : i32
    %c0_i32_1 = arith.constant 0 : i32
    return %c0_i32, %c0_i32_0 : i32, i32
  }
  func.func @transform_1(%arg0: i32) -> (i32, i32) {
    %c0_i32 = arith.constant 0 : i32
    %c0_i32_0 = arith.constant 0 : i32
    return %arg0, %c0_i32 : i32, i32
  }
  func.func @transform_2(%arg0: i32) -> (i32, i32) {
    %c0_i32 = arith.constant 0 : i32
    %c0_i32_0 = arith.constant 0 : i32
    return %arg0, %c0_i32 : i32, i32
  }
  func.func @transform_3(%arg0: i32) -> (i32, i32) {
    %c0_i32 = arith.constant 0 : i32
    %c0_i32_0 = arith.constant 0 : i32
    return %arg0, %c0_i32 : i32, i32
  }
  func.func @transform_4(%arg0: i32) -> (i32, i32) {
    %c0_i32 = arith.constant 0 : i32
    %c0_i32_0 = arith.constant 0 : i32
    %c0_i32_1 = arith.constant 0 : i32
    return %c0_i32, %c0_i32_0 : i32, i32
  }
  func.func @transform_5(%arg0: i32) -> (i32, i32) {
    %c0_i32 = arith.constant 0 : i32
    %c0_i32_0 = arith.constant 0 : i32
    %c0_i32_1 = arith.constant 0 : i32
    return %c0_i32, %c0_i32_0 : i32, i32
  }
  func.func @transform_6(%arg0: i32) -> (i32, i32) {
    %c0_i32 = arith.constant 0 : i32
    %c0_i32_0 = arith.constant 0 : i32
    %c0_i32_1 = arith.constant 0 : i32
    return %c0_i32, %c0_i32_0 : i32, i32
  }
  func.func @transform_7(%arg0: i32) -> (i32, i32) {
    %c0_i32 = arith.constant 0 : i32
    %c0_i32_0 = arith.constant 0 : i32
    %c0_i32_1 = arith.constant 0 : i32
    return %c0_i32, %c0_i32_0 : i32, i32
  }
  func.func @transform_8(%arg0: i32) -> (i32, i32) {
    %c0_i32 = arith.constant 0 : i32
    %c0_i32_0 = arith.constant 0 : i32
    %c0_i32_1 = arith.constant 0 : i32
    return %c0_i32, %c0_i32_0 : i32, i32
  }
  func.func @transform_9(%arg0: i32) -> (i32, i32) {
    %c0_i32 = arith.constant 0 : i32
    %c0_i32_0 = arith.constant 0 : i32
    return %arg0, %c0_i32 : i32, i32
  }
  func.func @transform_10(%arg0: i32) -> (i32, i32) {
    %c0_i32 = arith.constant 0 : i32
    %c0_i32_0 = arith.constant 0 : i32
    return %arg0, %c0_i32 : i32, i32
  }
  func.func @transform_11(%arg0: i32) -> (i32, i32) {
    %c0_i32 = arith.constant 0 : i32
    %c0_i32_0 = arith.constant 0 : i32
    return %arg0, %c0_i32 : i32, i32
  }
}

module attributes {stable_mosaic.version = 11 : i64} {
  func.func @gru_layer_kernel(%arg0: i32, %arg1: memref<256x128xbf16, #tpu.memory_space<vmem>>, %arg2: memref<128x256xbf16, #tpu.memory_space<vmem>>, %arg3: memref<128x128xf32, #tpu.memory_space<vmem>>, %arg4: memref<128x128xf32, #tpu.memory_space<vmem>>, %arg5: memref<128x384xbf16, #tpu.memory_space<vmem>>, %arg6: memref<128x384xbf16, #tpu.memory_space<vmem>>, %arg7: memref<1x256xf32, #tpu.memory_space<vmem>>, %arg8: memref<1x128xf32, #tpu.memory_space<vmem>>, %arg9: memref<1x128xf32, #tpu.memory_space<vmem>>, %arg10: memref<128x128xf32, #tpu.memory_space<vmem>>, %arg11: memref<128x128xbf16, #tpu.memory_space<vmem>>, %arg12: memref<128x128xf32, #tpu.memory_space<vmem>>) attributes {dimension_semantics = [#tpu.dimension_semantics<parallel>], iteration_bounds = array<i64: 2>, scalar_prefetch = 0 : i64, scratch_operands = 0 : i64, tpu.core_type = #tpu.core_type<tc>, window_params = [{pipeline_mode = #tpu.pipeline_mode<synchronous>, transform_indices = @transform_0, window_bounds = array<i64: 256, 128>}, {transform_indices = @transform_1, window_bounds = array<i64: 128, 256>}, {transform_indices = @transform_2, window_bounds = array<i64: 128, 128>}, {transform_indices = @transform_3, window_bounds = array<i64: 128, 128>}, {pipeline_mode = #tpu.pipeline_mode<synchronous>, transform_indices = @transform_4, window_bounds = array<i64: 128, 384>}, {pipeline_mode = #tpu.pipeline_mode<synchronous>, transform_indices = @transform_5, window_bounds = array<i64: 128, 384>}, {pipeline_mode = #tpu.pipeline_mode<synchronous>, transform_indices = @transform_6, window_bounds = array<i64: 1, 256>}, {pipeline_mode = #tpu.pipeline_mode<synchronous>, transform_indices = @transform_7, window_bounds = array<i64: 1, 128>}, {pipeline_mode = #tpu.pipeline_mode<synchronous>, transform_indices = @transform_8, window_bounds = array<i64: 1, 128>}, {transform_indices = @transform_9, window_bounds = array<i64: 128, 128>}, {transform_indices = @transform_10, window_bounds = array<i64: 128, 128>}, {transform_indices = @transform_11, window_bounds = array<i64: 128, 128>}]} {
    %c0 = arith.constant 0 : index
    %c0_0 = arith.constant 0 : index
    %0 = vector.load %arg2[%c0, %c0_0] : memref<128x256xbf16, #tpu.memory_space<vmem>>, vector<128x256xbf16>
    %c0_1 = arith.constant 0 : index
    %c0_2 = arith.constant 0 : index
    %1 = vector.load %arg1[%c0_1, %c0_2] : memref<256x128xbf16, #tpu.memory_space<vmem>>, vector<256x128xbf16>
    %cst = arith.constant dense<0.000000e+00> : vector<128x128xf32>
    %2 = tpu.matmul %0, %1, %cst {dimension_numbers = #tpu.dot_dimension_numbers<[1], [0], [0], [1], [0, 0, 1, 1], [], []>} : vector<128x256xbf16>, vector<256x128xbf16>, vector<128x128xf32> -> vector<128x128xf32>
    %c0_3 = arith.constant 0 : index
    %c0_4 = arith.constant 0 : index
    %3 = vector.load %arg3[%c0_3, %c0_4] : memref<128x128xf32, #tpu.memory_space<vmem>>, vector<128x128xf32>
    %4 = arith.truncf %2 : vector<128x128xf32> to vector<128x128xbf16>
    %c0_5 = arith.constant 0 : index
    %c0_6 = arith.constant 0 : index
    %5 = vector.load %arg5[%c0_5, %c0_6] : memref<128x384xbf16, #tpu.memory_space<vmem>>, vector<128x384xbf16>
    %cst_7 = arith.constant dense<0.000000e+00> : vector<128x384xf32>
    %6 = tpu.matmul %4, %5, %cst_7 {dimension_numbers = #tpu.dot_dimension_numbers<[1], [0], [0], [1], [0, 0, 1, 1], [], []>} : vector<128x128xbf16>, vector<128x384xbf16>, vector<128x384xf32> -> vector<128x384xf32>
    %7 = arith.truncf %3 : vector<128x128xf32> to vector<128x128xbf16>
    %c0_8 = arith.constant 0 : index
    %c0_9 = arith.constant 0 : index
    %8 = vector.load %arg6[%c0_8, %c0_9] : memref<128x384xbf16, #tpu.memory_space<vmem>>, vector<128x384xbf16>
    %cst_10 = arith.constant dense<0.000000e+00> : vector<128x384xf32>
    %9 = tpu.matmul %7, %8, %cst_10 {dimension_numbers = #tpu.dot_dimension_numbers<[1], [0], [0], [1], [0, 0, 1, 1], [], []>} : vector<128x128xbf16>, vector<128x384xbf16>, vector<128x384xf32> -> vector<128x384xf32>
    %10 = vector.extract_strided_slice %6 {offsets = [0, 0], sizes = [128, 256], strides = [1, 1]} : vector<128x384xf32> to vector<128x256xf32>
    %11 = vector.extract_strided_slice %9 {offsets = [0, 0], sizes = [128, 256], strides = [1, 1]} : vector<128x384xf32> to vector<128x256xf32>
    %12 = arith.addf %10, %11 : vector<128x256xf32>
    %c0_11 = arith.constant 0 : index
    %c0_12 = arith.constant 0 : index
    %13 = vector.load %arg7[%c0_11, %c0_12] : memref<1x256xf32, #tpu.memory_space<vmem>>, vector<1x256xf32>
    %14 = vector.broadcast %13 : vector<1x256xf32> to vector<128x256xf32>
    %15 = arith.addf %12, %14 : vector<128x256xf32>
    %16 = arith.negf %15 : vector<128x256xf32>
    %17 = math.exp %16 : vector<128x256xf32>
    %cst_13 = arith.constant 1.000000e+00 : f32
    %18 = vector.broadcast %cst_13 : f32 to vector<128x256xf32>
    %19 = arith.addf %18, %17 : vector<128x256xf32>
    %20 = arith.divf %18, %19 : vector<128x256xf32>
    %21 = vector.extract_strided_slice %20 {offsets = [0, 0], sizes = [128, 128], strides = [1, 1]} : vector<128x256xf32> to vector<128x128xf32>
    %22 = vector.extract_strided_slice %20 {offsets = [0, 128], sizes = [128, 128], strides = [1, 1]} : vector<128x256xf32> to vector<128x128xf32>
    %23 = vector.extract_strided_slice %6 {offsets = [0, 256], sizes = [128, 128], strides = [1, 1]} : vector<128x384xf32> to vector<128x128xf32>
    %c0_14 = arith.constant 0 : index
    %c0_15 = arith.constant 0 : index
    %24 = vector.load %arg8[%c0_14, %c0_15] : memref<1x128xf32, #tpu.memory_space<vmem>>, vector<1x128xf32>
    %25 = vector.broadcast %24 : vector<1x128xf32> to vector<128x128xf32>
    %26 = arith.addf %23, %25 : vector<128x128xf32>
    %27 = vector.extract_strided_slice %9 {offsets = [0, 256], sizes = [128, 128], strides = [1, 1]} : vector<128x384xf32> to vector<128x128xf32>
    %c0_16 = arith.constant 0 : index
    %c0_17 = arith.constant 0 : index
    %28 = vector.load %arg9[%c0_16, %c0_17] : memref<1x128xf32, #tpu.memory_space<vmem>>, vector<1x128xf32>
    %29 = vector.broadcast %28 : vector<1x128xf32> to vector<128x128xf32>
    %30 = arith.addf %27, %29 : vector<128x128xf32>
    %31 = arith.mulf %21, %30 : vector<128x128xf32>
    %32 = arith.addf %26, %31 : vector<128x128xf32>
    %33 = math.tanh %32 : vector<128x128xf32>
    %cst_18 = arith.constant 1.000000e+00 : f32
    %34 = vector.broadcast %cst_18 : f32 to vector<128x128xf32>
    %35 = arith.subf %34, %22 : vector<128x128xf32>
    %36 = arith.mulf %35, %33 : vector<128x128xf32>
    %37 = arith.mulf %22, %3 : vector<128x128xf32>
    %38 = arith.addf %36, %37 : vector<128x128xf32>
    %c0_19 = arith.constant 0 : index
    %c0_20 = arith.constant 0 : index
    %39 = vector.load %arg10[%c0_19, %c0_20] : memref<128x128xf32, #tpu.memory_space<vmem>>, vector<128x128xf32>
    tpu.vector_store %arg10[%c0_19, %c0_20], %38 {strides = array<i32>} : memref<128x128xf32, #tpu.memory_space<vmem>>, vector<128x128xf32>,
    %40 = arith.truncf %38 : vector<128x128xf32> to vector<128x128xbf16>
    %c0_21 = arith.constant 0 : index
    %c0_22 = arith.constant 0 : index
    %41 = vector.load %arg11[%c0_21, %c0_22] : memref<128x128xbf16, #tpu.memory_space<vmem>>, vector<128x128xbf16>
    tpu.vector_store %arg11[%c0_21, %c0_22], %40 {strides = array<i32>} : memref<128x128xbf16, #tpu.memory_space<vmem>>, vector<128x128xbf16>,
    %c0_23 = arith.constant 0 : index
    %c0_24 = arith.constant 0 : index
    %42 = vector.load %arg4[%c0_23, %c0_24] : memref<128x128xf32, #tpu.memory_space<vmem>>, vector<128x128xf32>
    %43 = arith.maximumf %42, %38 : vector<128x128xf32>
    %c0_25 = arith.constant 0 : index
    %c0_26 = arith.constant 0 : index
    %44 = vector.load %arg12[%c0_25, %c0_26] : memref<128x128xf32, #tpu.memory_space<vmem>>, vector<128x128xf32>
    tpu.vector_store %arg12[%c0_25, %c0_26], %43 {strides = array<i32>} : memref<128x128xf32, #tpu.memory_space<vmem>>, vector<128x128xf32>,
    return
  }
  func.func @transform_0(%arg0: i32) -> (i32, i32) {
    %c0_i32 = arith.constant 0 : i32
    %c0_i32_0 = arith.constant 0 : i32
    %c0_i32_1 = arith.constant 0 : i32
    return %c0_i32, %c0_i32_0 : i32, i32
  }
  func.func @transform_1(%arg0: i32) -> (i32, i32) {
    %c0_i32 = arith.constant 0 : i32
    %c0_i32_0 = arith.constant 0 : i32
    return %arg0, %c0_i32 : i32, i32
  }
  func.func @transform_2(%arg0: i32) -> (i32, i32) {
    %c0_i32 = arith.constant 0 : i32
    %c0_i32_0 = arith.constant 0 : i32
    return %arg0, %c0_i32 : i32, i32
  }
  func.func @transform_3(%arg0: i32) -> (i32, i32) {
    %c0_i32 = arith.constant 0 : i32
    %c0_i32_0 = arith.constant 0 : i32
    return %arg0, %c0_i32 : i32, i32
  }
  func.func @transform_4(%arg0: i32) -> (i32, i32) {
    %c0_i32 = arith.constant 0 : i32
    %c0_i32_0 = arith.constant 0 : i32
    %c0_i32_1 = arith.constant 0 : i32
    return %c0_i32, %c0_i32_0 : i32, i32
  }
  func.func @transform_5(%arg0: i32) -> (i32, i32) {
    %c0_i32 = arith.constant 0 : i32
    %c0_i32_0 = arith.constant 0 : i32
    %c0_i32_1 = arith.constant 0 : i32
    return %c0_i32, %c0_i32_0 : i32, i32
  }
  func.func @transform_6(%arg0: i32) -> (i32, i32) {
    %c0_i32 = arith.constant 0 : i32
    %c0_i32_0 = arith.constant 0 : i32
    %c0_i32_1 = arith.constant 0 : i32
    return %c0_i32, %c0_i32_0 : i32, i32
  }
  func.func @transform_7(%arg0: i32) -> (i32, i32) {
    %c0_i32 = arith.constant 0 : i32
    %c0_i32_0 = arith.constant 0 : i32
    %c0_i32_1 = arith.constant 0 : i32
    return %c0_i32, %c0_i32_0 : i32, i32
  }
  func.func @transform_8(%arg0: i32) -> (i32, i32) {
    %c0_i32 = arith.constant 0 : i32
    %c0_i32_0 = arith.constant 0 : i32
    %c0_i32_1 = arith.constant 0 : i32
    return %c0_i32, %c0_i32_0 : i32, i32
  }
  func.func @transform_9(%arg0: i32) -> (i32, i32) {
    %c0_i32 = arith.constant 0 : i32
    %c0_i32_0 = arith.constant 0 : i32
    return %arg0, %c0_i32 : i32, i32
  }
  func.func @transform_10(%arg0: i32) -> (i32, i32) {
    %c0_i32 = arith.constant 0 : i32
    %c0_i32_0 = arith.constant 0 : i32
    return %arg0, %c0_i32 : i32, i32
  }
  func.func @transform_11(%arg0: i32) -> (i32, i32) {
    %c0_i32 = arith.constant 0 : i32
    %c0_i32_0 = arith.constant 0 : i32
    return %arg0, %c0_i32 : i32, i32
  }
}

module attributes {stable_mosaic.version = 11 : i64} {
  func.func @decoder_kernel(%arg0: i32, %arg1: memref<128x128xf32, #tpu.memory_space<vmem>>, %arg2: memref<128x128xf32, #tpu.memory_space<vmem>>, %arg3: memref<1x128xf32, #tpu.memory_space<vmem>>, %arg4: memref<128x128xf32, #tpu.memory_space<vmem>>, %arg5: memref<1x128xf32, #tpu.memory_space<vmem>>, %arg6: memref<128x128xf32, #tpu.memory_space<vmem>>) attributes {dimension_semantics = [#tpu.dimension_semantics<parallel>], iteration_bounds = array<i64: 2>, scalar_prefetch = 0 : i64, scratch_operands = 0 : i64, tpu.core_type = #tpu.core_type<tc>, window_params = [{transform_indices = @transform_0, window_bounds = array<i64: 128, 128>}, {pipeline_mode = #tpu.pipeline_mode<synchronous>, transform_indices = @transform_1, window_bounds = array<i64: 128, 128>}, {pipeline_mode = #tpu.pipeline_mode<synchronous>, transform_indices = @transform_2, window_bounds = array<i64: 1, 128>}, {pipeline_mode = #tpu.pipeline_mode<synchronous>, transform_indices = @transform_3, window_bounds = array<i64: 128, 128>}, {pipeline_mode = #tpu.pipeline_mode<synchronous>, transform_indices = @transform_4, window_bounds = array<i64: 1, 128>}, {transform_indices = @transform_5, window_bounds = array<i64: 128, 128>}]} {
    %c0 = arith.constant 0 : index
    %c0_0 = arith.constant 0 : index
    %0 = vector.load %arg1[%c0, %c0_0] : memref<128x128xf32, #tpu.memory_space<vmem>>, vector<128x128xf32>
    %c0_1 = arith.constant 0 : index
    %c0_2 = arith.constant 0 : index
    %1 = vector.load %arg2[%c0_1, %c0_2] : memref<128x128xf32, #tpu.memory_space<vmem>>, vector<128x128xf32>
    %cst = arith.constant dense<0.000000e+00> : vector<128x128xf32>
    %2 = tpu.matmul %0, %1, %cst {dimension_numbers = #tpu.dot_dimension_numbers<[1], [0], [0], [1], [0, 0, 1, 1], [], []>} : vector<128x128xf32>, vector<128x128xf32>, vector<128x128xf32> -> vector<128x128xf32>
    %c0_3 = arith.constant 0 : index
    %c0_4 = arith.constant 0 : index
    %3 = vector.load %arg3[%c0_3, %c0_4] : memref<1x128xf32, #tpu.memory_space<vmem>>, vector<1x128xf32>
    %4 = vector.broadcast %3 : vector<1x128xf32> to vector<128x128xf32>
    %5 = arith.addf %2, %4 : vector<128x128xf32>
    %cst_5 = arith.constant 0.000000e+00 : f32
    %6 = vector.broadcast %cst_5 : f32 to vector<128x128xf32>
    %7 = arith.cmpf ogt, %5, %6 : vector<128x128xf32>
    %cst_6 = arith.constant 0.00999999977 : f32
    %8 = vector.broadcast %cst_6 : f32 to vector<128x128xf32>
    %9 = arith.mulf %8, %5 : vector<128x128xf32>
    %10 = arith.select %7, %5, %9 : vector<128x128xi1>, vector<128x128xf32>
    %c0_7 = arith.constant 0 : index
    %c0_8 = arith.constant 0 : index
    %11 = vector.load %arg4[%c0_7, %c0_8] : memref<128x128xf32, #tpu.memory_space<vmem>>, vector<128x128xf32>
    %cst_9 = arith.constant dense<0.000000e+00> : vector<128x128xf32>
    %12 = tpu.matmul %10, %11, %cst_9 {dimension_numbers = #tpu.dot_dimension_numbers<[1], [0], [0], [1], [0, 0, 1, 1], [], []>} : vector<128x128xf32>, vector<128x128xf32>, vector<128x128xf32> -> vector<128x128xf32>
    %c0_10 = arith.constant 0 : index
    %c0_11 = arith.constant 0 : index
    %13 = vector.load %arg5[%c0_10, %c0_11] : memref<1x128xf32, #tpu.memory_space<vmem>>, vector<1x128xf32>
    %14 = vector.broadcast %13 : vector<1x128xf32> to vector<128x128xf32>
    %15 = arith.addf %12, %14 : vector<128x128xf32>
    %c0_12 = arith.constant 0 : index
    %c0_13 = arith.constant 0 : index
    %16 = vector.load %arg6[%c0_12, %c0_13] : memref<128x128xf32, #tpu.memory_space<vmem>>, vector<128x128xf32>
    tpu.vector_store %arg6[%c0_12, %c0_13], %15 {strides = array<i32>} : memref<128x128xf32, #tpu.memory_space<vmem>>, vector<128x128xf32>,
    return
  }
  func.func @transform_0(%arg0: i32) -> (i32, i32) {
    %c0_i32 = arith.constant 0 : i32
    %c0_i32_0 = arith.constant 0 : i32
    return %arg0, %c0_i32 : i32, i32
  }
  func.func @transform_1(%arg0: i32) -> (i32, i32) {
    %c0_i32 = arith.constant 0 : i32
    %c0_i32_0 = arith.constant 0 : i32
    %c0_i32_1 = arith.constant 0 : i32
    return %c0_i32, %c0_i32_0 : i32, i32
  }
  func.func @transform_2(%arg0: i32) -> (i32, i32) {
    %c0_i32 = arith.constant 0 : i32
    %c0_i32_0 = arith.constant 0 : i32
    %c0_i32_1 = arith.constant 0 : i32
    return %c0_i32, %c0_i32_0 : i32, i32
  }
  func.func @transform_3(%arg0: i32) -> (i32, i32) {
    %c0_i32 = arith.constant 0 : i32
    %c0_i32_0 = arith.constant 0 : i32
    %c0_i32_1 = arith.constant 0 : i32
    return %c0_i32, %c0_i32_0 : i32, i32
  }
  func.func @transform_4(%arg0: i32) -> (i32, i32) {
    %c0_i32 = arith.constant 0 : i32
    %c0_i32_0 = arith.constant 0 : i32
    %c0_i32_1 = arith.constant 0 : i32
    return %c0_i32, %c0_i32_0 : i32, i32
  }
  func.func @transform_5(%arg0: i32) -> (i32, i32) {
    %c0_i32 = arith.constant 0 : i32
    %c0_i32_0 = arith.constant 0 : i32
    return %arg0, %c0_i32 : i32, i32
  }
}

</mosaic_0001>

<bundles_post_ra>
// kernel: drbc_forward.11
= control target key start
LH: loop header
LB: loop body
LE: loop exit
PB: predicated region body
PF: predicated region fallthrough
CT: control target
= control target key end

     0   :  { %s625_s18 = smov 0   ;;  %s805_s0 = inlined_call_operand.vmem [shape: f32[256,128], index: 0, kind: input, shape index: {}]   ;;  %s806_s1 = inlined_call_operand.vmem [shape: f32[128,128], index: 1, kind: input, shape index: {}]   ;;  %s807_s2 = inlined_call_operand.vmem [shape: f32[1,128], index: 2, kind: input, shape index: {}]   ;;  %s808_s3 = inlined_call_operand.vmem [shape: f32[128,128], index: 3, kind: input, shape index: {}]   ;;  %s809_s4 = inlined_call_operand.vmem [shape: f32[1,128], index: 4, kind: input, shape index: {}]   ;;  %s810_s5 = inlined_call_operand.vmem [shape: f32[256,128], index: 5, kind: output, shape index: {}]  }
   0x1 LB: > { %s534_s19 = sadd.s32 4294967295, %s593_s18   ;;  %p538_p0 = scmp.ge.s32.totalorder %s593_s18, 1  ;;  %s593_s18 = sphi %s625_s18, %s15_s18  }
   0x2   : > { %p188_p1 = scmp.lt.s32.totalorder %s593_s18, 3 }
   0x4   : > { %p189_p2 = pnand %p538_p0, %p188_p1 }
   0x5   : > { %s539_s11 = sshll.u32 (!%p189_p2), %s534_s19, 4 }
   0x6   : > { %192 = sbr.rel (%p189_p2) target bundleno = 371 (0x173), region = 40  ;;  %p217_p3 = scmp.lt.s32.totalorder (!%p189_p2), %s539_s11, 31 }
   0xb   : > { %v259_v0 = vld [vmem:[%s806_s1 + $0x78] sm:$0xff]  ;;  %v258_v1 = vld [vmem:[%s806_s1 + $0x70] sm:$0xff]  ;;  %v257_v2 = vld [vmem:[%s806_s1 + $0x68] sm:$0xff]  ;;  %s812_s11 = smov (!%p217_p3, %s539_s11), 31 }
   0xc   : > { %545 = vmatpush.msra.mxu2 %v259_v0  ;;  %264 = vmatpush.msra.mxu0 %v259_v0  ;;  %v256_v3 = vld [vmem:[%s806_s1 + $0x60] sm:$0xff]  ;;  %v255_v4 = vld [vmem:[%s806_s1 + $0x58] sm:$0xff]  ;;  %v254_v5 = vld [vmem:[%s806_s1 + $0x50] sm:$0xff]  ;;  %s540_s23 = sshll.u32 %s812_s11, 3 }
   0xd   : > { %v253_v6 = vld [vmem:[%s806_s1 + $0x48] sm:$0xff]  ;;  %v252_v7 = vld [vmem:[%s806_s1 + $0x40] sm:$0xff]  ;;  %v251_v8 = vld [vmem:[%s806_s1 + $0x38] sm:$0xff]  ;;  %s686_s30 = scalar_lea.vmem %s805_s0, %s540_s23  ;;  %s784_s27 = scalar_lea.vmem %s810_s5, %s540_s23 }
   0xe   : > { %546 = vmatpush.msra.mxu2 %v258_v1  ;;  %265 = vmatpush.msra.mxu0 %v258_v1  ;;  %v250_v9 = vld [vmem:[%s806_s1 + $0x30] sm:$0xff]  ;;  %v249_v10 = vld [vmem:[%s806_s1 + $0x28] sm:$0xff]  ;;  %v248_v11 = vld [vmem:[%s806_s1 + $0x20] sm:$0xff] }
   0xf   : > { %v247_v12 = vld [vmem:[%s806_s1 + $0x18] sm:$0xff]  ;;  %v246_v13 = vld [vmem:[%s806_s1 + $0x10] sm:$0xff]  ;;  %v245_v14 = vld [vmem:[%s806_s1 + $0x8] sm:$0xff] }
  0x10   : > { %547 = vmatpush.msra.mxu2 %v257_v2  ;;  %266 = vmatpush.msra.mxu0 %v257_v2  ;;  %v244_v15 = vld [vmem:[%s806_s1] sm:$0xff]  ;;  %v237_v18 = vld [vmem:[%s686_s30 + $0x48] sm:$0xff]  ;;  %v238_v20 = vld [vmem:[%s686_s30 + $0x50] sm:$0xff] }
  0x11   : > { %v236_v16 = vld [vmem:[%s686_s30 + $0x40] sm:$0xff]  ;;  %v229_v19 = vld [vmem:[%s686_s30 + $0x8] sm:$0xff]  ;;  %v230_v21 = vld [vmem:[%s686_s30 + $0x10] sm:$0xff] }
  0x12   : > { %548 = vmatpush.msra.mxu2 %v256_v3  ;;  %267 = vmatpush.msra.mxu0 %v256_v3  ;;  %v228_v17 = vld [vmem:[%s686_s30] sm:$0xff]  ;;  %v239_v22 = vld [vmem:[%s686_s30 + $0x58] sm:$0xff]  ;;  %v391_v25 = vld [vmem:[%s808_s3 + $0x70] sm:$0xff] }
  0x13   : > { %v231_v23 = vld [vmem:[%s686_s30 + $0x18] sm:$0xff]  ;;  %v390_v26 = vld [vmem:[%s808_s3 + $0x68] sm:$0xff]  ;;  %v389_v27 = vld [vmem:[%s808_s3 + $0x60] sm:$0xff] }
  0x14   : > { %549 = vmatpush.msra.mxu2 %v255_v4  ;;  %268 = vmatpush.msra.mxu0 %v255_v4  ;;  %v392_v24 = vld [vmem:[%s808_s3 + $0x78] sm:$0xff]  ;;  %v240_v28 = vld [vmem:[%s686_s30 + $0x60] sm:$0xff]  ;;  %v387_v31 = vld [vmem:[%s808_s3 + $0x50] sm:$0xff] }
  0x15   : > { %561 = vmatpush.msra.mxu3 %v392_v24  ;;  %397 = vmatpush.msra.mxu1 %v392_v24  ;;  %v232_v29 = vld [vmem:[%s686_s30 + $0x20] sm:$0xff]  ;;  %v388_v30 = vld [vmem:[%s808_s3 + $0x58] sm:$0xff]  ;;  %v386_v32 = vld [vmem:[%s808_s3 + $0x48] sm:$0xff] }
  0x16   : > { %550 = vmatpush.msra.mxu2 %v254_v5  ;;  %269 = vmatpush.msra.mxu0 %v254_v5  ;;  %v385_v33 = vld [vmem:[%s808_s3 + $0x40] sm:$0xff]  ;;  %v241_v34 = vld [vmem:[%s686_s30 + $0x68] sm:$0xff]  ;;  %v384_v36 = vld [vmem:[%s808_s3 + $0x38] sm:$0xff] }
  0x17   : > { %562 = vmatpush.msra.mxu3 %v391_v25  ;;  %398 = vmatpush.msra.mxu1 %v391_v25  ;;  %v233_v35 = vld [vmem:[%s686_s30 + $0x28] sm:$0xff]  ;;  %v383_v37 = vld [vmem:[%s808_s3 + $0x30] sm:$0xff]  ;;  %v381_v39 = vld [vmem:[%s808_s3 + $0x20] sm:$0xff] }
  0x18   : > { %551 = vmatpush.msra.mxu2 %v253_v6  ;;  %270 = vmatpush.msra.mxu0 %v253_v6  ;;  %v382_v38 = vld [vmem:[%s808_s3 + $0x28] sm:$0xff]  ;;  %v242_v40 = vld [vmem:[%s686_s30 + $0x70] sm:$0xff]  ;;  %v380_v42 = vld [vmem:[%s808_s3 + $0x18] sm:$0xff] }
  0x19   : > { %563 = vmatpush.msra.mxu3 %v390_v26  ;;  %399 = vmatpush.msra.mxu1 %v390_v26  ;;  %v234_v41 = vld [vmem:[%s686_s30 + $0x30] sm:$0xff]  ;;  %v243_v43 = vld [vmem:[%s686_s30 + $0x78] sm:$0xff]  ;;  %v378_v46 = vld [vmem:[%s808_s3 + $0x8] sm:$0xff] }
  0x1a   : > { %552 = vmatpush.msra.mxu2 %v252_v7  ;;  %271 = vmatpush.msra.mxu0 %v252_v7  ;;  %v235_v44 = vld [vmem:[%s686_s30 + $0x38] sm:$0xff]  ;;  %v379_v45 = vld [vmem:[%s808_s3 + $0x10] sm:$0xff]  ;;  %v377_v47 = vld [vmem:[%s808_s3] sm:$0xff] }
  0x1b   : > { %564 = vmatpush.msra.mxu3 %v389_v27  ;;  %400 = vmatpush.msra.mxu1 %v389_v27  ;;  %v758_v48 = vld [vmem:[%s807_s2] ss:$0 sm:$0xff] }
  0x1c   : > { %553 = vmatpush.msra.mxu2 %v251_v8  ;;  %272 = vmatpush.msra.mxu0 %v251_v8 }
  0x1d   : > { %565 = vmatpush.msra.mxu3 %v388_v30  ;;  %401 = vmatpush.msra.mxu1 %v388_v30 }
  0x1e   : > { %554 = vmatpush.msra.mxu2 %v250_v9  ;;  %273 = vmatpush.msra.mxu0 %v250_v9 }
  0x1f   : > { %566 = vmatpush.msra.mxu3 %v387_v31  ;;  %402 = vmatpush.msra.mxu1 %v387_v31 }
  0x20   : > { %555 = vmatpush.msra.mxu2 %v249_v10  ;;  %274 = vmatpush.msra.mxu0 %v249_v10 }
  0x21   : > { %567 = vmatpush.msra.mxu3 %v386_v32  ;;  %403 = vmatpush.msra.mxu1 %v386_v32 }
  0x22   : > { %556 = vmatpush.msra.mxu2 %v248_v11  ;;  %275 = vmatpush.msra.mxu0 %v248_v11 }
  0x23   : > { %568 = vmatpush.msra.mxu3 %v385_v33  ;;  %404 = vmatpush.msra.mxu1 %v385_v33 }
  0x24   : > { %557 = vmatpush.msra.mxu2 %v247_v12  ;;  %276 = vmatpush.msra.mxu0 %v247_v12 }
  0x25   : > { %569 = vmatpush.msra.mxu3 %v384_v36  ;;  %405 = vmatpush.msra.mxu1 %v384_v36 }
  0x26   : > { %558 = vmatpush.msra.mxu2 %v246_v13  ;;  %277 = vmatpush.msra.mxu0 %v246_v13 }
  0x27   : > { %570 = vmatpush.msra.mxu3 %v383_v37  ;;  %406 = vmatpush.msra.mxu1 %v383_v37 }
  0x28   : > { %559 = vmatpush.msra.mxu2 %v245_v14  ;;  %278 = vmatpush.msra.mxu0 %v245_v14 }
  0x29   : > { %571 = vmatpush.msra.mxu3 %v382_v38  ;;  %407 = vmatpush.msra.mxu1 %v382_v38 }
  0x2a   : > { %560 = vmatpush.msra.mxu2 %v244_v15  ;;  %279 = vmatpush.msra.mxu0 %v244_v15 }
  0x2b   : > { %304 = vmatmul.f32.vlgmr.msra.gmra.mxu2 %v236_v16  ;;  %280 = vmatmul.f32.vlgmr.msra.gmra.mxu0 %v228_v17 }
  0x2c   : > { %572 = vmatpush.msra.mxu3 %v381_v39  ;;  %408 = vmatpush.msra.mxu1 %v381_v39 }
  0x2e   : > { %573 = vmatpush.msra.mxu3 %v380_v42  ;;  %409 = vmatpush.msra.mxu1 %v380_v42 }
  0x30   : > { %574 = vmatpush.msra.mxu3 %v379_v45  ;;  %410 = vmatpush.msra.mxu1 %v379_v45 }
  0x32   : > { %575 = vmatpush.msra.mxu3 %v378_v46  ;;  %411 = vmatpush.msra.mxu1 %v378_v46 }
  0x33   : > { %307 = vmatmul.f32.gmra.mxu2 %v237_v18  ;;  %283 = vmatmul.f32.gmra.mxu0 %v229_v19 }
  0x34   : > { %576 = vmatpush.msra.mxu3 %v377_v47  ;;  %412 = vmatpush.msra.mxu1 %v377_v47 }
  0x3b   : > { %310 = vmatmul.f32.gmra.mxu2 %v238_v20  ;;  %286 = vmatmul.f32.gmra.mxu0 %v230_v21 }
  0x43   : > { %313 = vmatmul.f32.gmra.mxu2 %v239_v22  ;;  %289 = vmatmul.f32.gmra.mxu0 %v231_v23 }
  0x4b   : > { %316 = vmatmul.f32.gmra.mxu2 %v240_v28  ;;  %292 = vmatmul.f32.gmra.mxu0 %v232_v29 }
  0x53   : > { %319 = vmatmul.f32.gmra.mxu2 %v241_v34  ;;  %295 = vmatmul.f32.gmra.mxu0 %v233_v35 }
  0x5b   : > { %322 = vmatmul.f32.gmra.mxu2 %v242_v40  ;;  %298 = vmatmul.f32.gmra.mxu0 %v234_v41 }
  0x63   : > { %325 = vmatmul.f32.gmra.mxu2 %v243_v43  ;;  %301 = vmatmul.f32.gmra.mxu0 %v235_v44 }
  0xa8   : > { %v281_v49 = vpop.f32.mrf.mxu0 }
  0xa9   : > { %v282_v50 = vadd.f32 %v758_v48, %v281_v49 }
  0xab   : > { %vm329_vm0 = vcmp.gt.f32.partialorder %v282_v50, 0.0  ;;  %v345_v51 = vmul.f32 0.01, %v282_v50 }
  0xad   : > { %v361_v52 = vsel %vm329_vm0, %v282_v50, %v345_v51  ;;  %v586_v50 = vld [vmem:[%s809_s4] ss:$0 sm:$0xff] }
  0xae   : > { %v305_v53 = vpop.f32.mrf.mxu2  ;;  %413 = vmatmul.f32.vlgmr.msra.gmra.mxu1 %v361_v52 }
  0xaf   : > { %v306_v54 = vadd.f32 %v758_v48, %v305_v53 }
  0xb0   : > { %v284_v55 = vpop.f32.mrf.mxu0 }
  0xb1   : > { %vm337_vm1 = vcmp.gt.f32.partialorder %v306_v54, 0.0  ;;  %v353_v56 = vmul.f32 0.01, %v306_v54  ;;  %v285_v57 = vadd.f32 %v758_v48, %v284_v55 }
  0xb3   : > { %v369_v58 = vsel %vm337_vm1, %v306_v54, %v353_v56  ;;  %vm330_vm2 = vcmp.gt.f32.partialorder %v285_v57, 0.0  ;;  %v346_v59 = vmul.f32 0.01, %v285_v57 }
  0xb4   : > { %437 = vmatmul.f32.vlgmr.msra.gmra.mxu3 %v369_v58 }
  0xb5   : > { %v362_v60 = vsel %vm330_vm2, %v285_v57, %v346_v59 }
  0xb6   : > { %v308_v61 = vpop.f32.mrf.mxu2  ;;  %416 = vmatmul.f32.gmra.mxu1 %v362_v60 }
  0xb7   : > { %v309_v62 = vadd.f32 %v758_v48, %v308_v61 }
  0xb8   : > { %v287_v63 = vpop.f32.mrf.mxu0 }
  0xb9   : > { %vm338_vm3 = vcmp.gt.f32.partialorder %v309_v62, 0.0  ;;  %v354_v0 = vmul.f32 0.01, %v309_v62  ;;  %v288_v1 = vadd.f32 %v758_v48, %v287_v63 }
  0xbb   : > { %v370_v2 = vsel %vm338_vm3, %v309_v62, %v354_v0  ;;  %vm331_vm4 = vcmp.gt.f32.partialorder %v288_v1, 0.0  ;;  %v347_v3 = vmul.f32 0.01, %v288_v1 }
  0xbc   : > { %440 = vmatmul.f32.gmra.mxu3 %v370_v2 }
  0xbd   : > { %v363_v4 = vsel %vm331_vm4, %v288_v1, %v347_v3 }
  0xbe   : > { %v311_v5 = vpop.f32.mrf.mxu2  ;;  %419 = vmatmul.f32.gmra.mxu1 %v363_v4 }
  0xbf   : > { %v312_v6 = vadd.f32 %v758_v48, %v311_v5 }
  0xc0   : > { %v290_v7 = vpop.f32.mrf.mxu0 }
  0xc1   : > { %vm339_vm5 = vcmp.gt.f32.partialorder %v312_v6, 0.0  ;;  %v355_v8 = vmul.f32 0.01, %v312_v6  ;;  %v291_v9 = vadd.f32 %v758_v48, %v290_v7 }
  0xc3   : > { %v371_v10 = vsel %vm339_vm5, %v312_v6, %v355_v8  ;;  %vm332_vm6 = vcmp.gt.f32.partialorder %v291_v9, 0.0  ;;  %v348_v11 = vmul.f32 0.01, %v291_v9 }
  0xc4   : > { %443 = vmatmul.f32.gmra.mxu3 %v371_v10 }
  0xc5   : > { %v364_v12 = vsel %vm332_vm6, %v291_v9, %v348_v11 }
  0xc6   : > { %v314_v13 = vpop.f32.mrf.mxu2  ;;  %422 = vmatmul.f32.gmra.mxu1 %v364_v12 }
  0xc7   : > { %v315_v14 = vadd.f32 %v758_v48, %v314_v13 }
  0xc8   : > { %v293_v15 = vpop.f32.mrf.mxu0 }
  0xc9   : > { %vm340_vm7 = vcmp.gt.f32.partialorder %v315_v14, 0.0  ;;  %v356_v16 = vmul.f32 0.01, %v315_v14  ;;  %v294_v17 = vadd.f32 %v758_v48, %v293_v15 }
  0xcb   : > { %v372_v18 = vsel %vm340_vm7, %v315_v14, %v356_v16  ;;  %vm333_vm8 = vcmp.gt.f32.partialorder %v294_v17, 0.0  ;;  %v349_v19 = vmul.f32 0.01, %v294_v17 }
  0xcc   : > { %446 = vmatmul.f32.gmra.mxu3 %v372_v18 }
  0xcd   : > { %v365_v20 = vsel %vm333_vm8, %v294_v17, %v349_v19 }
  0xce   : > { %v317_v21 = vpop.f32.mrf.mxu2  ;;  %425 = vmatmul.f32.gmra.mxu1 %v365_v20 }
  0xcf   : > { %v318_v22 = vadd.f32 %v758_v48, %v317_v21 }
  0xd0   : > { %v296_v23 = vpop.f32.mrf.mxu0 }
  0xd1   : > { %vm341_vm9 = vcmp.gt.f32.partialorder %v318_v22, 0.0  ;;  %v357_v24 = vmul.f32 0.01, %v318_v22  ;;  %v297_v25 = vadd.f32 %v758_v48, %v296_v23 }
  0xd3   : > { %v373_v26 = vsel %vm341_vm9, %v318_v22, %v357_v24  ;;  %vm334_vm10 = vcmp.gt.f32.partialorder %v297_v25, 0.0  ;;  %v350_v27 = vmul.f32 0.01, %v297_v25 }
  0xd4   : > { %449 = vmatmul.f32.gmra.mxu3 %v373_v26 }
  0xd5   : > { %v366_v28 = vsel %vm334_vm10, %v297_v25, %v350_v27 }
  0xd6   : > { %v320_v29 = vpop.f32.mrf.mxu2  ;;  %428 = vmatmul.f32.gmra.mxu1 %v366_v28 }
  0xd7   : > { %v321_v30 = vadd.f32 %v758_v48, %v320_v29 }
  0xd8   : > { %v299_v31 = vpop.f32.mrf.mxu0 }
  0xd9   : > { %vm342_vm11 = vcmp.gt.f32.partialorder %v321_v30, 0.0  ;;  %v358_v32 = vmul.f32 0.01, %v321_v30  ;;  %v300_v33 = vadd.f32 %v758_v48, %v299_v31 }
  0xdb   : > { %v374_v34 = vsel %vm342_vm11, %v321_v30, %v358_v32  ;;  %vm335_vm12 = vcmp.gt.f32.partialorder %v300_v33, 0.0  ;;  %v351_v35 = vmul.f32 0.01, %v300_v33 }
  0xdc   : > { %452 = vmatmul.f32.gmra.mxu3 %v374_v34 }
  0xdd   : > { %v367_v36 = vsel %vm335_vm12, %v300_v33, %v351_v35 }
  0xde   : > { %v323_v37 = vpop.f32.mrf.mxu2  ;;  %431 = vmatmul.f32.gmra.mxu1 %v367_v36 }
  0xdf   : > { %v324_v38 = vadd.f32 %v758_v48, %v323_v37 }
  0xe0   : > { %v302_v39 = vpop.f32.mrf.mxu0 }
  0xe1   : > { %vm343_vm13 = vcmp.gt.f32.partialorder %v324_v38, 0.0  ;;  %v359_v40 = vmul.f32 0.01, %v324_v38  ;;  %v303_v41 = vadd.f32 %v758_v48, %v302_v39 }
  0xe3   : > { %v375_v42 = vsel %vm343_vm13, %v324_v38, %v359_v40  ;;  %vm336_vm14 = vcmp.gt.f32.partialorder %v303_v41, 0.0  ;;  %v352_v43 = vmul.f32 0.01, %v303_v41 }
  0xe4   : > { %455 = vmatmul.f32.gmra.mxu3 %v375_v42 }
  0xe5   : > { %v368_v44 = vsel %vm336_vm14, %v303_v41, %v352_v43 }
  0xe6   : > { %v326_v45 = vpop.f32.mrf.mxu2  ;;  %434 = vmatmul.f32.gmra.mxu1 %v368_v44 }
  0xe7   : > { %v327_v46 = vadd.f32 %v758_v48, %v326_v45 }
  0xe9   : > { %vm344_vm15 = vcmp.gt.f32.partialorder %v327_v46, 0.0  ;;  %v360_v47 = vmul.f32 0.01, %v327_v46 }
  0xeb   : > { %v376_v49 = vsel %vm344_vm15, %v327_v46, %v360_v47 }
  0xec   : > { %458 = vmatmul.f32.gmra.mxu3 %v376_v49 }
 0x12b   : > { %v414_v48 = vpop.f32.mrf.mxu1 }
 0x12c   : > { %v415_v51 = vadd.f32 %v586_v50, %v414_v48 }
 0x12e   : > { %462 = vst [vmem:[%s784_s27] sm:$0xff] %v415_v51 }
 0x133   : > { %v417_v52 = vpop.f32.mrf.mxu1 }
 0x134   : > { %v418_v53 = vadd.f32 %v586_v50, %v417_v52 }
 0x136   : > { %463 = vst [vmem:[%s784_s27 + $0x8] sm:$0xff] %v418_v53 }
 0x137   : > { %v438_v54 = vpop.f32.mrf.mxu3 }
 0x138   : > { %v439_v55 = vadd.f32 %v586_v50, %v438_v54 }
 0x13a   : > { %470 = vst [vmem:[%s784_s27 + $0x40] sm:$0xff] %v439_v55 }
 0x13b   : > { %v420_v56 = vpop.f32.mrf.mxu1 }
 0x13c   : > { %v421_v57 = vadd.f32 %v586_v50, %v420_v56 }
 0x13e   : > { %464 = vst [vmem:[%s784_s27 + $0x10] sm:$0xff] %v421_v57 }
 0x13f   : > { %v441_v58 = vpop.f32.mrf.mxu3 }
 0x140   : > { %v442_v59 = vadd.f32 %v586_v50, %v441_v58 }
 0x142   : > { %471 = vst [vmem:[%s784_s27 + $0x48] sm:$0xff] %v442_v59 }
 0x143   : > { %v423_v60 = vpop.f32.mrf.mxu1 }
 0x144   : > { %v424_v61 = vadd.f32 %v586_v50, %v423_v60 }
 0x146   : > { %465 = vst [vmem:[%s784_s27 + $0x18] sm:$0xff] %v424_v61 }
 0x147   : > { %v444_v62 = vpop.f32.mrf.mxu3 }
 0x148   : > { %v445_v63 = vadd.f32 %v586_v50, %v444_v62 }
 0x14a   : > { %472 = vst [vmem:[%s784_s27 + $0x50] sm:$0xff] %v445_v63 }
 0x14b   : > { %v426_v0 = vpop.f32.mrf.mxu1 }
 0x14c   : > { %v427_v1 = vadd.f32 %v586_v50, %v426_v0 }
 0x14e   : > { %466 = vst [vmem:[%s784_s27 + $0x20] sm:$0xff] %v427_v1 }
 0x14f   : > { %v447_v2 = vpop.f32.mrf.mxu3 }
 0x150   : > { %v448_v3 = vadd.f32 %v586_v50, %v447_v2 }
 0x152   : > { %473 = vst [vmem:[%s784_s27 + $0x58] sm:$0xff] %v448_v3 }
 0x153   : > { %v429_v4 = vpop.f32.mrf.mxu1 }
 0x154   : > { %v430_v5 = vadd.f32 %v586_v50, %v429_v4 }
 0x156   : > { %467 = vst [vmem:[%s784_s27 + $0x28] sm:$0xff] %v430_v5 }
 0x157   : > { %v450_v6 = vpop.f32.mrf.mxu3 }
 0x158   : > { %v451_v7 = vadd.f32 %v586_v50, %v450_v6 }
 0x15a   : > { %474 = vst [vmem:[%s784_s27 + $0x60] sm:$0xff] %v451_v7 }
 0x15b   : > { %v432_v8 = vpop.f32.mrf.mxu1 }
 0x15c   : > { %v433_v9 = vadd.f32 %v586_v50, %v432_v8 }
 0x15e   : > { %468 = vst [vmem:[%s784_s27 + $0x30] sm:$0xff] %v433_v9 }
 0x15f   : > { %v453_v10 = vpop.f32.mrf.mxu3 }
 0x160   : > { %v454_v11 = vadd.f32 %v586_v50, %v453_v10 }
 0x162   : > { %475 = vst [vmem:[%s784_s27 + $0x68] sm:$0xff] %v454_v11 }
 0x163   : > { %v435_v12 = vpop.f32.mrf.mxu1 }
 0x164   : > { %v436_v13 = vadd.f32 %v586_v50, %v435_v12 }
 0x166   : > { %469 = vst [vmem:[%s784_s27 + $0x38] sm:$0xff] %v436_v13 }
 0x167   : > { %v456_v14 = vpop.f32.mrf.mxu3 }
 0x168   : > { %v457_v15 = vadd.f32 %v586_v50, %v456_v14 }
 0x16a   : > { %476 = vst [vmem:[%s784_s27 + $0x70] sm:$0xff] %v457_v15 }
 0x16f   : > { %v459_v16 = vpop.f32.mrf.mxu3 }
 0x170   : > { %v460_v17 = vadd.f32 %v586_v50, %v459_v16 }
 0x172   : > { %477 = vst [vmem:[%s784_s27 + $0x78] sm:$0xff] %v460_v17 }
 0x173 PF: > { %s15_s18 = sadd.s32 1, %s593_s18  }
 0x174   : > { %p12_p4 = scmp.ge.s32.totalorder %s15_s18, 4  }
 0x176   :  { %14 = sbr.rel (!%p12_p4) target bundleno = 1 (0x1), region = 70 }

// kernel: drbc_forward.6
= control target key start
LH: loop header
LB: loop body
LE: loop exit
PB: predicated region body
PF: predicated region fallthrough
CT: control target
= control target key end

     0   :  { %s3262_s17 = smov 0   ;;  %s4786_s0 = inlined_call_operand.vmem [shape: bf16[256,128], index: 0, kind: input, shape index: {}]   ;;  %s4787_s1 = inlined_call_operand.vmem [shape: bf16[256,256], index: 1, kind: input, shape index: {}]   ;;  %s4788_s2 = inlined_call_operand.vmem [shape: f32[256,128], index: 2, kind: input, shape index: {}]   ;;  %s4789_s3 = inlined_call_operand.vmem [shape: f32[256,128], index: 3, kind: input, shape index: {}]   ;;  %s4790_s4 = inlined_call_operand.vmem [shape: bf16[128,384], index: 4, kind: input, shape index: {}]   ;;  %s4791_s5 = inlined_call_operand.vmem [shape: bf16[128,384], index: 5, kind: input, shape index: {}]   ;;  %s4792_s6 = inlined_call_operand.vmem [shape: f32[1,256], index: 6, kind: input, shape index: {}]   ;;  %s4793_s7 = inlined_call_operand.vmem [shape: f32[1,128], index: 7, kind: input, shape index: {}]   ;;  %s4794_s8 = inlined_call_operand.vmem [shape: f32[1,128], index: 8, kind: input, shape index: {}]   ;;  %s4795_s9 = inlined_call_operand.vmem [shape: f32[256,128], index: 9, kind: output, shape index: {0}]   ;;  %s4796_s10 = inlined_call_operand.vmem [shape: bf16[256,128], index: 10, kind: output, shape index: {1}]   ;;  %s4797_s11 = inlined_call_operand.vmem [shape: f32[256,128], index: 11, kind: output, shape index: {2}]  }
   0x1 LB: > { %s2506_s18 = sadd.s32 4294967295, %s3200_s17   ;;  %p2510_p0 = scmp.ge.s32.totalorder %s3200_s17, 1  ;;  %s3200_s17 = sphi %s3262_s17, %s22_s17  }
   0x2   : > { %p366_p1 = scmp.lt.s32.totalorder %s3200_s17, 3 }
   0x4   : > { %p367_p2 = pnand %p2510_p0, %p366_p1 }
   0x6   : > { %370 = sbr.rel (%p367_p2) target bundleno = 607 (0x25f), region = 56 }
   0xb   : > { %v2902_v0 = vld [vmem:[%s4786_s0 + $0x38] sm:$0xff]  ;;  %v2901_v2 = vld [vmem:[%s4786_s0 + $0x30] sm:$0xff]  ;;  %v2900_v4 = vld [vmem:[%s4786_s0 + $0x28] sm:$0xff]  ;;  %s2511_s12 = sshll.u32 %s2506_s18, 4 }
   0xc   : > { %v2910_v1 = vld [vmem:[%s4786_s0 + $0x78] sm:$0xff]  ;;  %688 = vmatpush.bf16.msra.mxu0 %v2902_v0  ;;  %v2909_v3 = vld [vmem:[%s4786_s0 + $0x70] sm:$0xff]  ;;  %v2908_v5 = vld [vmem:[%s4786_s0 + $0x68] sm:$0xff]  ;;  %p428_p3 = scmp.lt.s32.totalorder %s2511_s12, 31 }
   0xd   : > { %737 = vmatpush.bf16.msra.mxu1 %v2910_v1  ;;  %v2899_v6 = vld [vmem:[%s4786_s0 + $0x20] sm:$0xff]  ;;  %v2898_v8 = vld [vmem:[%s4786_s0 + $0x18] sm:$0xff]  ;;  %v2897_v10 = vld [vmem:[%s4786_s0 + $0x10] sm:$0xff] }
   0xe   : > { %v2907_v7 = vld [vmem:[%s4786_s0 + $0x60] sm:$0xff]  ;;  %v2906_v9 = vld [vmem:[%s4786_s0 + $0x58] sm:$0xff]  ;;  %s4875_s12 = smov (!%p428_p3, %s2511_s12), 31  ;;  %v2905_v11 = vld [vmem:[%s4786_s0 + $0x50] sm:$0xff] }
   0xf   : > { %s3309_s26 = sshll.u32 %s4875_s12, 3  ;;  %v2896_v12 = vld [vmem:[%s4786_s0 + $0x8] sm:$0xff]  ;;  %v2895_v14 = vld [vmem:[%s4786_s0] sm:$0xff]  ;;  %v2933_v47 = vld [vmem:[%s4790_s4 + $0xb0] sm:$0xf0] }
  0x10   : > { %689 = vmatpush.bf16.msra.mxu0 %v2901_v2  ;;  %v2904_v13 = vld [vmem:[%s4786_s0 + $0x48] sm:$0xff]  ;;  %s3321_s15 = scalar_lea.vmem %s4787_s1, %s3309_s26  ;;  %v2903_v15 = vld [vmem:[%s4786_s0 + $0x40] sm:$0xff]  ;;  %v2740_v50 = vld [vmem:[%s4790_s4 + $0xb4] sm:$0xf0]  ;;  %s3563_s20 = scalar_lea.vmem %s4788_s2, %s3309_s26 }
  0x11   : > { %738 = vmatpush.bf16.msra.mxu1 %v2909_v3  ;;  %v2526_v16 = vld [vmem:[%s3321_s15] sm:$0xf]  ;;  %v2880_v17 = vld [vmem:[%s3321_s15 + $0x4] sm:$0xf0]  ;;  %v2879_v18 = vld [vmem:[%s3321_s15 + $0x4] sm:$0xf]  ;;  %s4238_s29 = scalar_lea.vmem %s4789_s3, %s3309_s26  ;;  %s4270_s19 = scalar_lea.vmem %s4797_s11, %s3309_s26 }
  0x12   : > { %v2528_v19 = vld [vmem:[%s3321_s15 + $0x8] sm:$0xf0]  ;;  %v2527_v20 = vor.u32 %v2880_v17, %v2526_v16  ;;  %v2534_v22 = vld [vmem:[%s3321_s15 + $0x10] sm:$0xf]  ;;  %v2882_v23 = vld [vmem:[%s3321_s15 + $0x14] sm:$0xf0] }
  0x13   : > { %v2531_v21 = vor.u32 %v2879_v18, %v2528_v19  ;;  %v2881_v24 = vld [vmem:[%s3321_s15 + $0x14] sm:$0xf]  ;;  %v2536_v25 = vld [vmem:[%s3321_s15 + $0x18] sm:$0xf0]  ;;  %v2535_v26 = vor.u32 %v2882_v23, %v2534_v22  ;;  %v2542_v28 = vld [vmem:[%s3321_s15 + $0x20] sm:$0xf] }
  0x14   : > { %690 = vmatpush.bf16.msra.mxu0 %v2900_v4  ;;  %v2539_v27 = vor.u32 %v2881_v24, %v2536_v25  ;;  %v2884_v29 = vld [vmem:[%s3321_s15 + $0x24] sm:$0xf0]  ;;  %v2883_v30 = vld [vmem:[%s3321_s15 + $0x24] sm:$0xf]  ;;  %v2544_v31 = vld [vmem:[%s3321_s15 + $0x28] sm:$0xf0] }
  0x15   : > { %739 = vmatpush.bf16.msra.mxu1 %v2908_v5  ;;  %v2543_v32 = vor.u32 %v2884_v29, %v2542_v28  ;;  %v2547_v33 = vor.u32 %v2883_v30, %v2544_v31  ;;  %v2550_v34 = vld [vmem:[%s3321_s15 + $0x30] sm:$0xf]  ;;  %v2886_v35 = vld [vmem:[%s3321_s15 + $0x34] sm:$0xf0]  ;;  %v2885_v36 = vld [vmem:[%s3321_s15 + $0x34] sm:$0xf] }
  0x16   : > { %v2552_v37 = vld [vmem:[%s3321_s15 + $0x38] sm:$0xf0]  ;;  %v2551_v38 = vor.u32 %v2886_v35, %v2550_v34  ;;  %v2558_v40 = vld [vmem:[%s3321_s15 + $0x40] sm:$0xf]  ;;  %v2888_v41 = vld [vmem:[%s3321_s15 + $0x44] sm:$0xf0] }
  0x17   : > { %v2555_v39 = vor.u32 %v2885_v36, %v2552_v37  ;;  %v2887_v42 = vld [vmem:[%s3321_s15 + $0x44] sm:$0xf]  ;;  %v2560_v43 = vld [vmem:[%s3321_s15 + $0x48] sm:$0xf0]  ;;  %v2559_v44 = vor.u32 %v2888_v41, %v2558_v40  ;;  %v2738_v46 = vld [vmem:[%s4790_s4 + $0xa8] sm:$0xf] }
  0x18   : > { %691 = vmatpush.bf16.msra.mxu0 %v2899_v6  ;;  %v2563_v45 = vor.u32 %v2887_v42, %v2560_v43  ;;  %v2932_v48 = vld [vmem:[%s4790_s4 + $0xac] sm:$0xf]  ;;  %v2739_v49 = vor.u32 %v2933_v47, %v2738_v46  ;;  %v2746_v51 = vld [vmem:[%s4790_s4 + $0xb0] sm:$0xf]  ;;  %v2934_v52 = vld [vmem:[%s4790_s4 + $0xb8] sm:$0xf0] }
  0x19   : > { %740 = vmatpush.bf16.msra.mxu1 %v2907_v7  ;;  %v2743_v53 = vor.u32 %v2932_v48, %v2740_v50  ;;  %v2747_v54 = vor.u32 %v2934_v52, %v2746_v51  ;;  %v2726_v55 = vld [vmem:[%s4790_s4 + $0x90] sm:$0xf]  ;;  %v2930_v56 = vld [vmem:[%s4790_s4 + $0x98] sm:$0xf0]  ;;  %v2929_v57 = vld [vmem:[%s4790_s4 + $0x94] sm:$0xf] }
  0x1a   : > { %970 = vmatpush.bf16.msra.mxu2 %v2739_v49  ;;  %v2727_v58 = vor.u32 %v2930_v56, %v2726_v55  ;;  %v2728_v59 = vld [vmem:[%s4790_s4 + $0x9c] sm:$0xf0]  ;;  %v2734_v60 = vld [vmem:[%s4790_s4 + $0x98] sm:$0xf]  ;;  %v2931_v61 = vld [vmem:[%s4790_s4 + $0xa0] sm:$0xf0] }
  0x1b   : > { %1019 = vmatpush.bf16.msra.mxu3 %v2743_v53  ;;  %v2731_v62 = vor.u32 %v2929_v57, %v2728_v59  ;;  %v2735_v63 = vor.u32 %v2931_v61, %v2734_v60  ;;  %v2566_v0 = vld [vmem:[%s3321_s15 + $0x50] sm:$0xf]  ;;  %v2890_v1 = vld [vmem:[%s3321_s15 + $0x54] sm:$0xf0]  ;;  %v2889_v2 = vld [vmem:[%s3321_s15 + $0x54] sm:$0xf] }
  0x1c   : > { %692 = vmatpush.bf16.msra.mxu0 %v2898_v8  ;;  %v2568_v3 = vld [vmem:[%s3321_s15 + $0x58] sm:$0xf0]  ;;  %v2567_v4 = vor.u32 %v2890_v1, %v2566_v0  ;;  %v2834_v6 = vld [vmem:[%s4791_s5 + $0xa8] sm:$0xf]  ;;  %v2957_v7 = vld [vmem:[%s4791_s5 + $0xb0] sm:$0xf0] }
  0x1d   : > { %741 = vmatpush.bf16.msra.mxu1 %v2906_v9  ;;  %v2571_v5 = vor.u32 %v2889_v2, %v2568_v3  ;;  %v2835_v8 = vor.u32 %v2957_v7, %v2834_v6  ;;  %v2714_v9 = vld [vmem:[%s4790_s4 + $0x78] sm:$0xf]  ;;  %v2822_v18 = vld [vmem:[%s4791_s5 + $0x90] sm:$0xf]  ;;  %v2954_v19 = vld [vmem:[%s4791_s5 + $0x98] sm:$0xf0] }
  0x1e   : > { %971 = vmatpush.bf16.msra.mxu2 %v2727_v58  ;;  %v2924_v22 = vld [vmem:[%s4790_s4 + $0x68] sm:$0xf0]  ;;  %v2923_v23 = vld [vmem:[%s4790_s4 + $0x64] sm:$0xf]  ;;  %v2704_v24 = vld [vmem:[%s4790_s4 + $0x6c] sm:$0xf0] }
  0x1f   : > { %1020 = vmatpush.bf16.msra.mxu3 %v2731_v62  ;;  %v2925_v28 = vld [vmem:[%s4790_s4 + $0x70] sm:$0xf0]  ;;  %v2810_v29 = vld [vmem:[%s4791_s5 + $0x78] sm:$0xf]  ;;  %v2951_v31 = vld [vmem:[%s4791_s5 + $0x80] sm:$0xf0] }
  0x20   : > { %693 = vmatpush.bf16.msra.mxu0 %v2897_v10  ;;  %v2927_v10 = vld [vmem:[%s4790_s4 + $0x80] sm:$0xf0]  ;;  %v2811_v34 = vor.u32 %v2951_v31, %v2810_v29  ;;  %v2920_v35 = vld [vmem:[%s4790_s4 + $0x4c] sm:$0xf]  ;;  %v2692_v36 = vld [vmem:[%s4790_s4 + $0x54] sm:$0xf0] }
  0x21   : > { %742 = vmatpush.bf16.msra.mxu1 %v2905_v11  ;;  %v2926_v11 = vld [vmem:[%s4790_s4 + $0x7c] sm:$0xf]  ;;  %v2698_v37 = vld [vmem:[%s4790_s4 + $0x50] sm:$0xf]  ;;  %v2574_v40 = vld [vmem:[%s3321_s15 + $0x60] sm:$0xf]  ;;  %v2695_v41 = vor.u32 %v2920_v35, %v2692_v36 }
  0x22   : > { %v2892_v43 = vld [vmem:[%s3321_s15 + $0x64] sm:$0xf0]  ;;  %v2798_v46 = vld [vmem:[%s4791_s5 + $0x60] sm:$0xf]  ;;  %v2948_v47 = vld [vmem:[%s4791_s5 + $0x68] sm:$0xf0] }
  0x23   : > { %v2799_v48 = vor.u32 %v2948_v47, %v2798_v46  ;;  %v2575_v49 = vor.u32 %v2892_v43, %v2574_v40  ;;  %v2678_v51 = vld [vmem:[%s4790_s4 + $0x30] sm:$0xf]  ;;  %v2918_v52 = vld [vmem:[%s4790_s4 + $0x38] sm:$0xf0]  ;;  %v2917_v53 = vld [vmem:[%s4790_s4 + $0x34] sm:$0xf] }
  0x24   : > { %694 = vmatpush.bf16.msra.mxu0 %v2896_v12  ;;  %v2715_v12 = vor.u32 %v2927_v10, %v2714_v9  ;;  %v2680_v55 = vld [vmem:[%s4790_s4 + $0x3c] sm:$0xf0]  ;;  %v2686_v56 = vld [vmem:[%s4790_s4 + $0x38] sm:$0xf]  ;;  %v2919_v57 = vld [vmem:[%s4790_s4 + $0x40] sm:$0xf0] }
  0x25   : > { %743 = vmatpush.bf16.msra.mxu1 %v2904_v13  ;;  %v2716_v13 = vld [vmem:[%s4790_s4 + $0x84] sm:$0xf0]  ;;  %v2683_v58 = vor.u32 %v2917_v53, %v2680_v55  ;;  %v2687_v59 = vor.u32 %v2919_v57, %v2686_v56  ;;  %v2945_v61 = vld [vmem:[%s4791_s5 + $0x50] sm:$0xf0]  ;;  %v2666_v62 = vld [vmem:[%s4790_s4 + $0x18] sm:$0xf] }
  0x26   : > { %v2719_v16 = vor.u32 %v2926_v11, %v2716_v13  ;;  %972 = vmatpush.bf16.msra.mxu2 %v2715_v12  ;;  %v2786_v60 = vld [vmem:[%s4791_s5 + $0x48] sm:$0xf]  ;;  %v2915_v0 = vld [vmem:[%s4790_s4 + $0x20] sm:$0xf0]  ;;  %v2914_v1 = vld [vmem:[%s4790_s4 + $0x1c] sm:$0xf] }
  0x27   : > { %v2668_v2 = vld [vmem:[%s4790_s4 + $0x24] sm:$0xf0]  ;;  %v2667_v3 = vor.u32 %v2915_v0, %v2666_v62  ;;  %v2942_v9 = vld [vmem:[%s4791_s5 + $0x38] sm:$0xf0]  ;;  %v2654_v11 = vld [vmem:[%s4790_s4] sm:$0xf] }
  0x28   : > { %695 = vmatpush.bf16.msra.mxu0 %v2895_v14  ;;  %v2722_v14 = vld [vmem:[%s4790_s4 + $0x80] sm:$0xf]  ;;  %1021 = vmatpush.bf16.msra.mxu3 %v2719_v16  ;;  %v2671_v6 = vor.u32 %v2914_v1, %v2668_v2  ;;  %v2912_v12 = vld [vmem:[%s4790_s4 + $0x8] sm:$0xf0]  ;;  %v2911_v13 = vld [vmem:[%s4790_s4 + $0x4] sm:$0xf] }
  0x29   : > { %744 = vmatpush.bf16.msra.mxu1 %v2903_v15  ;;  %v2928_v15 = vld [vmem:[%s4790_s4 + $0x88] sm:$0xf0]  ;;  %v2662_v16 = vld [vmem:[%s4790_s4 + $0x8] sm:$0xf]  ;;  %v2750_v29 = vld [vmem:[%s4791_s5] sm:$0xf] }
  0x2a   : > { %v2723_v17 = vor.u32 %v2928_v15, %v2722_v14  ;;  %v2655_v14 = vor.u32 %v2912_v12, %v2654_v11  ;;  %v2656_v15 = vld [vmem:[%s4790_s4 + $0xc] sm:$0xf0]  ;;  %v786_v35 = vld [vmem:[%s3563_s20] sm:$0xff]  ;;  %v787_v36 = vld [vmem:[%s3563_s20 + $0x8] sm:$0xff] }
  0x2b   : > { %696 = vmatmul.bf16.vlgmr.msra.gmra.mxu0 %v2527_v20  ;;  %v2702_v20 = vld [vmem:[%s4790_s4 + $0x60] sm:$0xf]  ;;  %v2842_v43 = vld [vmem:[%s4791_s5 + $0xb0] sm:$0xf]  ;;  %v2950_v53 = vld [vmem:[%s4791_s5 + $0x7c] sm:$0xf] }
  0x2c   : > { %745 = vmatmul.bf16.vlgmr.msra.gmra.mxu1 %v2531_v21  ;;  %1068 = vmatpush.bf16.msrb.mxu0 %v2747_v54  ;;  %v2823_v21 = vor.u32 %v2954_v19, %v2822_v18  ;;  %v2703_v25 = vor.u32 %v2924_v22, %v2702_v20  ;;  %v2679_v54 = vor.u32 %v2918_v52, %v2678_v51  ;;  %v2762_v20 = vld [vmem:[%s4791_s5 + $0x18] sm:$0xf]  ;;  %v788_v51 = vld [vmem:[%s3563_s20 + $0x10] sm:$0xff]  ;;  %v2818_v11 = vld [vmem:[%s4791_s5 + $0x80] sm:$0xf] }
  0x2d   : > { %1285 = vmatpush.bf16.msrb.mxu1 %v2835_v8  ;;  %v2774_v8 = vld [vmem:[%s4791_s5 + $0x30] sm:$0xf]  ;;  %v2659_v18 = vor.u32 %v2911_v13, %v2656_v15  ;;  %v789_v52 = vld [vmem:[%s3563_s20 + $0x18] sm:$0xff]  ;;  %v2952_v12 = vld [vmem:[%s4791_s5 + $0x88] sm:$0xf0] }
  0x2e   : > { %973 = vmatpush.bf16.msra.mxu2 %v2703_v25  ;;  %v2775_v10 = vor.u32 %v2942_v9, %v2774_v8  ;;  %v2893_v25 = vld [vmem:[%s3321_s15 + $0x74] sm:$0xf]  ;;  %v3590_v55 = vpack.c.bf16 %v789_v52, %v788_v51  ;;  %v2819_v13 = vor.u32 %v2952_v12, %v2818_v11 }
  0x2f   : > { %v796_v52 = vld [vmem:[%s3563_s20 + $0x50] sm:$0xff] }
  0x30   : > { %1069 = vmatpush.bf16.msrb.mxu0 %v2735_v63  ;;  %v2787_v63 = vor.u32 %v2945_v61, %v2786_v60  ;;  %v2955_v60 = vld [vmem:[%s4791_s5 + $0xa0] sm:$0xf0] }
  0x31   : > { %1286 = vmatpush.bf16.msrb.mxu1 %v2823_v21  ;;  %v2939_v21 = vld [vmem:[%s4791_s5 + $0x20] sm:$0xf0] }
  0x32   : > { %v2763_v22 = vor.u32 %v2939_v21, %v2762_v20  ;;  %v793_v20 = vld [vmem:[%s3563_s20 + $0x38] sm:$0xff]  ;;  %v2944_v21 = vld [vmem:[%s4791_s5 + $0x4c] sm:$0xf] }
  0x34   : > { %1070 = vmatpush.bf16.msrb.mxu0 %v2723_v17  ;;  %v2913_v17 = vld [vmem:[%s4790_s4 + $0x10] sm:$0xf0] }
  0x35   : > { %1287 = vmatpush.bf16.msrb.mxu1 %v2811_v34  ;;  %v2663_v19 = vor.u32 %v2913_v17, %v2662_v16 }
  0x39   : > { %1288 = vmatpush.bf16.msrb.mxu1 %v2799_v48 }
  0x3b   : > { %701 = vmatmul.bf16.gmra.mxu0 %v2535_v26  ;;  %v2707_v26 = vor.u32 %v2923_v23, %v2704_v24  ;;  %v2582_v23 = vld [vmem:[%s3321_s15 + $0x70] sm:$0xf]  ;;  %v2894_v24 = vld [vmem:[%s3321_s15 + $0x74] sm:$0xf0] }
  0x3c   : > { %750 = vmatmul.bf16.gmra.mxu1 %v2539_v27  ;;  %v2710_v27 = vld [vmem:[%s4790_s4 + $0x68] sm:$0xf] }
  0x3d   : > { %v2711_v30 = vor.u32 %v2925_v28, %v2710_v27  ;;  %1022 = vmatpush.bf16.msra.mxu3 %v2707_v26  ;;  %1289 = vmatpush.bf16.msrb.mxu1 %v2787_v63  ;;  %v2584_v26 = vld [vmem:[%s3321_s15 + $0x78] sm:$0xf0]  ;;  %v2956_v27 = vld [vmem:[%s4791_s5 + $0xac] sm:$0xf]  ;;  %v2836_v28 = vld [vmem:[%s4791_s5 + $0xb4] sm:$0xf0] }
  0x3e   : > { %v2587_v31 = vor.u32 %v2893_v25, %v2584_v26 }
  0x3f   : > { %1071 = vmatpush.bf16.msrb.mxu0 %v2711_v30  ;;  %v2583_v30 = vor.u32 %v2894_v24, %v2582_v23 }
  0x41   : > { %1023 = vmatpush.bf16.msra.mxu3 %v2695_v41  ;;  %1290 = vmatpush.bf16.msrb.mxu1 %v2775_v10 }
  0x45   : > { %1024 = vmatpush.bf16.msra.mxu3 %v2683_v58  ;;  %1291 = vmatpush.bf16.msrb.mxu1 %v2763_v22  ;;  %v2788_v22 = vld [vmem:[%s4791_s5 + $0x54] sm:$0xf0] }
  0x46   : > { %v2791_v24 = vor.u32 %v2944_v21, %v2788_v22 }
  0x49   : > { %1025 = vmatpush.bf16.msra.mxu3 %v2671_v6  ;;  %v2800_v6 = vld [vmem:[%s4791_s5 + $0x6c] sm:$0xf0] }
  0x4b   : > { %706 = vmatmul.bf16.gmra.mxu0 %v2543_v32  ;;  %v2690_v32 = vld [vmem:[%s4790_s4 + $0x48] sm:$0xf] }
  0x4c   : > { %755 = vmatmul.bf16.gmra.mxu1 %v2547_v33  ;;  %v2921_v33 = vld [vmem:[%s4790_s4 + $0x50] sm:$0xf0] }
  0x4d   : > { %1026 = vmatpush.bf16.msra.mxu3 %v2659_v18 }
  0x5b   : > { %711 = vmatmul.bf16.gmra.mxu0 %v2551_v38  ;;  %v2691_v38 = vor.u32 %v2921_v33, %v2690_v32  ;;  %v2839_v32 = vor.u32 %v2956_v27, %v2836_v28  ;;  %v2936_v33 = vld [vmem:[%s4791_s5 + $0x8] sm:$0xf0]  ;;  %v2806_v27 = vld [vmem:[%s4791_s5 + $0x68] sm:$0xf]  ;;  %v2949_v28 = vld [vmem:[%s4791_s5 + $0x70] sm:$0xf0] }
  0x5c   : > { %760 = vmatmul.bf16.gmra.mxu1 %v2555_v39  ;;  %v2922_v39 = vld [vmem:[%s4790_s4 + $0x58] sm:$0xf0]  ;;  %v2751_v34 = vor.u32 %v2936_v33, %v2750_v29  ;;  %v2807_v29 = vor.u32 %v2949_v28, %v2806_v27 }
  0x5d   : > { %v2699_v42 = vor.u32 %v2922_v39, %v2698_v37  ;;  %974 = vmatpush.bf16.msra.mxu2 %v2691_v38  ;;  %v2953_v37 = vld [vmem:[%s4791_s5 + $0x94] sm:$0xf]  ;;  %v2824_v38 = vld [vmem:[%s4791_s5 + $0x9c] sm:$0xf0]  ;;  %v3573_v39 = vpack.c.bf16 %v787_v36, %v786_v35  ;;  %v795_v36 = vld [vmem:[%s3563_s20 + $0x48] sm:$0xff] }
  0x5e   : > { %1292 = vmatpush.bf16.msrb.mxu1 %v2751_v34  ;;  %v2827_v40 = vor.u32 %v2953_v37, %v2824_v38  ;;  %v794_v35 = vld [vmem:[%s3563_s20 + $0x40] sm:$0xff]  ;;  %v2941_v37 = vld [vmem:[%s4791_s5 + $0x34] sm:$0xf]  ;;  %v801_v27 = vld [vmem:[%s3563_s20 + $0x78] sm:$0xff] }
  0x5f   : > { %1072 = vmatpush.bf16.msrb.mxu0 %v2699_v42  ;;  %v2776_v38 = vld [vmem:[%s4791_s5 + $0x3c] sm:$0xf0] }
  0x61   : > { %975 = vmatpush.bf16.msra.mxu2 %v2679_v54  ;;  %v2812_v54 = vld [vmem:[%s4791_s5 + $0x84] sm:$0xf0] }
  0x62   : > { %v2815_v56 = vor.u32 %v2950_v53, %v2812_v54  ;;  %v797_v53 = vld [vmem:[%s3563_s20 + $0x58] sm:$0xff] }
  0x63   : > { %1073 = vmatpush.bf16.msrb.mxu0 %v2687_v59  ;;  %v2830_v59 = vld [vmem:[%s4791_s5 + $0x98] sm:$0xf]  ;;  %v2938_v54 = vld [vmem:[%s4791_s5 + $0x1c] sm:$0xf] }
  0x64   : > { %v2831_v61 = vor.u32 %v2955_v60, %v2830_v59 }
  0x65   : > { %976 = vmatpush.bf16.msra.mxu2 %v2667_v3  ;;  %v790_v3 = vld [vmem:[%s3563_s20 + $0x20] sm:$0xff] }
  0x69   : > { %977 = vmatpush.bf16.msra.mxu2 %v2655_v14 }
  0x6b   : > { %716 = vmatmul.bf16.gmra.mxu0 %v2559_v44  ;;  %v2891_v44 = vld [vmem:[%s3321_s15 + $0x64] sm:$0xf] }
  0x6c   : > { %765 = vmatmul.bf16.gmra.mxu1 %v2563_v45  ;;  %v2576_v45 = vld [vmem:[%s3321_s15 + $0x68] sm:$0xf0]  ;;  %s4250_s15 = scalar_lea.vmem %s4795_s9, %s3309_s26  ;;  %s2521_s26 = sshll.u32 %s4875_s12, 2 }
  0x6d   : > { %v2579_v50 = vor.u32 %v2891_v44, %v2576_v45  ;;  %1334 = vmatpush.bf16.msrb.mxu2 %v2839_v32  ;;  %v2958_v44 = vld [vmem:[%s4791_s5 + $0xb8] sm:$0xf0]  ;;  %s4310_s22 = scalar_lea.vmem %s4796_s10, %s2521_s26 }
  0x6e   : > { %v2843_v45 = vor.u32 %v2958_v44, %v2842_v43  ;;  %v2794_v44 = vld [vmem:[%s4791_s5 + $0x50] sm:$0xf] }
  0x70   : > { %1383 = vmatpush.bf16.msrb.mxu3 %v2843_v45  ;;  %v2946_v45 = vld [vmem:[%s4791_s5 + $0x58] sm:$0xf0] }
  0x71   : > { %1335 = vmatpush.bf16.msrb.mxu2 %v2827_v40  ;;  %v3641_v40 = vpack.c.bf16 %v795_v36, %v794_v35 }
  0x74   : > { %1384 = vmatpush.bf16.msrb.mxu3 %v2831_v61  ;;  %v2782_v61 = vld [vmem:[%s4791_s5 + $0x38] sm:$0xf] }
  0x75   : > { %1336 = vmatpush.bf16.msrb.mxu2 %v2815_v56  ;;  %v2764_v56 = vld [vmem:[%s4791_s5 + $0x24] sm:$0xf0] }
  0x78   : > { %1385 = vmatpush.bf16.msrb.mxu3 %v2819_v13  ;;  %v2940_v13 = vld [vmem:[%s4791_s5 + $0x28] sm:$0xf0] }
  0x7b   : > { %721 = vmatmul.bf16.gmra.mxu0 %v2567_v4  ;;  %v2674_v4 = vld [vmem:[%s4790_s4 + $0x20] sm:$0xf] }
  0x7c   : > { %770 = vmatmul.bf16.gmra.mxu1 %v2571_v5  ;;  %v2916_v5 = vld [vmem:[%s4790_s4 + $0x28] sm:$0xf0]  ;;  %1386 = vmatpush.bf16.msrb.mxu3 %v2807_v29 }
  0x7d   : > { %v2675_v7 = vor.u32 %v2916_v5, %v2674_v4  ;;  %v791_v4 = vld [vmem:[%s3563_s20 + $0x28] sm:$0xff]  ;;  %v2947_v5 = vld [vmem:[%s4791_s5 + $0x64] sm:$0xf] }
  0x7e   : > { %v2803_v8 = vor.u32 %v2947_v5, %v2800_v6  ;;  %v798_v5 = vld [vmem:[%s3563_s20 + $0x60] sm:$0xff]  ;;  %v799_v6 = vld [vmem:[%s3563_s20 + $0x68] sm:$0xff] }
  0x7f   : > { %1074 = vmatpush.bf16.msrb.mxu0 %v2675_v7  ;;  %v3607_v7 = vpack.c.bf16 %v791_v4, %v790_v3  ;;  %v3678_v11 = vpack.c.bf16 %v799_v6, %v798_v5 }
  0x80   : > { %1337 = vmatpush.bf16.msrb.mxu2 %v2803_v8  ;;  %v2935_v8 = vld [vmem:[%s4791_s5 + $0x4] sm:$0xf] }
  0x83   : > { %1075 = vmatpush.bf16.msrb.mxu0 %v2663_v19  ;;  %v792_v19 = vld [vmem:[%s3563_s20 + $0x30] sm:$0xff] }
  0x84   : > { %v3624_v23 = vpack.c.bf16 %v793_v20, %v792_v19  ;;  %1338 = vmatpush.bf16.msrb.mxu2 %v2791_v24  ;;  %v2758_v19 = vld [vmem:[%s4791_s5 + $0x8] sm:$0xf]  ;;  %v2937_v20 = vld [vmem:[%s4791_s5 + $0x10] sm:$0xf0] }
  0x85   : > { %v2759_v24 = vor.u32 %v2937_v20, %v2758_v19 }
  0x8b   : > { %726 = vmatmul.bf16.gmra.mxu0 %v2575_v49 }
  0x8c   : > { %775 = vmatmul.bf16.gmra.mxu1 %v2579_v50 }
  0x9b   : > { %731 = vmatmul.bf16.gmra.mxu0 %v2583_v30 }
  0x9c   : > { %780 = vmatmul.bf16.gmra.mxu1 %v2587_v31 }
  0xa8   : > { %v697_v41 = vpop.f32.mrf.mxu0 }
  0xa9   : > { %v746_v42 = vpop.f32.mrf.mxu1 }
  0xaa   : > { %v747_v48 = vadd.f32 %v746_v42, %v697_v41  ;;  %v2779_v41 = vor.u32 %v2941_v37, %v2776_v38 }
  0xac   : > { %1293 = vmatmul.bf16.vlgmr.msrb.gmra.mxu1 %v3573_v39  ;;  %1339 = vmatpush.bf16.msrb.mxu2 %v2779_v41 }
  0xb0   : > { %v699_v46 = vpop.f32.mrf.mxu0 }
  0xb1   : > { %v748_v47 = vpop.f32.mrf.mxu1 }
  0xb2   : > { %v749_v49 = vadd.f32 %v748_v47, %v699_v46  ;;  %v2795_v46 = vor.u32 %v2946_v45, %v2794_v44 }
  0xb4   : > { %v802_v50 = vpack.c.bf16 %v749_v49, %v747_v48  ;;  %1387 = vmatpush.bf16.msrb.mxu3 %v2795_v46 }
  0xb6   : > { %978 = vmatmul.bf16.vlgmr.msra.gmra.mxu2 %v802_v50  ;;  %1027 = vmatmul.bf16.vlgmr.msra.gmra.mxu3 %v802_v50 }
  0xb7   : > { %1076 = vmatmul.bf16.vlgmr.msrb.gmra.mxu0 %v802_v50 }
  0xb8   : > { %v702_v57 = vpop.f32.mrf.mxu0 }
  0xb9   : > { %v751_v58 = vpop.f32.mrf.mxu1 }
  0xba   : > { %v752_v0 = vadd.f32 %v751_v58, %v702_v57  ;;  %v3658_v57 = vpack.c.bf16 %v797_v53, %v796_v52  ;;  %v2767_v58 = vor.u32 %v2938_v54, %v2764_v56 }
  0xbc   : > { %1298 = vmatmul.bf16.gmra.mxu1 %v3590_v55  ;;  %1340 = vmatpush.bf16.msrb.mxu2 %v2767_v58 }
  0xc0   : > { %v704_v62 = vpop.f32.mrf.mxu0 }
  0xc1   : > { %v753_v63 = vpop.f32.mrf.mxu1 }
  0xc2   : > { %v754_v1 = vadd.f32 %v753_v63, %v704_v62  ;;  %v2943_v62 = vld [vmem:[%s4791_s5 + $0x40] sm:$0xf0] }
  0xc3   : > { %v2783_v63 = vor.u32 %v2943_v62, %v2782_v61 }
  0xc4   : > { %v803_v2 = vpack.c.bf16 %v754_v1, %v752_v0 }
  0xc5   : > { %1388 = vmatpush.bf16.msrb.mxu3 %v2783_v63 }
  0xc6   : > { %983 = vmatmul.bf16.gmra.mxu2 %v803_v2  ;;  %1032 = vmatmul.bf16.gmra.mxu3 %v803_v2 }
  0xc7   : > { %1081 = vmatmul.bf16.gmra.mxu0 %v803_v2 }
  0xc8   : > { %v707_v9 = vpop.f32.mrf.mxu0 }
  0xc9   : > { %v756_v10 = vpop.f32.mrf.mxu1 }
  0xca   : > { %v757_v16 = vadd.f32 %v756_v10, %v707_v9  ;;  %v2752_v9 = vld [vmem:[%s4791_s5 + $0xc] sm:$0xf0]  ;;  %v2770_v10 = vld [vmem:[%s4791_s5 + $0x20] sm:$0xf] }
  0xcb   : > { %v2755_v12 = vor.u32 %v2935_v8, %v2752_v9 }
  0xcc   : > { %1303 = vmatmul.bf16.gmra.mxu1 %v3607_v7 }
  0xcd   : > { %1341 = vmatpush.bf16.msrb.mxu2 %v2755_v12 }
  0xd0   : > { %v709_v14 = vpop.f32.mrf.mxu0 }
  0xd1   : > { %v758_v15 = vpop.f32.mrf.mxu1 }
  0xd2   : > { %v759_v17 = vadd.f32 %v758_v15, %v709_v14 }
  0xd4   : > { %v804_v18 = vpack.c.bf16 %v759_v17, %v757_v16  ;;  %v2771_v16 = vor.u32 %v2940_v13, %v2770_v10 }
  0xd6   : > { %988 = vmatmul.bf16.gmra.mxu2 %v804_v18  ;;  %1037 = vmatmul.bf16.gmra.mxu3 %v804_v18 }
  0xd7   : > { %1086 = vmatmul.bf16.gmra.mxu0 %v804_v18  ;;  %1389 = vmatpush.bf16.msrb.mxu3 %v2771_v16 }
  0xd8   : > { %v712_v25 = vpop.f32.mrf.mxu0 }
  0xd9   : > { %v761_v26 = vpop.f32.mrf.mxu1 }
  0xda   : > { %v762_v32 = vadd.f32 %v761_v26, %v712_v25  ;;  %v800_v26 = vld [vmem:[%s3563_s20 + $0x70] sm:$0xff] }
  0xdb   : > { %1390 = vmatpush.bf16.msrb.mxu3 %v2759_v24  ;;  %v3692_v28 = vpack.c.bf16 %v801_v27, %v800_v26 }
  0xdc   : > { %1308 = vmatmul.bf16.gmra.mxu1 %v3624_v23 }
  0xe0   : > { %v714_v30 = vpop.f32.mrf.mxu0 }
  0xe1   : > { %v763_v31 = vpop.f32.mrf.mxu1 }
  0xe2   : > { %v764_v33 = vadd.f32 %v763_v31, %v714_v30 }
  0xe4   : > { %v805_v34 = vpack.c.bf16 %v764_v33, %v762_v32 }
  0xe6   : > { %993 = vmatmul.bf16.gmra.mxu2 %v805_v34  ;;  %1042 = vmatmul.bf16.gmra.mxu3 %v805_v34 }
  0xe7   : > { %1091 = vmatmul.bf16.gmra.mxu0 %v805_v34 }
  0xe8   : > { %v717_v42 = vpop.f32.mrf.mxu0 }
  0xe9   : > { %v766_v43 = vpop.f32.mrf.mxu1 }
  0xea   : > { %v767_v49 = vadd.f32 %v766_v43, %v717_v42 }
  0xec   : > { %1313 = vmatmul.bf16.gmra.mxu1 %v3641_v40 }
  0xf0   : > { %v719_v47 = vpop.f32.mrf.mxu0 }
  0xf1   : > { %v768_v48 = vpop.f32.mrf.mxu1 }
  0xf2   : > { %v769_v50 = vadd.f32 %v768_v48, %v719_v47 }
  0xf4   : > { %v806_v51 = vpack.c.bf16 %v769_v50, %v767_v49 }
  0xf6   : > { %998 = vmatmul.bf16.gmra.mxu2 %v806_v51  ;;  %1047 = vmatmul.bf16.gmra.mxu3 %v806_v51 }
  0xf7   : > { %1096 = vmatmul.bf16.gmra.mxu0 %v806_v51 }
  0xf8   : > { %v722_v59 = vpop.f32.mrf.mxu0 }
  0xf9   : > { %v771_v60 = vpop.f32.mrf.mxu1 }
  0xfa   : > { %v772_v2 = vadd.f32 %v771_v60, %v722_v59 }
  0xfc   : > { %1318 = vmatmul.bf16.gmra.mxu1 %v3658_v57 }
 0x100   : > { %v724_v0 = vpop.f32.mrf.mxu0 }
 0x101   : > { %v773_v1 = vpop.f32.mrf.mxu1 }
 0x102   : > { %v774_v3 = vadd.f32 %v773_v1, %v724_v0 }
 0x104   : > { %v807_v4 = vpack.c.bf16 %v774_v3, %v772_v2 }
 0x106   : > { %1003 = vmatmul.bf16.gmra.mxu2 %v807_v4  ;;  %1052 = vmatmul.bf16.gmra.mxu3 %v807_v4 }
 0x107   : > { %1101 = vmatmul.bf16.gmra.mxu0 %v807_v4 }
 0x108   : > { %v727_v14 = vpop.f32.mrf.mxu0 }
 0x109   : > { %v776_v15 = vpop.f32.mrf.mxu1 }
 0x10a   : > { %v777_v21 = vadd.f32 %v776_v15, %v727_v14 }
 0x10c   : > { %1323 = vmatmul.bf16.gmra.mxu1 %v3678_v11 }
 0x110   : > { %v729_v17 = vpop.f32.mrf.mxu0 }
 0x111   : > { %v778_v18 = vpop.f32.mrf.mxu1 }
 0x112   : > { %v779_v22 = vadd.f32 %v778_v18, %v729_v17 }
 0x114   : > { %v808_v25 = vpack.c.bf16 %v779_v22, %v777_v21 }
 0x116   : > { %1008 = vmatmul.bf16.gmra.mxu2 %v808_v25  ;;  %1057 = vmatmul.bf16.gmra.mxu3 %v808_v25 }
 0x117   : > { %1106 = vmatmul.bf16.gmra.mxu0 %v808_v25 }
 0x118   : > { %v732_v29 = vpop.f32.mrf.mxu0 }
 0x119   : > { %v781_v30 = vpop.f32.mrf.mxu1 }
 0x11a   : > { %v782_v33 = vadd.f32 %v781_v30, %v732_v29 }
 0x11c   : > { %1328 = vmatmul.bf16.gmra.mxu1 %v3692_v28 }
 0x120   : > { %v734_v31 = vpop.f32.mrf.mxu0 }
 0x121   : > { %v783_v32 = vpop.f32.mrf.mxu1 }
 0x122   : > { %v784_v34 = vadd.f32 %v783_v32, %v734_v31 }
 0x124   : > { %v809_v35 = vpack.c.bf16 %v784_v34, %v782_v33 }
 0x126   : > { %1013 = vmatmul.bf16.gmra.mxu2 %v809_v35  ;;  %1062 = vmatmul.bf16.gmra.mxu3 %v809_v35 }
 0x127   : > { %1111 = vmatmul.bf16.gmra.mxu0 %v809_v35 }
 0x129   : > { %v1294_v42 = vpop.f32.mrf.mxu1 }
 0x134   : > { %v3705_v45 = vpop.f32.mrf.mxu0 }
 0x136   : > { %1342 = vmatmul.bf16.vlgmr.msrb.gmra.mxu2 %v3573_v39  ;;  %1391 = vmatmul.bf16.vlgmr.msrb.gmra.mxu3 %v3573_v39  ;;  %v1296_v39 = vpop.f32.mrf.mxu1 }
 0x139   : > { %v979_v36 = vpop.f32.mrf.mxu2  ;;  %v3697_v37 = vpop.f32.mrf.mxu3 }
 0x13a   : > { %v1432_v2 = vadd.f32 %v1294_v42, %v979_v36 }
 0x13c   : > { %v3713_v50 = vpop.f32.mrf.mxu0 }
 0x141   : > { %v981_v38 = vpop.f32.mrf.mxu2  ;;  %v3699_v41 = vpop.f32.mrf.mxu3 }
 0x142   : > { %v1434_v4 = vadd.f32 %v1296_v39, %v981_v38 }
 0x144   : > { %v3717_v53 = vpop.f32.mrf.mxu0 }
 0x146   : > { %1347 = vmatmul.bf16.gmra.mxu2 %v3590_v55  ;;  %1396 = vmatmul.bf16.gmra.mxu3 %v3590_v55  ;;  %v1299_v55 = vpop.f32.mrf.mxu1 }
 0x149   : > { %v984_v43 = vpop.f32.mrf.mxu2  ;;  %v3703_v44 = vpop.f32.mrf.mxu3 }
 0x14a   : > { %v1436_v5 = vadd.f32 %v1299_v55, %v984_v43 }
 0x14e   : > { %v1301_v54 = vpop.f32.mrf.mxu1 }
 0x151   : > { %v986_v46 = vpop.f32.mrf.mxu2  ;;  %v3707_v47 = vpop.f32.mrf.mxu3 }
 0x152   : > { %v1438_v16 = vadd.f32 %v1301_v54, %v986_v46 }
 0x156   : > { %1352 = vmatmul.bf16.gmra.mxu2 %v3607_v7  ;;  %1401 = vmatmul.bf16.gmra.mxu3 %v3607_v7  ;;  %v3723_v7 = vpop.f32.mrf.mxu0  ;;  %v1304_v59 = vpop.f32.mrf.mxu1 }
 0x159   : > { %v989_v48 = vpop.f32.mrf.mxu2  ;;  %v3711_v49 = vpop.f32.mrf.mxu3 }
 0x15a   : > { %v1440_v24 = vadd.f32 %v1304_v59, %v989_v48 }
 0x15e   : > { %v3729_v62 = vpop.f32.mrf.mxu0  ;;  %v1306_v1 = vpop.f32.mrf.mxu1 }
 0x161   : > { %v991_v51 = vpop.f32.mrf.mxu2  ;;  %v3715_v52 = vpop.f32.mrf.mxu3 }
 0x162   : > { %v1442_v27 = vadd.f32 %v1306_v1, %v991_v51 }
 0x166   : > { %1357 = vmatmul.bf16.gmra.mxu2 %v3624_v23  ;;  %1406 = vmatmul.bf16.gmra.mxu3 %v3624_v23  ;;  %v3738_v23 = vld [vmem:[%s4792_s6] sm:$0x3]  ;;  %v3749_v10 = vpop.f32.mrf.mxu0  ;;  %v1309_v13 = vpop.f32.mrf.mxu1 }
 0x167   : > { %v3741_v3 = vperm.slane %v3738_v23, 0 }
 0x169   : > { %v994_v56 = vpop.f32.mrf.mxu2  ;;  %v3721_v58 = vpop.f32.mrf.mxu3  ;;  %v1472_v9 = vadd.f32 %v3741_v3, %v1434_v4  ;;  %v1474_v12 = vadd.f32 %v3741_v3, %v1436_v5  ;;  %v1476_v20 = vadd.f32 %v3741_v3, %v1438_v16  ;;  %v1478_v33 = vadd.f32 %v3741_v3, %v1440_v24 }
 0x16a   : > { %v1480_v35 = vadd.f32 %v3741_v3, %v1442_v27  ;;  %v1444_v36 = vadd.f32 %v1309_v13, %v994_v56 }
 0x16b   : > { %v2846_v15 = vmul.f32 -1.442695, %v1472_v9  ;;  %v2848_v17 = vmul.f32 -1.442695, %v1474_v12  ;;  %v2850_v22 = vmul.f32 -1.442695, %v1476_v20 }
 0x16c   : > { %v2852_v42 = vmul.f32 -1.442695, %v1478_v33  ;;  %v2854_v46 = vmul.f32 -1.442695, %v1480_v35  ;;  %v1482_v55 = vadd.f32 %v3741_v3, %v1444_v36 }
 0x16e   : > { %v3759_v21 = vpop.f32.mrf.mxu0  ;;  %v1311_v25 = vpop.f32.mrf.mxu1 }
 0x171   : > { %v996_v60 = vpop.f32.mrf.mxu2  ;;  %v3725_v61 = vpop.f32.mrf.mxu3 }
 0x172   : > { %v1446_v39 = vadd.f32 %v1311_v25, %v996_v60 }
 0x176   : > { %1362 = vmatmul.bf16.gmra.mxu2 %v3641_v40  ;;  %1411 = vmatmul.bf16.gmra.mxu3 %v3641_v40  ;;  %v1470_v40 = vadd.f32 %v3741_v3, %v1432_v2  ;;  %v3774_v43 = vpop.f32.mrf.mxu0  ;;  %v1314_v51 = vpop.f32.mrf.mxu1  ;;  %v2856_v2 = vmul.f32 -1.442695, %v1482_v55 }
 0x178   : > { %v2844_v14 = vmul.f32 -1.442695, %v1470_v40 }
 0x179   : > { %v3731_v63 = vpop.f32.mrf.mxu2  ;;  %v3733_v0 = vpop.f32.mrf.mxu3 }
 0x17a   : > { %3016 = vpow2.f32 %v2844_v14  ;;  %v1448_v4 = vadd.f32 %v1314_v51, %v3731_v63 }
 0x17b   : > { %3018 = vpow2.f32 %v2846_v15 }
 0x17c   : > { %3020 = vpow2.f32 %v2848_v17  ;;  %v1486_v16 = vadd.f32 %v3741_v3, %v1448_v4 }
 0x17d   : > { %3022 = vpow2.f32 %v2850_v22  ;;  %v3810_v22 = vld [vmem:[%s4793_s7] ss:$0 sm:$0xff] }
 0x17e   : > { %v3798_v13 = vpop.f32.mrf.mxu0  ;;  %v1316_v20 = vpop.f32.mrf.mxu1  ;;  %v2860_v33 = vmul.f32 -1.442695, %v1486_v16  ;;  %v3843_v4 = vadd.f32 %v3810_v22, %v3713_v50 }
 0x180   : > { %v3017_v26 = vpop.eup %3016 }
 0x181   : > { %v3744_v6 = vpop.f32.mrf.mxu2  ;;  %v3746_v8 = vpop.f32.mrf.mxu3  ;;  %v3765_v32 = vadd.f32 1.0, %v3017_v26 }
 0x182   : > { %v3019_v29 = vpop.eup %3018  ;;  %v1450_v35 = vadd.f32 %v1316_v20, %v3744_v6  ;;  %v3935_v20 = vadd.f32 %v3810_v22, %v3749_v10 }
 0x183   : > { %v3021_v31 = vpop.eup %3020  ;;  %v3768_v34 = vadd.f32 1.0, %v3019_v29  ;;  %3024 = vrcp.f32 %v3765_v32  ;;  %vm1635_vm0 = vweird.f32 %v3765_v32 }
 0x184   : > { %v3771_v38 = vadd.f32 1.0, %v3021_v31  ;;  %v3023_v48 = vpop.eup %3022 }
 0x185   : > { %3026 = vrcp.f32 %v3768_v34  ;;  %v3785_v59 = vadd.f32 1.0, %v3023_v48  ;;  %v1671_v16 = vand.u32 2147483648, %v3768_v34  ;;  %vm1665_vm5 = vweird.f32 %v3768_v34 }
 0x186   : > { %1367 = vmatmul.bf16.gmra.mxu2 %v3658_v57  ;;  %1416 = vmatmul.bf16.gmra.mxu3 %v3658_v57  ;;  %3028 = vrcp.f32 %v3771_v38  ;;  %vm1695_vm9 = vweird.f32 %v3771_v38 }
 0x187   : > { %3030 = vpow2.f32 %v2852_v42  ;;  %v3825_v42 = vadd.f32 %v3810_v22, %v3705_v45  ;;  %vm1725_vm13 = vweird.f32 %v3785_v59 }
 0x188   : > { %3032 = vpow2.f32 %v2854_v46 }
 0x189   : > { %v3754_v18 = vpop.f32.mrf.mxu2  ;;  %v3756_v19 = vpop.f32.mrf.mxu3  ;;  %3034 = vrcp.f32 %v3785_v59 }
 0x18a   : > { %v3788_v1 = vpop.eup %3024  ;;  %3036 = vpow2.f32 %v2856_v2 }
 0x18b   : > { %v3790_v60 = vpop.eup %3026  ;;  %v1631_v9 = vmul.f32 %v3788_v1, %v3765_v32  ;;  %vm1636_vm1 = vweird.f32 %v3788_v1 }
 0x18c   : > { %v3793_v5 = vpop.eup %3028  ;;  %v1661_v14 = vmul.f32 %v3790_v60, %v3768_v34  ;;  %vm1666_vm3 = vweird.f32 %v3790_v60  ;;  %vm3875_vm4 = vmor %vm1635_vm0, %vm1636_vm1 }
 0x18d   : > { %v3031_v12 = vpop.eup %3030  ;;  %v1632_v25 = vsub.f32 1.0, %v1631_v9  ;;  %v1691_v29 = vmul.f32 %v3793_v5, %v3771_v38  ;;  %v3849_v9 = vpop.f32.mrf.mxu0  ;;  %vm3892_vm7 = vmor %vm1665_vm5, %vm1666_vm3  ;;  %vm1696_vm8 = vweird.f32 %v3793_v5 }
 0x18e   : > { %v3033_v15 = vpop.eup %3032  ;;  %v3812_v24 = vadd.f32 1.0, %v3031_v12  ;;  %v1662_v27 = vsub.f32 1.0, %v1661_v14  ;;  %v1641_v12 = vand.u32 2147483648, %v3765_v32  ;;  %v1669_v14 = vand.u32 2147483647, %v3768_v34  ;;  %vm3923_vm10 = vmor %vm1695_vm9, %vm1696_vm8 }
 0x18f   : > { %v3814_v26 = vadd.f32 1.0, %v3033_v15  ;;  %v3818_v31 = vpop.eup %3034  ;;  %v1633_v46 = vmul.f32 %v3788_v1, %v1632_v25  ;;  %v1692_v6 = vsub.f32 1.0, %v1691_v29 }
 0x190   : > { %v3037_v36 = vpop.eup %3036  ;;  %v1663_v48 = vmul.f32 %v3790_v60, %v1662_v27  ;;  %v1721_v2 = vmul.f32 %v3818_v31, %v3785_v59  ;;  %vm3880_vm6 = vcmp.eq.f32.partialorder %v1669_v14, 8.507059e+37  ;;  %vm1726_vm12 = vweird.f32 %v3818_v31 }
 0x191   : > { %v3761_v30 = vpop.f32.mrf.mxu2  ;;  %v3763_v57 = vpop.f32.mrf.mxu3  ;;  %v3832_v51 = vadd.f32 1.0, %v3037_v36  ;;  %v1634_v15 = vadd.f32 %v3788_v1, %v1633_v46  ;;  %v1642_v46 = vor.u32 1.1754944e-38, %v1641_v12  ;;  %vm3972_vm15 = vmor %vm1725_vm13, %vm1726_vm12  ;;  %vm1755_vm0 = vweird.f32 %v3812_v24 }
 0x192   : > { %4798 = vst [vmem:[#allocation2_spill] sm:$0xff] %v3763_v57  ;;  %v1722_v29 = vsub.f32 1.0, %v1721_v2  ;;  %vm1785_vm3 = vweird.f32 %v3814_v26 }
 0x193   : > { %vm1815_vm9 = vweird.f32 %v3832_v51 }
 0x196   : > { %1372 = vmatmul.bf16.gmra.mxu2 %v3678_v11  ;;  %1421 = vmatmul.bf16.gmra.mxu3 %v3678_v11  ;;  %v1484_v11 = vadd.f32 %v3741_v3, %v1446_v39  ;;  %v1639_v39 = vand.u32 2147483647, %v3765_v32  ;;  %v1664_v32 = vadd.f32 %v3790_v60, %v1663_v48  ;;  %v1638_v48 = vsel %vm3875_vm4, %v3788_v1, %v1634_v15 }
 0x198   : > { %v2858_v40 = vmul.f32 -1.442695, %v1484_v11  ;;  %vm3859_vm2 = vcmp.eq.f32.partialorder %v1639_v39, 8.507059e+37  ;;  %v1668_v15 = vsel %vm3892_vm7, %v3790_v60, %v1664_v32  ;;  %v1759_v39 = vand.u32 2147483647, %v3812_v24 }
 0x199   : > { %v3781_v54 = vpop.f32.mrf.mxu2  ;;  %v3783_v56 = vpop.f32.mrf.mxu3 }
 0x19a   : > { %4799 = vst [vmem:[#allocation3_spill] sm:$0xff] %v3783_v56  ;;  %3038 = vpow2.f32 %v2858_v40  ;;  %v3847_v40 = vadd.f32 %v3810_v22, %v3717_v53  ;;  %v1693_v53 = vmul.f32 %v3793_v5, %v1692_v6  ;;  %vm3989_vm1 = vcmp.eq.f32.partialorder %v1759_v39, 8.507059e+37 }
 0x19b   : > { %3040 = vrcp.f32 %v3812_v24 }
 0x19c   : > { %3042 = vrcp.f32 %v3814_v26  ;;  %v1694_v2 = vadd.f32 %v3793_v5, %v1693_v53  ;;  %v3912_v53 = vadd.f32 %v3810_v22, %v3729_v62 }
 0x19d   : > { %3044 = vpow2.f32 %v2860_v33 }
 0x19e   : > { %3046 = vrcp.f32 %v3832_v51 }
 0x1a0   : > { %v3039_v55 = vpop.eup %3038 }
 0x1a1   : > { %v3803_v17 = vpop.f32.mrf.mxu2  ;;  %v3805_v63 = vpop.f32.mrf.mxu3  ;;  %v3857_v50 = vadd.f32 1.0, %v3039_v55  ;;  %v1672_v55 = vor.u32 1.1754944e-38, %v1671_v16  ;;  %v1723_v16 = vmul.f32 %v3818_v31, %v1722_v29  ;;  %v1729_v29 = vand.u32 2147483647, %v3785_v59 }
 0x1a2   : > { %4800 = vst [vmem:[#allocation4_spill] sm:$0xff] %v3805_v63  ;;  %v3865_v25 = vpop.eup %3040  ;;  %v3918_v63 = vsel %vm3859_vm2, %v1642_v46, %v1638_v48  ;;  %v1698_v48 = vsel %vm3923_vm10, %v3793_v5, %v1694_v2 }
 0x1a3   : > { %v3869_v33 = vpop.eup %3042  ;;  %3048 = vrcp.f32 %v3857_v50  ;;  %v1751_v1 = vmul.f32 %v3865_v25, %v3812_v24  ;;  %v3941_v46 = vsel %vm3880_vm6, %v1672_v55, %v1668_v15  ;;  %vm3960_vm14 = vcmp.eq.f32.partialorder %v1729_v29, 8.507059e+37 }
 0x1a4   : > { %v3045_v6 = vpop.eup %3044  ;;  %v1781_v36 = vmul.f32 %v3869_v33, %v3814_v26  ;;  %v1761_v15 = vand.u32 2147483648, %v3812_v24  ;;  %vm1756_vm2 = vweird.f32 %v3865_v25  ;;  %vm1786_vm4 = vweird.f32 %v3869_v33 }
 0x1a5   : > { %v3921_v34 = vpop.eup %3046  ;;  %vm4028_vm6 = vmor %vm1755_vm0, %vm1756_vm2  ;;  %vm1845_vm12 = vweird.f32 %v3857_v50 }
 0x1a6   : > { %1377 = vmatmul.bf16.gmra.mxu2 %v3692_v28  ;;  %1426 = vmatmul.bf16.gmra.mxu3 %v3692_v28  ;;  %v1488_v28 = vadd.f32 %v3741_v3, %v1450_v35  ;;  %v3873_v35 = vadd.f32 %v3810_v22, %v3723_v7  ;;  %v1699_v7 = vand.u32 2147483647, %v3771_v38  ;;  %v1782_v56 = vsub.f32 1.0, %v1781_v36  ;;  %vm4043_vm7 = vmor %vm1785_vm3, %vm1786_vm4 }
 0x1a7   : > { %v1811_v55 = vmul.f32 %v3921_v34, %v3832_v51  ;;  %v3997_v36 = vadd.f32 %v3810_v22, %v3774_v43  ;;  %vm1816_vm8 = vweird.f32 %v3921_v34 }
 0x1a8   : > { %v2862_v27 = vmul.f32 -1.442695, %v1488_v28  ;;  %v1701_v28 = vand.u32 2147483648, %v3771_v38  ;;  %vm3927_vm11 = vcmp.eq.f32.partialorder %v1699_v7, 8.507059e+37  ;;  %v3937_v38 = vpop.f32.mrf.mxu0  ;;  %v1752_v7 = vsub.f32 1.0, %v1751_v1 }
 0x1a9   : > { %v3835_v11 = vpop.f32.mrf.mxu2  ;;  %v3837_v45 = vpop.f32.mrf.mxu3  ;;  %v1783_v32 = vmul.f32 %v3869_v33, %v1782_v56  ;;  %v1762_v56 = vor.u32 1.1754944e-38, %v1761_v15 }
 0x1aa   : > { %4801 = vst [vmem:[#allocation5_spill] sm:$0xff] %v3837_v45  ;;  %3050 = vpow2.f32 %v2862_v27  ;;  %v3914_v45 = vadd.f32 1.0, %v3045_v6  ;;  %v1319_v27 = vpop.f32.mrf.mxu1  ;;  %v1702_v62 = vor.u32 1.1754944e-38, %v1701_v28  ;;  %v1731_v6 = vand.u32 2147483648, %v3785_v59  ;;  %v3949_v10 = vpop.eup %3048 }
 0x1ab   : > { %v1452_v28 = vadd.f32 %v1319_v27, %v3754_v18  ;;  %v3958_v18 = vadd.f32 %v3810_v22, %v3759_v21  ;;  %v1753_v21 = vmul.f32 %v3865_v25, %v1752_v7  ;;  %v1841_v57 = vmul.f32 %v3949_v10, %v3857_v50 }
 0x1ac   : > { %3052 = vrcp.f32 %v3914_v45  ;;  %v1732_v1 = vor.u32 1.1754944e-38, %v1731_v6  ;;  %v3970_v59 = vsel %vm3927_vm11, %v1702_v62, %v1698_v48  ;;  %v1789_v62 = vand.u32 2147483647, %v3814_v26  ;;  %vm4085_vm11 = vmor %vm1815_vm9, %vm1816_vm8 }
 0x1ad   : > { %v1490_v27 = vadd.f32 %v3741_v3, %v1452_v28  ;;  %v1812_v28 = vsub.f32 1.0, %v1811_v55  ;;  %v1754_v55 = vadd.f32 %v3865_v25, %v1753_v21  ;;  %v1842_v21 = vsub.f32 1.0, %v1841_v57 }
 0x1ae   : > { %vm4012_vm5 = vcmp.eq.f32.partialorder %v1789_v62, 8.507059e+37  ;;  %v1819_v62 = vand.u32 2147483647, %v3832_v51  ;;  %vm1875_vm0 = vweird.f32 %v3914_v45 }
 0x1b0   : > { %v3051_v5 = vpop.eup %3050  ;;  %vm4064_vm10 = vcmp.eq.f32.partialorder %v1819_v62, 8.507059e+37 }
 0x1b1   : > { %v3900_v12 = vpop.f32.mrf.mxu2  ;;  %v3902_v14 = vpop.f32.mrf.mxu3  ;;  %v3986_v6 = vadd.f32 1.0, %v3051_v5  ;;  %v2864_v5 = vmul.f32 -1.442695, %v1490_v27  ;;  %v4022_v27 = vadd.f32 %v3810_v22, %v3798_v13  ;;  %v1758_v13 = vsel %vm4028_vm6, %v3865_v25, %v1754_v55 }
 0x1b2   : > { %4810 = vst [vmem:[#allocation6_spill] sm:$0xff] %v3902_v14  ;;  %v1724_v14 = vadd.f32 %v3818_v31, %v1723_v16  ;;  %v3966_v16 = vperm.slane %v3738_v23, 1  ;;  %v1321_v43 = vpop.f32.mrf.mxu1  ;;  %v1849_v25 = vand.u32 2147483647, %v3857_v50  ;;  %v1851_v55 = vand.u32 2147483648, %v3857_v50 }
 0x1b3   : > { %3054 = vrcp.f32 %v3986_v6  ;;  %4823 = vst [vmem:[#allocation7_spill] sm:$0xff] %v4022_v27  ;;  %v1454_v57 = vadd.f32 %v1321_v43, %v3761_v30  ;;  %vm1905_vm3 = vweird.f32 %v3986_v6 }
 0x1b4   : > { %v1728_v23 = vsel %vm3972_vm15, %v3818_v31, %v1724_v14  ;;  %v1791_v31 = vand.u32 2147483648, %v3814_v26  ;;  %v4001_v14 = vpop.eup %3052  ;;  %vm4090_vm13 = vcmp.eq.f32.partialorder %v1849_v25, 8.507059e+37  ;;  %v1879_v25 = vand.u32 2147483647, %v3914_v45 }
 0x1b5   : > { %v4006_v39 = vsel %vm3960_vm14, %v1732_v1, %v1728_v23  ;;  %v1813_v1 = vmul.f32 %v3921_v34, %v1812_v28  ;;  %v1821_v28 = vand.u32 2147483648, %v3832_v51  ;;  %v4079_v51 = vld [vmem:[%s4794_s8] ss:$0 sm:$0xff]  ;;  %vm1846_vm14 = vweird.f32 %v3949_v10 }
 0x1b6   : > { %vm4123_vm15 = vmor %vm1845_vm12, %vm1846_vm14  ;;  %vm4137_vm2 = vcmp.eq.f32.partialorder %v1879_v25, 8.507059e+37 }
 0x1b7   : > { %v1814_v43 = vadd.f32 %v3921_v34, %v1813_v1  ;;  %v1492_v1 = vadd.f32 %v3741_v3, %v1454_v57  ;;  %v1822_v7 = vor.u32 1.1754944e-38, %v1821_v28 }
 0x1b9   : > { %v1343_v60 = vpop.f32.mrf.mxu2  ;;  %v3979_v29 = vpop.f32.mrf.mxu3  ;;  %v1818_v24 = vsel %vm4085_vm11, %v3921_v34, %v1814_v43  ;;  %v2866_v34 = vmul.f32 -1.442695, %v1492_v1 }
 0x1ba   : > { %v1433_v48 = vadd.f32 %v1343_v60, %v3697_v37  ;;  %v1784_v60 = vadd.f32 %v3869_v33, %v1783_v32  ;;  %v1792_v32 = vor.u32 1.1754944e-38, %v1791_v31  ;;  %v4068_v23 = vpop.eup %3054  ;;  %v1324_v28 = vpop.f32.mrf.mxu1 }
 0x1bc   : > { %v1471_v37 = vadd.f32 %v3966_v16, %v1433_v48  ;;  %v4017_v48 = vpop.f32.mrf.mxu0  ;;  %v1788_v30 = vsel %vm4043_vm7, %v3869_v33, %v1784_v60 }
 0x1be   : > { %v2845_v2 = vmul.f32 -1.442695, %v1471_v37  ;;  %v1871_v37 = vmul.f32 %v4001_v14, %v3914_v45 }
 0x1c0   : > { %3056 = vpow2.f32 %v2845_v2  ;;  %v1843_v2 = vmul.f32 %v3949_v10, %v1842_v21  ;;  %v1872_v60 = vsub.f32 1.0, %v1871_v37  ;;  %v1852_v37 = vor.u32 1.1754944e-38, %v1851_v55 }
 0x1c1   : > { %3058 = vpow2.f32 %v2864_v5  ;;  %v1345_v31 = vpop.f32.mrf.mxu2  ;;  %v4048_v27 = vpop.f32.mrf.mxu3  ;;  %v4061_v5 = vsel %vm3989_vm1, %v1762_v56, %v1758_v13  ;;  %v4083_v56 = vsel %vm4012_vm5, %v1792_v32, %v1788_v30  ;;  %v1901_v55 = vmul.f32 %v4068_v23, %v3986_v6 }
 0x1c2   : > { %v1435_v26 = vadd.f32 %v1345_v31, %v3699_v41  ;;  %v4072_v41 = vadd.f32 %v3810_v22, %v3849_v9  ;;  %v1844_v15 = vadd.f32 %v3949_v10, %v1843_v2  ;;  %v1873_v30 = vmul.f32 %v4001_v14, %v1872_v60 }
 0x1c3   : > { %v1881_v2 = vand.u32 2147483648, %v3914_v45  ;;  %vm1876_vm1 = vweird.f32 %v4001_v14  ;;  %vm1906_vm5 = vweird.f32 %v4068_v23 }
 0x1c4   : > { %v1473_v21 = vadd.f32 %v3966_v16, %v1435_v26  ;;  %v4107_v26 = vadd.f32 %v3810_v22, %v3937_v38  ;;  %v1107_v43 = vpop.f32.mrf.mxu0  ;;  %v1848_v33 = vsel %vm4123_vm15, %v3949_v10, %v1844_v15  ;;  %vm4159_vm4 = vmor %vm1875_vm0, %vm1876_vm1 }
 0x1c5   : > { %v4150_v15 = vsel %vm4090_vm13, %v1852_v37, %v1848_v33  ;;  %vm4213_vm9 = vmor %vm1905_vm3, %vm1906_vm5 }
 0x1c6   : > { %v3057_v57 = vpop.eup %3056  ;;  %v2847_v13 = vmul.f32 -1.442695, %v1473_v21  ;;  %4834 = vst [vmem:[#allocation8_spill] sm:$0xff] %v4107_v26  ;;  %v2134_v21 = vadd.f32 %v4079_v51, %v3979_v29  ;;  %v1456_v29 = vadd.f32 %v1324_v28, %v3781_v54  ;;  %v1882_v26 = vor.u32 1.1754944e-38, %v1881_v2 }
 0x1c7   : > { %v3059_v32 = vpop.eup %3058  ;;  %v4099_v31 = vadd.f32 1.0, %v3057_v57  ;;  %v4117_v57 = vsel %vm4064_vm10, %v1822_v7, %v1818_v24  ;;  %v1874_v7 = vadd.f32 %v4001_v14, %v1873_v30  ;;  %v1902_v24 = vsub.f32 1.0, %v1901_v55 }
 0x1c8   : > { %3060 = vpow2.f32 %v2847_v13  ;;  %v4128_v1 = vadd.f32 1.0, %v3059_v32  ;;  %v1911_v54 = vand.u32 2147483648, %v3986_v6  ;;  %v2150_v10 = vmul.f32 %v2134_v21, %v3918_v63 }
 0x1c9   : > { %3062 = vrcp.f32 %v4099_v31  ;;  %v1348_v60 = vpop.f32.mrf.mxu2  ;;  %v4113_v62 = vpop.f32.mrf.mxu3  ;;  %v1494_v30 = vadd.f32 %v3741_v3, %v1456_v29  ;;  %v1909_v63 = vand.u32 2147483647, %v3986_v6  ;;  %v1878_v55 = vsel %vm4159_vm4, %v4001_v14, %v1874_v7 }
 0x1ca   : > { %v1437_v13 = vadd.f32 %v1348_v60, %v3703_v44  ;;  %3064 = vpow2.f32 %v2866_v34  ;;  %v4145_v44 = vadd.f32 %v3810_v22, %v4017_v48  ;;  %v1903_v34 = vmul.f32 %v4068_v23, %v1902_v24 }
 0x1cb   : > { %3066 = vrcp.f32 %v4128_v1  ;;  %v1941_v2 = vand.u32 2147483648, %v4128_v1  ;;  %v4172_v21 = vadd.f32 %v3810_v22, %v1107_v43  ;;  %v4175_v60 = vor.u32 1.1754944e-38, %v1911_v54 }
 0x1cc   : > { %v1475_v32 = vadd.f32 %v3966_v16, %v1437_v13  ;;  %v2166_v38 = vadd.f32 %v2150_v10, %v3825_v42  ;;  %v2135_v29 = vadd.f32 %v4079_v51, %v4048_v27  ;;  %v2868_v43 = vmul.f32 -1.442695, %v1494_v30  ;;  %v1109_v7 = vpop.f32.mrf.mxu0 }
 0x1cd   : > { %v4187_v54 = vsel %vm4137_vm2, %v1882_v26, %v1878_v55  ;;  %v1656_v42 = vand.u32 2147483648, %v4099_v31  ;;  %v1904_v10 = vadd.f32 %v4068_v23, %v1903_v34  ;;  %v1939_v27 = vand.u32 2147483647, %v4128_v1 }
 0x1ce   : > { %v3061_v28 = vpop.eup %3060  ;;  %v2849_v25 = vmul.f32 -1.442695, %v1475_v32  ;;  %v1654_v30 = vand.u32 2147483647, %v4099_v31  ;;  %vm4198_vm7 = vcmp.eq.f32.partialorder %v1909_v63, 8.507059e+37  ;;  %v4205_v55 = vadd.f32 %v3810_v22, %v1109_v7  ;;  %v1326_v22 = vpop.f32.mrf.mxu1 }
 0x1cf   : > { %v3063_v9 = vpop.eup %3062  ;;  %v4164_v37 = vadd.f32 1.0, %v3061_v28  ;;  %v4192_v28 = vor.u32 1.1754944e-38, %v1941_v2  ;;  %v2151_v34 = vmul.f32 %v2135_v29, %v3941_v46  ;;  %vm1650_vm8 = vweird.f32 %v4099_v31 }
 0x1d0   : > { %v1646_v45 = vmul.f32 %v3063_v9, %v4099_v31  ;;  %3068 = vpow2.f32 %v2849_v25  ;;  %v3065_v33 = vpop.eup %3064  ;;  %vm1651_vm6 = vweird.f32 %v3063_v9  ;;  %v1908_v31 = vsel %vm4213_vm9, %v4068_v23, %v1904_v10 }
 0x1d1   : > { %3070 = vrcp.f32 %v4164_v37  ;;  %v1350_v14 = vpop.f32.mrf.mxu2  ;;  %v4181_v13 = vpop.f32.mrf.mxu3  ;;  %v4202_v26 = vadd.f32 1.0, %v3065_v33  ;;  %vm1652_vm10 = vmor %vm1650_vm8, %vm1651_vm6  ;;  %vm1655_vm11 = vcmp.eq.f32.partialorder %v1654_v30, 8.507059e+37  ;;  %v1458_v23 = vadd.f32 %v1326_v22, %v3803_v17  ;;  %v3176_v17 = vld [vmem:[%s3563_s20] sm:$0xff] }
 0x1d2   : > { %v1647_v24 = vsub.f32 1.0, %v1646_v45  ;;  %v1439_v32 = vadd.f32 %v1350_v14, %v3707_v47  ;;  %v4194_v25 = vpop.eup %3066  ;;  %3072 = vtanh.f32 %v2166_v38  ;;  %v1657_v38 = vor.u32 1.1754944e-38, %v1656_v42  ;;  %v2310_v22 = vld [vmem:[%s4238_s29] sm:$0xff] }
 0x1d3   : > { %3074 = vpow2.f32 %v2868_v43  ;;  %v1931_v29 = vmul.f32 %v4194_v25, %v4128_v1  ;;  %v1686_v30 = vand.u32 2147483648, %v4164_v37  ;;  %vm1680_vm13 = vweird.f32 %v4164_v37 }
 0x1d4   : > { %v1648_v48 = vmul.f32 %v3063_v9, %v1647_v24  ;;  %v1477_v47 = vadd.f32 %v3966_v16, %v1439_v32  ;;  %v2167_v24 = vadd.f32 %v2151_v34, %v3843_v4  ;;  %v2136_v32 = vadd.f32 %v4079_v51, %v4113_v62 }
 0x1d5   : > { %v1684_v62 = vand.u32 2147483647, %v4164_v37  ;;  %v1932_v34 = vsub.f32 1.0, %v1931_v29  ;;  %v4258_v29 = vsel %vm4198_vm7, %v4175_v60, %v1908_v31  ;;  %vm1936_vm0 = vweird.f32 %v4194_v25 }
 0x1d6   : > { %v3069_v2 = vpop.eup %3068  ;;  %v1649_v45 = vadd.f32 %v3063_v9, %v1648_v48  ;;  %v2851_v14 = vmul.f32 -1.442695, %v1477_v47  ;;  %vm1935_vm2 = vweird.f32 %v4128_v1  ;;  %vm4329_vm6 = vcmp.eq.f32.partialorder %v1939_v27, 8.507059e+37 }
 0x1d7   : > { %v3071_v33 = vpop.eup %3070  ;;  %v4218_v46 = vadd.f32 1.0, %v3069_v2  ;;  %v1933_v31 = vmul.f32 %v4194_v25, %v1932_v34  ;;  %vm1685_vm15 = vcmp.eq.f32.partialorder %v1684_v62, 8.507059e+37  ;;  %vm4348_vm8 = vmor %vm1935_vm2, %vm1936_vm0 }
 0x1d8   : > { %v1653_v6 = vsel %vm1652_vm10, %v3063_v9, %v1649_v45  ;;  %v1676_v43 = vmul.f32 %v3071_v33, %v4164_v37  ;;  %3076 = vpow2.f32 %v2851_v14  ;;  %v3073_v10 = vpop.eup %3072  ;;  %vm1681_vm12 = vweird.f32 %v3071_v33 }
 0x1d9   : > { %v1658_v7 = vsel %vm1655_vm11, %v1657_v38, %v1653_v6  ;;  %3078 = vrcp.f32 %v4218_v46  ;;  %v1353_v42 = vpop.f32.mrf.mxu2  ;;  %v4230_v48 = vpop.f32.mrf.mxu3  ;;  %v2152_v38 = vmul.f32 %v2136_v32, %v3970_v59  ;;  %vm1682_vm14 = vmor %vm1680_vm13, %vm1681_vm12  ;;  %v1687_v59 = vor.u32 1.1754944e-38, %v1686_v30 }
 0x1da   : > { %3080 = vrcp.f32 %v4202_v26  ;;  %v2198_v4 = vsub.f32 1.0, %v1658_v7  ;;  %v1677_v9 = vsub.f32 1.0, %v1676_v43  ;;  %v1441_v47 = vadd.f32 %v1353_v42, %v3711_v49  ;;  %v4243_v2 = vpop.eup %3074 }
 0x1db   : > { %v2230_v14 = vmul.f32 %v3176_v17, %v1658_v7  ;;  %3082 = vtanh.f32 %v2167_v24  ;;  %v1496_v43 = vadd.f32 %v3741_v3, %v1458_v23  ;;  %v2137_v30 = vadd.f32 %v4079_v51, %v4181_v13 }
 0x1dc   : > { %v2214_v45 = vmul.f32 %v3073_v10, %v2198_v4  ;;  %v1678_v63 = vmul.f32 %v3071_v33, %v1677_v9  ;;  %v1479_v49 = vadd.f32 %v3966_v16, %v1441_v47  ;;  %v2168_v10 = vadd.f32 %v2152_v38, %v3847_v40  ;;  %v3177_v38 = vld [vmem:[%s3563_s20 + $0x8] sm:$0xff] }
 0x1dd   : > { %v1971_v17 = vand.u32 2147483648, %v4202_v26  ;;  %vm1710_vm3 = vweird.f32 %v4218_v46  ;;  %v4340_v27 = vadd.f32 1.0, %v4243_v2  ;;  %vm1965_vm13 = vweird.f32 %v4202_v26 }
 0x1de   : > { %v3077_v6 = vpop.eup %3076  ;;  %v4261_v7 = vadd.f32 %v2230_v14, %v2214_v45  ;;  %v1679_v42 = vadd.f32 %v3071_v33, %v1678_v63  ;;  %v2853_v60 = vmul.f32 -1.442695, %v1479_v49  ;;  %v2870_v45 = vmul.f32 -1.442695, %v1496_v43  ;;  %v2311_v43 = vld [vmem:[%s4238_s29 + $0x8] sm:$0xff] }
 0x1df   : > { %v4264_v4 = vpop.eup %3078  ;;  %v4272_v50 = vadd.f32 1.0, %v3077_v6  ;;  %v1716_v14 = vand.u32 2147483648, %v4218_v46  ;;  %v1714_v63 = vand.u32 2147483647, %v4218_v46 }
 0x1e0   : > { %v4275_v24 = vpop.eup %3080  ;;  %2262 = vst [vmem:[%s4250_s15] sm:$0xff] %v4261_v7  ;;  %v2326_v37 = vmax.f32 %v2310_v22, %v4261_v7  ;;  %v1683_v32 = vsel %vm1682_vm14, %v3071_v33, %v1679_v42  ;;  %v1706_v23 = vmul.f32 %v4264_v4, %v4218_v46  ;;  %vm1711_vm1 = vweird.f32 %v4264_v4 }
 0x1e1   : > { %v1688_v9 = vsel %vm1685_vm15, %v1687_v59, %v1683_v32  ;;  %3084 = vrcp.f32 %v4272_v50  ;;  %v1355_v47 = vpop.f32.mrf.mxu2  ;;  %v4286_v34 = vpop.f32.mrf.mxu3  ;;  %v2153_v42 = vmul.f32 %v2137_v30, %v4006_v39  ;;  %vm1712_vm4 = vmor %vm1710_vm3, %vm1711_vm1  ;;  %v1717_v39 = vor.u32 1.1754944e-38, %v1716_v14 }
 0x1e2   : > { %2342 = vst [vmem:[%s4270_s19] sm:$0xff] %v2326_v37  ;;  %v2199_v33 = vsub.f32 1.0, %v1688_v9  ;;  %v1707_v62 = vsub.f32 1.0, %v1706_v23  ;;  %v3083_v40 = vpop.eup %3082  ;;  %3086 = vpow2.f32 %v2853_v60  ;;  %v1443_v13 = vadd.f32 %v1355_v47, %v3715_v52  ;;  %v1329_v52 = vpop.f32.mrf.mxu1 }
 0x1e3   : > { %v2231_v49 = vmul.f32 %v3177_v38, %v1688_v9  ;;  %3088 = vtanh.f32 %v2168_v10  ;;  %v4303_v60 = vadd.f32 %v4194_v25, %v1933_v31  ;;  %vm1715_vm5 = vcmp.eq.f32.partialorder %v1714_v63, 8.507059e+37 }
 0x1e4   : > { %v2215_v22 = vmul.f32 %v3083_v40, %v2199_v33  ;;  %v1708_v6 = vmul.f32 %v4264_v4, %v1707_v62  ;;  %v1481_v59 = vadd.f32 %v3966_v16, %v1443_v13  ;;  %3090 = vpow2.f32 %v2870_v45 }
 0x1e5   : > { %v1961_v31 = vmul.f32 %v4275_v24, %v4202_v26  ;;  %v1460_v33 = vadd.f32 %v1329_v52, %v3835_v11  ;;  %v2169_v40 = vadd.f32 %v2153_v42, %v3873_v35  ;;  %v1746_v38 = vand.u32 2147483648, %v4272_v50 }
 0x1e6   : > { %v2247_v37 = vadd.f32 %v2231_v49, %v2215_v22  ;;  %v1709_v32 = vadd.f32 %v4264_v4, %v1708_v6  ;;  %v2855_v9 = vmul.f32 -1.442695, %v1481_v59  ;;  %v1744_v49 = vand.u32 2147483647, %v4272_v50  ;;  %v3178_v59 = vld [vmem:[%s3563_s20 + $0x10] sm:$0xff] }
 0x1e7   : > { %v3085_v23 = vpop.eup %3084  ;;  %vm1740_vm9 = vweird.f32 %v4272_v50  ;;  %v1747_v1 = vor.u32 1.1754944e-38, %v1746_v38  ;;  %vm1966_vm12 = vweird.f32 %v4275_v24 }
 0x1e8   : > { %2263 = vst [vmem:[%s4250_s15 + $0x8] sm:$0xff] %v2247_v37  ;;  %v2962_v10 = vpack.c.bf16 %v2247_v37, %v4261_v7  ;;  %v2327_v46 = vmax.f32 %v2311_v43, %v2247_v37  ;;  %v1713_v30 = vsel %vm1712_vm4, %v4264_v4, %v1709_v32  ;;  %v1736_v47 = vmul.f32 %v3085_v23, %v4272_v50  ;;  %v3087_v45 = vpop.eup %3086  ;;  %v2312_v37 = vld [vmem:[%s4238_s29 + $0x10] sm:$0xff] }
 0x1e9   : > { %v1718_v62 = vsel %vm1715_vm5, %v1717_v39, %v1713_v30  ;;  %3092 = vpow2.f32 %v2855_v9  ;;  %v1358_v14 = vpop.f32.mrf.mxu2  ;;  %v4320_v63 = vpop.f32.mrf.mxu3  ;;  %v4323_v22 = vadd.f32 1.0, %v3087_v45  ;;  %v2138_v4 = vadd.f32 %v4079_v51, %v4230_v48  ;;  %vm4435_vm5 = vmor %vm1965_vm13, %vm1966_vm12 }
 0x1ea   : > { %2963 = vst [vmem:[%s4310_s22] sm:$0xff] %v2962_v10   ;;  %v2200_v13 = vsub.f32 1.0, %v1718_v62  ;;  %v1737_v7 = vsub.f32 1.0, %v1736_v47  ;;  %v3089_v35 = vpop.eup %3088  ;;  %vm1741_vm7 = vweird.f32 %v3085_v23  ;;  %v1445_v6 = vadd.f32 %v1358_v14, %v3721_v58 }
 0x1eb   : > { %2343 = vst [vmem:[%s4270_s19 + $0x8] sm:$0xff] %v2327_v46  ;;  %v3091_v43 = vpop.eup %3090  ;;  %v2232_v52 = vmul.f32 %v3178_v59, %v1718_v62  ;;  %3094 = vrcp.f32 %v4323_v22  ;;  %v1962_v39 = vsub.f32 1.0, %v1961_v31  ;;  %v1938_v10 = vsel %vm4348_vm8, %v4194_v25, %v4303_v60  ;;  %vm1742_vm10 = vmor %vm1740_vm9, %vm1741_vm7 }
 0x1ec   : > { %v2216_v42 = vmul.f32 %v3089_v35, %v2200_v13  ;;  %v1738_v48 = vmul.f32 %v3085_v23, %v1737_v7  ;;  %3096 = vtanh.f32 %v2169_v40  ;;  %v1483_v32 = vadd.f32 %v3966_v16, %v1445_v6  ;;  %v3179_v6 = vld [vmem:[%s3563_s20 + $0x18] sm:$0xff] }
 0x1ed   : > { %v1498_v30 = vadd.f32 %v3741_v3, %v1460_v33  ;;  %v2154_v47 = vmul.f32 %v2138_v4, %v4061_v5  ;;  %vm1745_vm11 = vcmp.eq.f32.partialorder %v1744_v49, 8.507059e+37  ;;  %v2139_v25 = vadd.f32 %v4079_v51, %v4286_v34 }
 0x1ee   : > { %v4352_v9 = vadd.f32 %v2232_v52, %v2216_v42  ;;  %v1739_v2 = vadd.f32 %v3085_v23, %v1738_v48  ;;  %v2857_v31 = vmul.f32 -1.442695, %v1483_v32  ;;  %v1963_v5 = vmul.f32 %v4275_v24, %v1962_v39  ;;  %v2313_v48 = vld [vmem:[%s4238_s29 + $0x18] sm:$0xff] }
 0x1ef   : > { %v3093_v46 = vpop.eup %3092  ;;  %v4377_v7 = vor.u32 1.1754944e-38, %v1971_v17  ;;  %v2170_v35 = vadd.f32 %v2154_v47, %v3912_v53  ;;  %v4385_v38 = vsel %vm4329_vm6, %v4192_v28, %v1938_v10  ;;  %v1999_v17 = vand.u32 2147483647, %v4340_v27 }
 0x1f0   : > { %2264 = vst [vmem:[%s4250_s15 + $0x10] sm:$0xff] %v4352_v9  ;;  %v2328_v50 = vmax.f32 %v2312_v37, %v4352_v9  ;;  %v1743_v45 = vsel %vm1742_vm10, %v3085_v23, %v1739_v2  ;;  %v4365_v62 = vadd.f32 1.0, %v3093_v46  ;;  %3098 = vpow2.f32 %v2857_v31 }
 0x1f1   : > { %v1748_v40 = vsel %vm1745_vm11, %v1747_v1, %v1743_v45  ;;  %v1360_v60 = vpop.f32.mrf.mxu2  ;;  %v4369_v33 = vpop.f32.mrf.mxu3  ;;  %v1969_v23 = vand.u32 2147483647, %v4202_v26  ;;  %v2872_v52 = vmul.f32 -1.442695, %v1498_v30  ;;  %v2155_v53 = vmul.f32 %v2139_v25, %v4083_v56 }
 0x1f2   : > { %v3095_v14 = vpop.eup %3094  ;;  %2344 = vst [vmem:[%s4270_s19 + $0x10] sm:$0xff] %v2328_v50  ;;  %v2201_v13 = vsub.f32 1.0, %v1748_v40  ;;  %3100 = vrcp.f32 %v4365_v62  ;;  %v2233_v42 = vmul.f32 %v3179_v6, %v1748_v40  ;;  %v1447_v59 = vadd.f32 %v1360_v60, %v3725_v61 }
 0x1f3   : > { %v3097_v34 = vpop.eup %3096  ;;  %3102 = vrcp.f32 %v4340_v27  ;;  %v1766_v4 = vmul.f32 %v3095_v14, %v4323_v22  ;;  %v4394_v32 = vadd.f32 %v4275_v24, %v1963_v5  ;;  %v1776_v11 = vand.u32 2147483648, %v4323_v22 }
 0x1f4   : > { %v2217_v49 = vmul.f32 %v3097_v34, %v2201_v13  ;;  %v1774_v58 = vand.u32 2147483647, %v4323_v22  ;;  %v1485_v61 = vadd.f32 %v3966_v16, %v1447_v59  ;;  %v4400_v2 = vadd.f32 1.0, %v3091_v43 }
 0x1f5   : > { %v1767_v37 = vsub.f32 1.0, %v1766_v4  ;;  %vm1771_vm14 = vweird.f32 %v3095_v14  ;;  %3104 = vtanh.f32 %v2170_v35  ;;  %vm1770_vm15 = vweird.f32 %v4323_v22 }
 0x1f6   : > { %v2249_v28 = vadd.f32 %v2233_v42, %v2217_v49  ;;  %v3099_v39 = vpop.eup %3098  ;;  %v2859_v47 = vmul.f32 -1.442695, %v1485_v61  ;;  %v2171_v45 = vadd.f32 %v2155_v53, %v3935_v20  ;;  %vm1772_vm0 = vmor %vm1770_vm15, %vm1771_vm14  ;;  %vm1775_vm1 = vcmp.eq.f32.partialorder %v1774_v58, 8.507059e+37 }
 0x1f7   : > { %v1768_v10 = vmul.f32 %v3095_v14, %v1767_v37  ;;  %v4404_v1 = vadd.f32 1.0, %v3099_v39  ;;  %v2140_v60 = vadd.f32 %v4079_v51, %v4320_v63  ;;  %v1806_v34 = vand.u32 2147483648, %v4365_v62 }
 0x1f8   : > { %v3101_v56 = vpop.eup %3100  ;;  %2265 = vst [vmem:[%s4250_s15 + $0x18] sm:$0xff] %v2249_v28  ;;  %v2967_v46 = vpack.c.bf16 %v2249_v28, %v4352_v9  ;;  %v2329_v30 = vmax.f32 %v2313_v48, %v2249_v28  ;;  %v1777_v9 = vor.u32 1.1754944e-38, %v1776_v11  ;;  %v1804_v4 = vand.u32 2147483647, %v4365_v62 }
 0x1f9   : > { %v4406_v31 = vpop.eup %3102  ;;  %v1769_v50 = vadd.f32 %v3095_v14, %v1768_v10  ;;  %v1796_v43 = vmul.f32 %v3101_v56, %v4365_v62  ;;  %v1363_v40 = vpop.f32.mrf.mxu2  ;;  %3106 = vrcp.f32 %v4404_v1  ;;  %vm1801_vm2 = vweird.f32 %v3101_v56 }
 0x1fa   : > { %v4411_v25 = vpop.f32.mrf.mxu3  ;;  %2999 = vst [vmem:[%s4310_s22 + $0x8] sm:$0xff] %v2967_v46   ;;  %3108 = vpow2.f32 %v2859_v47  ;;  %v1449_v13 = vadd.f32 %v1363_v40, %v3733_v0  ;;  %vm4423_vm3 = vcmp.eq.f32.partialorder %v1969_v23, 8.507059e+37  ;;  %vm1800_vm4 = vweird.f32 %v4365_v62  ;;  %v2314_v62 = vld [vmem:[%s4238_s29 + $0x20] sm:$0xff] }
 0x1fb   : > { %2345 = vst [vmem:[%s4270_s19 + $0x18] sm:$0xff] %v2329_v30  ;;  %v1773_v22 = vsel %vm1772_vm0, %v3095_v14, %v1769_v50  ;;  %v1797_v5 = vsub.f32 1.0, %v1796_v43  ;;  %3110 = vpow2.f32 %v2872_v52  ;;  %v3105_v35 = vpop.eup %3104  ;;  %v2156_v0 = vmul.f32 %v2140_v60, %v4117_v57  ;;  %v3180_v52 = vld [vmem:[%s3563_s20 + $0x20] sm:$0xff]  ;;  %vm1802_vm6 = vmor %vm1800_vm4, %vm1801_vm2 }
 0x1fc   : > { %v1778_v20 = vsel %vm1775_vm1, %v1777_v9, %v1773_v22  ;;  %v1487_v63 = vadd.f32 %v3966_v16, %v1449_v13  ;;  %3112 = vtanh.f32 %v2171_v45  ;;  %v2001_v42 = vand.u32 2147483648, %v4340_v27  ;;  %v3181_v13 = vld [vmem:[%s3563_s20 + $0x28] sm:$0xff] }
 0x1fd   : > { %v2202_v49 = vsub.f32 1.0, %v1778_v20  ;;  %v1798_v6 = vmul.f32 %v3101_v56, %v1797_v5  ;;  %v2234_v48 = vmul.f32 %v3180_v52, %v1778_v20  ;;  %3114 = vrcp.f32 %v4400_v2 }
 0x1fe   : > { %v2861_v53 = vmul.f32 -1.442695, %v1487_v63  ;;  %v1807_v57 = vor.u32 1.1754944e-38, %v1806_v34  ;;  %v1968_v11 = vsel %vm4435_vm5, %v4275_v24, %v4394_v32  ;;  %v4448_v26 = vmul.f32 %v4406_v31, %v4340_v27  ;;  %v1331_v24 = vpop.f32.mrf.mxu1 }
 0x1ff   : > { %v2218_v59 = vmul.f32 %v3105_v35, %v2202_v49  ;;  %v1799_v37 = vadd.f32 %v3101_v56, %v1798_v6  ;;  %v3107_v28 = vpop.eup %3106  ;;  %vm1805_vm7 = vcmp.eq.f32.partialorder %v1804_v4, 8.507059e+37  ;;  %v2172_v50 = vadd.f32 %v2156_v0, %v3958_v18  ;;  %v2315_v49 = vld [vmem:[%s4238_s29 + $0x28] sm:$0xff] }
 0x200   : > { %v3109_v58 = vpop.eup %3108  ;;  %v1826_v10 = vmul.f32 %v3107_v28, %v4404_v1  ;;  %3116 = vpow2.f32 %v2861_v53  ;;  %vm1831_vm8 = vweird.f32 %v3107_v28  ;;  %v1836_v22 = vand.u32 2147483648, %v4404_v1 }
 0x201   : > { %v2250_v61 = vadd.f32 %v2234_v48, %v2218_v59  ;;  %v1803_v39 = vsel %vm1802_vm6, %v3101_v56, %v1799_v37  ;;  %v1365_v46 = vpop.f32.mrf.mxu2  ;;  %v4451_v30 = vpop.eup %3110  ;;  %v4454_v43 = vadd.f32 1.0, %v3109_v58  ;;  %v2141_v56 = vadd.f32 %v4079_v51, %v4369_v33 }
 0x202   : > { %v1808_v47 = vsel %vm1805_vm7, %v1807_v57, %v1803_v39  ;;  %v1827_v40 = vsub.f32 1.0, %v1826_v10  ;;  %v4459_v9 = vpop.f32.mrf.mxu3  ;;  %v3113_v60 = vpop.eup %3112  ;;  %v1834_v18 = vand.u32 2147483647, %v4404_v1  ;;  %v1451_v4 = vadd.f32 %v1365_v46, %v3746_v8  ;;  %v3182_v10 = vld [vmem:[%s3563_s20 + $0x30] sm:$0xff] }
 0x203   : > { %2266 = vst [vmem:[%s4250_s15 + $0x20] sm:$0xff] %v2250_v61  ;;  %v2330_v32 = vmax.f32 %v2314_v62, %v2250_v61  ;;  %v2203_v45 = vsub.f32 1.0, %v1808_v47  ;;  %3118 = vrcp.f32 %v4454_v43  ;;  %v2235_v20 = vmul.f32 %v3181_v13, %v1808_v47  ;;  %v4467_v35 = vpop.eup %3114 }
 0x204   : > { %v1828_v34 = vmul.f32 %v3107_v28, %v1827_v40  ;;  %v1462_v33 = vadd.f32 %v1331_v24, %v3900_v12  ;;  %3120 = vtanh.f32 %v2172_v50  ;;  %v4474_v6 = vsel %vm4423_vm3, %v4377_v7, %v1968_v11 }
 0x205   : > { %2346 = vst [vmem:[%s4270_s19 + $0x20] sm:$0xff] %v2330_v32  ;;  %v2219_v5 = vmul.f32 %v3113_v60, %v2203_v45  ;;  %v4476_v63 = vor.u32 1.1754944e-38, %v2001_v42  ;;  %vm1830_vm9 = vweird.f32 %v4404_v1  ;;  %v1489_v8 = vadd.f32 %v3966_v16, %v1451_v4  ;;  %v2316_v45 = vld [vmem:[%s4238_s29 + $0x30] sm:$0xff] }
 0x206   : > { %v1829_v59 = vadd.f32 %v3107_v28, %v1828_v34  ;;  %v3117_v52 = vpop.eup %3116  ;;  %vm1832_vm10 = vmor %vm1830_vm9, %vm1831_vm8  ;;  %v1837_v48 = vor.u32 1.1754944e-38, %v1836_v22  ;;  %vm1835_vm11 = vcmp.eq.f32.partialorder %v1834_v18, 8.507059e+37  ;;  %v2157_v12 = vmul.f32 %v2141_v56, %v4150_v15 }
 0x207   : > { %v2251_v0 = vadd.f32 %v2235_v20, %v2219_v5  ;;  %v1992_v14 = vsub.f32 1.0, %v4448_v26  ;;  %v4484_v1 = vadd.f32 1.0, %v3117_v52  ;;  %v2863_v57 = vmul.f32 -1.442695, %v1489_v8 }
 0x208   : > { %v1833_v37 = vsel %vm1832_vm10, %v3107_v28, %v1829_v59  ;;  %v2031_v58 = vand.u32 2147483648, %v4400_v2  ;;  %v1500_v15 = vadd.f32 %v3741_v3, %v1462_v33  ;;  %v2029_v39 = vand.u32 2147483647, %v4400_v2  ;;  %v4853_v59 = vld [vmem:[#allocation2_spill] sm:$0xff] }
 0x209   : > { %2267 = vst [vmem:[%s4250_s15 + $0x28] sm:$0xff] %v2251_v0  ;;  %v2972_v7 = vpack.c.bf16 %v2251_v0, %v2250_v61  ;;  %v2331_v42 = vmax.f32 %v2315_v49, %v2251_v0  ;;  %v1368_v53 = vpop.f32.mrf.mxu2  ;;  %v3119_v23 = vpop.eup %3118  ;;  %v1838_v62 = vsel %vm1835_vm11, %v1837_v48, %v1833_v37  ;;  %v2173_v47 = vadd.f32 %v2157_v12, %v3997_v36 }
 0x20a   : > { %v1453_v11 = vadd.f32 %v1368_v53, %v3756_v19  ;;  %v2204_v26 = vsub.f32 1.0, %v1838_v62  ;;  %v1856_v61 = vmul.f32 %v3119_v23, %v4454_v43  ;;  %v3121_v28 = vpop.eup %3120  ;;  %v2236_v46 = vmul.f32 %v3182_v10, %v1838_v62  ;;  %v4500_v32 = vpop.f32.mrf.mxu3 }
 0x20b   : > { %3000 = vst [vmem:[%s4310_s22 + $0x10] sm:$0xff] %v2972_v7   ;;  %3122 = vrcp.f32 %v4484_v1  ;;  %v2142_v19 = vadd.f32 %v4079_v51, %v4411_v25  ;;  %vm1996_vm12 = vweird.f32 %v4406_v31  ;;  %v1866_v40 = vand.u32 2147483648, %v4454_v43  ;;  %v4856_v7 = vld [vmem:[#allocation7_spill] sm:$0xff] }
 0x20c   : > { %2347 = vst [vmem:[%s4270_s19 + $0x28] sm:$0xff] %v2331_v42  ;;  %v2220_v3 = vmul.f32 %v3121_v28, %v2204_v26  ;;  %v1857_v50 = vsub.f32 1.0, %v1856_v61  ;;  %3124 = vpow2.f32 %v2863_v57  ;;  %v1491_v24 = vadd.f32 %v3966_v16, %v1453_v11  ;;  %v3183_v61 = vld [vmem:[%s3563_s20 + $0x38] sm:$0xff] }
 0x20d   : > { %v1864_v36 = vand.u32 2147483647, %v4454_v43  ;;  %v1993_v56 = vmul.f32 %v4406_v31, %v1992_v14  ;;  %vm1995_vm13 = vweird.f32 %v4340_v27  ;;  %v4507_v25 = vor.u32 1.1754944e-38, %v2031_v58 }
 0x20e   : > { %v4509_v60 = vadd.f32 %v2236_v46, %v2220_v3  ;;  %v1858_v22 = vmul.f32 %v3119_v23, %v1857_v50  ;;  %vm1861_vm14 = vweird.f32 %v3119_v23  ;;  %v2865_v18 = vmul.f32 -1.442695, %v1491_v24  ;;  %vm4546_vm4 = vmor %vm1995_vm13, %vm1996_vm12 }
 0x20f   : > { %v2874_v5 = vmul.f32 -1.442695, %v1500_v15  ;;  %vm1860_vm15 = vweird.f32 %v4454_v43  ;;  %3126 = vtanh.f32 %v2173_v47  ;;  %v2158_v13 = vmul.f32 %v2142_v19, %v4187_v54  ;;  %v2317_v19 = vld [vmem:[%s4238_s29 + $0x38] sm:$0xff] }
 0x210   : > { %2268 = vst [vmem:[%s4250_s15 + $0x30] sm:$0xff] %v4509_v60  ;;  %v2332_v20 = vmax.f32 %v2316_v45, %v4509_v60  ;;  %v1859_v34 = vadd.f32 %v3119_v23, %v1858_v22  ;;  %v2143_v4 = vadd.f32 %v4079_v51, %v4459_v9  ;;  %3128 = vpow2.f32 %v2865_v18  ;;  %vm1862_vm0 = vmor %vm1860_vm15, %vm1861_vm14 }
 0x211   : > { %v1370_v33 = vpop.f32.mrf.mxu2  ;;  %v3123_v49 = vpop.eup %3122  ;;  %v4519_v0 = vadd.f32 1.0, %v4451_v30  ;;  %v1867_v43 = vor.u32 1.1754944e-38, %v1866_v40  ;;  %v1994_v54 = vadd.f32 %v4406_v31, %v1993_v56  ;;  %vm1865_vm1 = vcmp.eq.f32.partialorder %v1864_v36, 8.507059e+37 }
 0x212   : > { %v1455_v8 = vadd.f32 %v1370_v33, %v4853_v59  ;;  %v3125_v52 = vpop.eup %3124  ;;  %2348 = vst [vmem:[%s4270_s19 + $0x30] sm:$0xff] %v2332_v20  ;;  %v1863_v48 = vsel %vm1862_vm0, %v3119_v23, %v1859_v34  ;;  %v1886_v12 = vmul.f32 %v3123_v49, %v4484_v1  ;;  %vm4527_vm2 = vcmp.eq.f32.partialorder %v1999_v17, 8.507059e+37  ;;  %v1419_v47 = vpop.f32.mrf.mxu3  ;;  %v4859_v34 = vld [vmem:[#allocation3_spill] sm:$0xff] }
 0x213   : > { %v2021_v30 = vmul.f32 %v4467_v35, %v4400_v2  ;;  %v1868_v14 = vsel %vm1865_vm1, %v1867_v43, %v1863_v48  ;;  %v2174_v42 = vadd.f32 %v2158_v13, %v4856_v7  ;;  %v4534_v37 = vadd.f32 1.0, %v3125_v52 }
 0x214   : > { %v1493_v53 = vadd.f32 %v3966_v16, %v1455_v8  ;;  %3130 = vpow2.f32 %v2874_v5  ;;  %v2205_v23 = vsub.f32 1.0, %v1868_v14  ;;  %v1887_v62 = vsub.f32 1.0, %v1886_v12  ;;  %v3184_v12 = vld [vmem:[%s3563_s20 + $0x40] sm:$0xff] }
 0x215   : > { %v2159_v17 = vmul.f32 %v2143_v4, %v4258_v29  ;;  %v3127_v57 = vpop.eup %3126  ;;  %vm1891_vm3 = vweird.f32 %v3123_v49  ;;  %v1896_v11 = vand.u32 2147483648, %v4484_v1  ;;  %v1894_v58 = vand.u32 2147483647, %v4484_v1 }
 0x216   : > { %3132 = vrcp.f32 %v4534_v37  ;;  %v3129_v15 = vpop.eup %3128  ;;  %v2221_v26 = vmul.f32 %v3127_v57, %v2205_v23  ;;  %v2237_v28 = vmul.f32 %v3183_v61, %v1868_v14  ;;  %v1888_v10 = vmul.f32 %v3123_v49, %v1887_v62 }
 0x217   : > { %v2867_v46 = vmul.f32 -1.442695, %v1493_v53  ;;  %3134 = vtanh.f32 %v2174_v42  ;;  %v4551_v3 = vadd.f32 1.0, %v3129_v15  ;;  %v1998_v50 = vsel %vm4546_vm4, %v4406_v31, %v1994_v54  ;;  %v4860_v15 = vld [vmem:[#allocation8_spill] sm:$0xff] }
 0x218   : > { %v2022_v24 = vsub.f32 1.0, %v2021_v30  ;;  %v2253_v45 = vadd.f32 %v2237_v28, %v2221_v26  ;;  %vm1890_vm5 = vweird.f32 %v4484_v1  ;;  %v1889_v40 = vadd.f32 %v3123_v49, %v1888_v10  ;;  %v2318_v30 = vld [vmem:[%s4238_s29 + $0x40] sm:$0xff] }
 0x219   : > { %3136 = vpow2.f32 %v2867_v46  ;;  %v1373_v27 = vpop.f32.mrf.mxu2  ;;  %vm1892_vm6 = vmor %vm1890_vm5, %vm1891_vm3  ;;  %v1897_v36 = vor.u32 1.1754944e-38, %v1896_v11  ;;  %v2175_v56 = vadd.f32 %v2159_v17, %v4072_v41  ;;  %v2144_v22 = vadd.f32 %v4079_v51, %v4500_v32 }
 0x21a   : > { %3138 = vrcp.f32 %v4551_v3  ;;  %v3131_v18 = vpop.eup %3130  ;;  %2269 = vst [vmem:[%s4250_s15 + $0x38] sm:$0xff] %v2253_v45  ;;  %v2977_v31 = vpack.c.bf16 %v2253_v45, %v4509_v60  ;;  %v2333_v1 = vmax.f32 %v2317_v19, %v2253_v45  ;;  %v1893_v5 = vsel %vm1892_vm6, %v3123_v49, %v1889_v40  ;;  %v1422_v57 = vpop.f32.mrf.mxu3 }
 0x21b   : > { %vm1895_vm7 = vcmp.eq.f32.partialorder %v1894_v58, 8.507059e+37  ;;  %3140 = vrcp.f32 %v4519_v0  ;;  %v1457_v41 = vadd.f32 %v1373_v27, %v4859_v34  ;;  %v4569_v4 = vsel %vm4527_vm2, %v4476_v63, %v1998_v50  ;;  %v3185_v34 = vld [vmem:[%s3563_s20 + $0x48] sm:$0xff] }
 0x21c   : > { %v3133_v13 = vpop.eup %3132  ;;  %v1898_v20 = vsel %vm1895_vm7, %v1897_v36, %v1893_v5  ;;  %3001 = vst [vmem:[%s4310_s22 + $0x18] sm:$0xff] %v2977_v31   ;;  %v4574_v33 = vmul.f32 %v4467_v35, %v2022_v24  ;;  %v2059_v49 = vand.u32 2147483647, %v4519_v0  ;;  %v4577_v59 = vadd.f32 1.0, %v3131_v18 }
 0x21d   : > { %v2206_v32 = vsub.f32 1.0, %v1898_v20  ;;  %v1916_v60 = vmul.f32 %v3133_v13, %v4534_v37  ;;  %v3135_v43 = vpop.eup %3134  ;;  %2349 = vst [vmem:[%s4270_s19 + $0x38] sm:$0xff] %v2333_v1  ;;  %v2160_v8 = vmul.f32 %v2144_v22, %v4385_v38  ;;  %v2145_v54 = vadd.f32 %v4079_v51, %v1419_v47 }
 0x21e   : > { %v1495_v63 = vadd.f32 %v3966_v16, %v1457_v41  ;;  %v2238_v9 = vmul.f32 %v3184_v12, %v1898_v20  ;;  %3142 = vtanh.f32 %v2175_v56  ;;  %v1926_v42 = vand.u32 2147483648, %v4534_v37 }
 0x21f   : > { %v3137_v52 = vpop.eup %3136  ;;  %v2222_v48 = vmul.f32 %v3135_v43, %v2206_v32  ;;  %v1917_v14 = vsub.f32 1.0, %v1916_v60  ;;  %v1924_v53 = vand.u32 2147483647, %v4534_v37  ;;  %vm1921_vm8 = vweird.f32 %v3133_v13  ;;  %v2319_v43 = vld [vmem:[%s4238_s29 + $0x48] sm:$0xff] }
 0x220   : > { %v3139_v7 = vpop.eup %3138  ;;  %v4587_v23 = vadd.f32 1.0, %v3137_v52  ;;  %v2869_v38 = vmul.f32 -1.442695, %v1495_v63  ;;  %vm1920_vm9 = vweird.f32 %v4534_v37  ;;  %v2176_v26 = vadd.f32 %v2160_v8, %v4860_v15  ;;  %v4861_v37 = vld [vmem:[#allocation4_spill] sm:$0xff] }
 0x221   : > { %v4589_v62 = vadd.f32 %v2238_v9, %v2222_v48  ;;  %v1918_v51 = vmul.f32 %v3133_v13, %v1917_v14  ;;  %v1946_v17 = vmul.f32 %v3139_v7, %v4551_v3  ;;  %v1375_v11 = vpop.f32.mrf.mxu2  ;;  %v4592_v58 = vpop.eup %3140  ;;  %v2161_v61 = vmul.f32 %v2145_v54, %v4474_v6  ;;  %vm1922_vm10 = vmor %vm1920_vm9, %vm1921_vm8 }
 0x222   : > { %3144 = vrcp.f32 %v4587_v23  ;;  %v1927_v47 = vor.u32 1.1754944e-38, %v1926_v42  ;;  %v1956_v29 = vand.u32 2147483648, %v4551_v3  ;;  %v1954_v19 = vand.u32 2147483647, %v4551_v3 }
 0x223   : > { %2270 = vst [vmem:[%s4250_s15 + $0x40] sm:$0xff] %v4589_v62  ;;  %v2334_v28 = vmax.f32 %v2318_v30, %v4589_v62  ;;  %v1919_v10 = vadd.f32 %v3133_v13, %v1918_v51  ;;  %v1947_v46 = vsub.f32 1.0, %v1946_v17  ;;  %3146 = vpow2.f32 %v2869_v38  ;;  %v1424_v30 = vpop.f32.mrf.mxu3 }
 0x224   : > { %v1459_v50 = vadd.f32 %v1375_v11, %v4861_v37  ;;  %v3143_v24 = vpop.eup %3142  ;;  %vm1925_vm11 = vcmp.eq.f32.partialorder %v1924_v53, 8.507059e+37  ;;  %vm1951_vm12 = vweird.f32 %v3139_v7  ;;  %3148 = vtanh.f32 %v2176_v26  ;;  %v2320_v26 = vld [vmem:[%s4238_s29 + $0x50] sm:$0xff] }
 0x225   : > { %2350 = vst [vmem:[%s4270_s19 + $0x40] sm:$0xff] %v2334_v28  ;;  %v1923_v45 = vsel %vm1922_vm10, %v3133_v13, %v1919_v10  ;;  %v1948_v6 = vmul.f32 %v3139_v7, %v1947_v46  ;;  %v4608_v36 = vmul.f32 %v4592_v58, %v4519_v0  ;;  %3150 = vrcp.f32 %v4577_v59 }
 0x226   : > { %v1928_v40 = vsel %vm1925_vm11, %v1927_v47, %v1923_v45  ;;  %v1497_v27 = vadd.f32 %v3966_v16, %v1459_v50  ;;  %vm1950_vm13 = vweird.f32 %v4551_v3  ;;  %vm2026_vm14 = vweird.f32 %v4467_v35 }
 0x227   : > { %v2207_v56 = vsub.f32 1.0, %v1928_v40  ;;  %v1949_v22 = vadd.f32 %v3139_v7, %v1948_v6  ;;  %vm1952_vm15 = vmor %vm1950_vm13, %vm1951_vm12  ;;  %v1957_v31 = vor.u32 1.1754944e-38, %v1956_v29  ;;  %vm1955_vm0 = vcmp.eq.f32.partialorder %v1954_v19, 8.507059e+37 }
 0x228   : > { %v4613_v18 = vpop.eup %3144  ;;  %v2177_v1 = vadd.f32 %v2161_v61, %v4145_v44  ;;  %v2871_v5 = vmul.f32 -1.442695, %v1497_v27  ;;  %v2239_v41 = vmul.f32 %v3185_v34, %v1928_v40  ;;  %vm2025_vm1 = vweird.f32 %v4400_v2  ;;  %v4626_v44 = vld [vmem:[%s4794_s8] ss:$0 sm:$0xff]  ;;  %v4864_v61 = vld [vmem:[#allocation5_spill] sm:$0xff] }
 0x229   : > { %v3147_v13 = vpop.eup %3146  ;;  %v2223_v20 = vmul.f32 %v3143_v24, %v2207_v56  ;;  %v1953_v32 = vsel %vm1952_vm15, %v3139_v7, %v1949_v22  ;;  %v1976_v3 = vmul.f32 %v4613_v18, %v4587_v23  ;;  %v1378_v60 = vpop.f32.mrf.mxu2  ;;  %v2146_v63 = vadd.f32 %v4626_v44, %v1422_v57  ;;  %v3187_v7 = vld [vmem:[%s3563_s20 + $0x50] sm:$0xff]  ;;  %vm4673_vm7 = vmor %vm2025_vm1, %vm2026_vm14  ;;  %v4867_v22 = vld [vmem:[#allocation6_spill] sm:$0xff] }
 0x22a   : > { %v1958_v8 = vsel %vm1955_vm0, %v1957_v31, %v1953_v32  ;;  %v4621_v54 = vadd.f32 1.0, %v3147_v13  ;;  %3152 = vpow2.f32 %v2871_v5  ;;  %v1986_v9 = vand.u32 2147483648, %v4587_v23  ;;  %v3149_v14 = vpop.eup %3148  ;;  %v3188_v32 = vld [vmem:[%s3563_s20 + $0x58] sm:$0xff] }
 0x22b   : > { %v2255_v52 = vadd.f32 %v2239_v41, %v2223_v20  ;;  %v2208_v48 = vsub.f32 1.0, %v1958_v8  ;;  %v1977_v12 = vsub.f32 1.0, %v1976_v3  ;;  %v2240_v42 = vmul.f32 %v3187_v7, %v1958_v8  ;;  %v4634_v38 = vpop.eup %3150  ;;  %v2321_v8 = vld [vmem:[%s4238_s29 + $0x58] sm:$0xff] }
 0x22c   : > { %vm1981_vm2 = vweird.f32 %v4613_v18  ;;  %v1984_v53 = vand.u32 2147483647, %v4587_v23  ;;  %3154 = vrcp.f32 %v4621_v54  ;;  %vm4641_vm3 = vcmp.eq.f32.partialorder %v2029_v39, 8.507059e+37 }
 0x22d   : > { %2271 = vst [vmem:[%s4250_s15 + $0x48] sm:$0xff] %v2255_v52  ;;  %v2982_v51 = vpack.c.bf16 %v2255_v52, %v4589_v62  ;;  %v2335_v17 = vmax.f32 %v2319_v43, %v2255_v52  ;;  %v2224_v57 = vmul.f32 %v3149_v14, %v2208_v48  ;;  %v1978_v11 = vmul.f32 %v4613_v18, %v1977_v12  ;;  %v1427_v43 = vpop.f32.mrf.mxu3 }
 0x22e   : > { %3156 = vtanh.f32 %v2177_v1  ;;  %v1461_v28 = vadd.f32 %v1378_v60, %v4864_v61  ;;  %v2052_v10 = vsub.f32 1.0, %v4608_v36  ;;  %v2061_v62 = vand.u32 2147483648, %v4519_v0 }
 0x22f   : > { %3002 = vst [vmem:[%s4310_s22 + $0x20] sm:$0xff] %v2982_v51   ;;  %v4650_v46 = vadd.f32 %v2240_v42, %v2224_v57  ;;  %vm1980_vm4 = vweird.f32 %v4587_v23  ;;  %v1979_v47 = vadd.f32 %v4613_v18, %v1978_v11  ;;  %v2024_v39 = vadd.f32 %v4467_v35, %v4574_v33  ;;  %v1112_v11 = vpop.f32.mrf.mxu0 }
 0x230   : > { %v3153_v29 = vpop.eup %3152  ;;  %2351 = vst [vmem:[%s4270_s19 + $0x48] sm:$0xff] %v2335_v17  ;;  %vm1982_vm5 = vmor %vm1980_vm4, %vm1981_vm2  ;;  %v1987_v19 = vor.u32 1.1754944e-38, %v1986_v9  ;;  %v2162_v37 = vmul.f32 %v2146_v63, %v4569_v4  ;;  %v1499_v50 = vadd.f32 %v3966_v16, %v1461_v28  ;;  %v2081_v24 = vmul.f32 %v4634_v38, %v4577_v59 }
 0x231   : > { %2272 = vst [vmem:[%s4250_s15 + $0x50] sm:$0xff] %v4650_v46  ;;  %v2336_v23 = vmax.f32 %v2320_v26, %v4650_v46  ;;  %v1983_v33 = vsel %vm1982_vm5, %v4613_v18, %v1979_v47  ;;  %vm1985_vm6 = vcmp.eq.f32.partialorder %v1984_v53, 8.507059e+37  ;;  %v4667_v45 = vadd.f32 1.0, %v3153_v29  ;;  %v1380_v6 = vpop.f32.mrf.mxu2 }
 0x232   : > { %v3155_v40 = vpop.eup %3154  ;;  %v1988_v27 = vsel %vm1985_vm6, %v1987_v19, %v1983_v33  ;;  %v2873_v36 = vmul.f32 -1.442695, %v1499_v50  ;;  %v2053_v56 = vmul.f32 %v4592_v58, %v2052_v10  ;;  %vm2055_vm8 = vweird.f32 %v4519_v0 }
 0x233   : > { %v1463_v18 = vadd.f32 %v1380_v6, %v4867_v22  ;;  %2352 = vst [vmem:[%s4270_s19 + $0x50] sm:$0xff] %v2336_v23  ;;  %v2209_v31 = vsub.f32 1.0, %v1988_v27  ;;  %v2006_v1 = vmul.f32 %v3155_v40, %v4621_v54  ;;  %v2028_v2 = vsel %vm4673_vm7, %v4467_v35, %v2024_v39 }
 0x234   : > { %vm2056_vm9 = vweird.f32 %v4592_v58  ;;  %v3157_v5 = vpop.eup %3156  ;;  %v2178_v13 = vadd.f32 %v2162_v37, %v4172_v21  ;;  %3158 = vrcp.f32 %v4667_v45  ;;  %v2147_v20 = vadd.f32 %v4626_v44, %v1424_v30 }
 0x235   : > { %v2082_v34 = vsub.f32 1.0, %v2081_v24  ;;  %v2225_v41 = vmul.f32 %v3157_v5, %v2209_v31  ;;  %v2241_v3 = vmul.f32 %v3188_v32, %v1988_v27  ;;  %v2007_v60 = vsub.f32 1.0, %v2006_v1  ;;  %vm4717_vm0 = vmor %vm2055_vm8, %vm2056_vm9  ;;  %v3189_v24 = vld [vmem:[%s3563_s20 + $0x60] sm:$0xff]  ;;  %v1429_v33 = vpop.f32.mrf.mxu3 }
 0x236   : > { %3160 = vpow2.f32 %v2873_v36  ;;  %v2016_v35 = vand.u32 2147483648, %v4621_v54  ;;  %v2033_v63 = vsel %vm4641_vm3, %v4507_v25, %v2028_v2  ;;  %v2054_v21 = vadd.f32 %v4592_v58, %v2053_v56 }
 0x237   : > { %v1501_v52 = vadd.f32 %v3966_v16, %v1463_v18  ;;  %v2257_v48 = vadd.f32 %v2241_v3, %v2225_v41  ;;  %v2008_v12 = vmul.f32 %v3155_v40, %v2007_v60  ;;  %vm2011_vm10 = vweird.f32 %v3155_v40  ;;  %v1114_v3 = vpop.f32.mrf.mxu0 }
 0x238   : > { %v2014_v9 = vand.u32 2147483647, %v4621_v54  ;;  %vm4700_vm11 = vcmp.eq.f32.partialorder %v2059_v49, 8.507059e+37  ;;  %3162 = vtanh.f32 %v2178_v13  ;;  %v2163_v14 = vmul.f32 %v2147_v20, %v2033_v63 }
 0x239   : > { %v2875_v7 = vmul.f32 -1.442695, %v1501_v52  ;;  %v2083_v25 = vmul.f32 %v4634_v38, %v2082_v34  ;;  %2273 = vst [vmem:[%s4250_s15 + $0x58] sm:$0xff] %v2257_v48  ;;  %v2987_v16 = vpack.c.bf16 %v2257_v48, %v4650_v46  ;;  %v2337_v42 = vmax.f32 %v2321_v8, %v2257_v48  ;;  %v3190_v34 = vld [vmem:[%s4793_s7] ss:$0 sm:$0xff] }
 0x23a   : > { %vm2010_vm12 = vweird.f32 %v4621_v54  ;;  %v2009_v53 = vadd.f32 %v3155_v40, %v2008_v12  ;;  %v3159_v51 = vpop.eup %3158  ;;  %v2017_v49 = vor.u32 1.1754944e-38, %v2016_v35  ;;  %v2062_v17 = vor.u32 1.1754944e-38, %v2061_v62 }
 0x23b   : > { %vm2012_vm13 = vmor %vm2010_vm12, %vm2011_vm10  ;;  %3164 = vpow2.f32 %v2875_v7  ;;  %vm2085_vm14 = vweird.f32 %v4577_v59  ;;  %3003 = vst [vmem:[%s4310_s22 + $0x28] sm:$0xff] %v2987_v16   ;;  %vm2015_vm15 = vcmp.eq.f32.partialorder %v2014_v9, 8.507059e+37  ;;  %v2036_v26 = vmul.f32 %v3159_v51, %v4667_v45  ;;  %v2323_v9 = vld [vmem:[%s4238_s29 + $0x68] sm:$0xff] }
 0x23c   : > { %v3161_v57 = vpop.eup %3160  ;;  %v2013_v15 = vsel %vm2012_vm13, %v3155_v40, %v2009_v53  ;;  %v2091_v61 = vand.u32 2147483648, %v4577_v59  ;;  %2353 = vst [vmem:[%s4270_s19 + $0x58] sm:$0xff] %v2337_v42  ;;  %v2179_v10 = vadd.f32 %v2163_v14, %v4205_v55  ;;  %v2058_v46 = vsel %vm4717_vm0, %v4592_v58, %v2054_v21  ;;  %v2322_v40 = vld [vmem:[%s4238_s29 + $0x60] sm:$0xff]  ;;  %v3191_v21 = vld [vmem:[%s3563_s20 + $0x68] sm:$0xff] }
 0x23d   : > { %v2018_v28 = vsel %vm2015_vm15, %v2017_v49, %v2013_v15  ;;  %v4724_v62 = vadd.f32 1.0, %v3161_v57  ;;  %v2037_v0 = vsub.f32 1.0, %v2036_v26  ;;  %v2084_v39 = vadd.f32 %v4634_v38, %v2083_v25 }
 0x23e   : > { %v2210_v47 = vsub.f32 1.0, %v2018_v28  ;;  %vm2086_vm1 = vweird.f32 %v4634_v38  ;;  %v3163_v29 = vpop.eup %3162  ;;  %v2046_v19 = vand.u32 2147483648, %v4667_v45  ;;  %v2044_v37 = vand.u32 2147483647, %v4667_v45 }
 0x23f   : > { %3166 = vrcp.f32 %v4724_v62  ;;  %v2148_v55 = vadd.f32 %v4626_v44, %v1427_v43  ;;  %v2242_v23 = vmul.f32 %v3189_v24, %v2018_v28  ;;  %v2038_v58 = vmul.f32 %v3159_v51, %v2037_v0  ;;  %vm4747_vm4 = vmor %vm2085_vm14, %vm2086_vm1  ;;  %v3192_v0 = vld [vmem:[%s3563_s20 + $0x70] sm:$0xff] }
 0x240   : > { %v2226_v50 = vmul.f32 %v3163_v29, %v2210_v47  ;;  %vm2041_vm2 = vweird.f32 %v3159_v51  ;;  %3168 = vtanh.f32 %v2179_v10  ;;  %v2063_v27 = vsel %vm4700_vm11, %v2062_v17, %v2058_v46 }
 0x241   : > { %v3165_v6 = vpop.eup %3164  ;;  %v2089_v4 = vand.u32 2147483647, %v4577_v59  ;;  %v2092_v36 = vor.u32 1.1754944e-38, %v2091_v61  ;;  %vm2040_vm3 = vweird.f32 %v4667_v45  ;;  %v2039_v22 = vadd.f32 %v3159_v51, %v2038_v58 }
 0x242   : > { %v2258_v56 = vadd.f32 %v2242_v23, %v2226_v50  ;;  %v4741_v18 = vadd.f32 1.0, %v3165_v6  ;;  %vm2042_vm5 = vmor %vm2040_vm3, %vm2041_vm2  ;;  %v2047_v1 = vor.u32 1.1754944e-38, %v2046_v19  ;;  %v2164_v2 = vmul.f32 %v2148_v55, %v2063_v27  ;;  %v2324_v19 = vld [vmem:[%s4238_s29 + $0x70] sm:$0xff]  ;;  %v3193_v6 = vld [vmem:[%s3563_s20 + $0x78] sm:$0xff] }
 0x243   : > { %v2088_v5 = vsel %vm4747_vm4, %v4634_v38, %v2084_v39  ;;  %v2149_v45 = vadd.f32 %v4626_v44, %v1429_v33  ;;  %v2043_v20 = vsel %vm2042_vm5, %v3159_v51, %v2039_v22  ;;  %vm2045_vm6 = vcmp.eq.f32.partialorder %v2044_v37, 8.507059e+37  ;;  %v2325_v27 = vld [vmem:[%s4238_s29 + $0x78] sm:$0xff] }
 0x244   : > { %2274 = vst [vmem:[%s4250_s15 + $0x60] sm:$0xff] %v2258_v56  ;;  %v2338_v13 = vmax.f32 %v2322_v40, %v2258_v56  ;;  %3170 = vrcp.f32 %v4741_v18  ;;  %v2128_v41 = vadd.f32 %v3190_v34, %v1112_v11  ;;  %v2048_v32 = vsel %vm2045_vm6, %v2047_v1, %v2043_v20 }
 0x245   : > { %v3167_v59 = vpop.eup %3166  ;;  %vm2090_vm7 = vcmp.eq.f32.partialorder %v2089_v4, 8.507059e+37  ;;  %v2211_v38 = vsub.f32 1.0, %v2048_v32  ;;  %v2243_v52 = vmul.f32 %v3191_v21, %v2048_v32  ;;  %v2129_v12 = vadd.f32 %v3190_v34, %v1114_v3 }
 0x246   : > { %2354 = vst [vmem:[%s4270_s19 + $0x60] sm:$0xff] %v2338_v13  ;;  %v2066_v44 = vmul.f32 %v3167_v59, %v4724_v62  ;;  %v2093_v60 = vsel %vm2090_vm7, %v2092_v36, %v2088_v5  ;;  %v3169_v43 = vpop.eup %3168  ;;  %v2180_v8 = vadd.f32 %v2164_v2, %v2128_v41  ;;  %v2076_v30 = vand.u32 2147483648, %v4724_v62 }
 0x247   : > { %v2165_v35 = vmul.f32 %v2149_v45, %v2093_v60  ;;  %v2227_v63 = vmul.f32 %v3169_v43, %v2211_v38  ;;  %vm2071_vm8 = vweird.f32 %v3167_v59  ;;  %v2074_v16 = vand.u32 2147483647, %v4724_v62 }
 0x248   : > { %v2067_v48 = vsub.f32 1.0, %v2066_v44  ;;  %3172 = vtanh.f32 %v2180_v8  ;;  %vm2070_vm9 = vweird.f32 %v4724_v62  ;;  %v2077_v57 = vor.u32 1.1754944e-38, %v2076_v30 }
 0x249   : > { %v2259_v7 = vadd.f32 %v2243_v52, %v2227_v63  ;;  %v2181_v53 = vadd.f32 %v2165_v35, %v2129_v12  ;;  %vm2072_vm10 = vmor %vm2070_vm9, %vm2071_vm8  ;;  %vm2075_vm11 = vcmp.eq.f32.partialorder %v2074_v16, 8.507059e+37  ;;  %v2106_v26 = vand.u32 2147483648, %v4741_v18 }
 0x24a   : > { %v3171_v14 = vpop.eup %3170  ;;  %v2068_v25 = vmul.f32 %v3167_v59, %v2067_v48  ;;  %v2104_v28 = vand.u32 2147483647, %v4741_v18  ;;  %vm2100_vm13 = vweird.f32 %v4741_v18 }
 0x24b   : > { %v2096_v42 = vmul.f32 %v3171_v14, %v4741_v18  ;;  %2275 = vst [vmem:[%s4250_s15 + $0x68] sm:$0xff] %v2259_v7  ;;  %v2992_v51 = vpack.c.bf16 %v2259_v7, %v2258_v56  ;;  %v2339_v49 = vmax.f32 %v2323_v9, %v2259_v7  ;;  %vm2101_vm12 = vweird.f32 %v3171_v14 }
 0x24c   : > { %v2069_v17 = vadd.f32 %v3167_v59, %v2068_v25  ;;  %3174 = vtanh.f32 %v2181_v53  ;;  %vm2102_vm14 = vmor %vm2100_vm13, %vm2101_vm12  ;;  %v2107_v29 = vor.u32 1.1754944e-38, %v2106_v26  ;;  %vm2105_vm15 = vcmp.eq.f32.partialorder %v2104_v28, 8.507059e+37 }
 0x24d   : > { %v2097_v11 = vsub.f32 1.0, %v2096_v42  ;;  %3004 = vst [vmem:[%s4310_s22 + $0x30] sm:$0xff] %v2992_v51  }
 0x24e   : > { %v2073_v15 = vsel %vm2072_vm10, %v3167_v59, %v2069_v17  ;;  %2355 = vst [vmem:[%s4270_s19 + $0x68] sm:$0xff] %v2339_v49  ;;  %v3173_v62 = vpop.eup %3172 }
 0x24f   : > { %v2078_v54 = vsel %vm2075_vm11, %v2077_v57, %v2073_v15  ;;  %v2098_v61 = vmul.f32 %v3171_v14, %v2097_v11 }
 0x250   : > { %v2212_v10 = vsub.f32 1.0, %v2078_v54  ;;  %v2244_v39 = vmul.f32 %v3192_v0, %v2078_v54 }
 0x251   : > { %v2099_v46 = vadd.f32 %v3171_v14, %v2098_v61 }
 0x252   : > { %v2228_v47 = vmul.f32 %v3173_v62, %v2212_v10  ;;  %v3175_v23 = vpop.eup %3174 }
 0x253   : > { %v2103_v37 = vsel %vm2102_vm14, %v3171_v14, %v2099_v46 }
 0x254   : > { %v2260_v55 = vadd.f32 %v2244_v39, %v2228_v47  ;;  %v2108_v50 = vsel %vm2105_vm15, %v2107_v29, %v2103_v37 }
 0x255   : > { %v2213_v24 = vsub.f32 1.0, %v2108_v50  ;;  %v2245_v40 = vmul.f32 %v3193_v6, %v2108_v50 }
 0x256   : > { %2276 = vst [vmem:[%s4250_s15 + $0x70] sm:$0xff] %v2260_v55  ;;  %v2340_v58 = vmax.f32 %v2324_v19, %v2260_v55 }
 0x257   : > { %v2229_v33 = vmul.f32 %v3175_v23, %v2213_v24 }
 0x258   : > { %2356 = vst [vmem:[%s4270_s19 + $0x70] sm:$0xff] %v2340_v58 }
 0x259   : > { %v2261_v4 = vadd.f32 %v2245_v40, %v2229_v33 }
 0x25b   : > { %2277 = vst [vmem:[%s4250_s15 + $0x78] sm:$0xff] %v2261_v4  ;;  %v2997_v36 = vpack.c.bf16 %v2261_v4, %v2260_v55  ;;  %v2341_v56 = vmax.f32 %v2325_v27, %v2261_v4 }
 0x25d   : > { %3005 = vst [vmem:[%s4310_s22 + $0x38] sm:$0xff] %v2997_v36  }
 0x25e   : > { %2357 = vst [vmem:[%s4270_s19 + $0x78] sm:$0xff] %v2341_v56 }
 0x25f PF: > { %s22_s17 = sadd.s32 1, %s3200_s17  }
 0x260   : > { %p19_p4 = scmp.ge.s32.totalorder %s22_s17, 4  }
 0x262   :  { %21 = sbr.rel (!%p19_p4) target bundleno = 1 (0x1), region = 116 }

// kernel: drbc_forward.10
= control target key start
LH: loop header
LB: loop body
LE: loop exit
PB: predicated region body
PF: predicated region fallthrough
CT: control target
= control target key end

     0   :  { %s5057_s0 = inlined_call_operand.vmem [shape: bf16[256,128], index: 0, kind: input, shape index: {}]   ;;  %s5058_s1 = inlined_call_operand.vmem [shape: bf16[256,256], index: 1, kind: input, shape index: {}]   ;;  %s5059_s2 = inlined_call_operand.vmem [shape: f32[256,128], index: 2, kind: input, shape index: {}]   ;;  %s5060_s3 = inlined_call_operand.vmem [shape: f32[256,128], index: 3, kind: input, shape index: {}]   ;;  %s5061_s4 = inlined_call_operand.vmem [shape: bf16[128,384], index: 4, kind: input, shape index: {}]   ;;  %s5062_s5 = inlined_call_operand.vmem [shape: bf16[128,384], index: 5, kind: input, shape index: {}]   ;;  %s5063_s6 = inlined_call_operand.vmem [shape: f32[1,256], index: 6, kind: input, shape index: {}]   ;;  %s5064_s7 = inlined_call_operand.vmem [shape: f32[1,128], index: 7, kind: input, shape index: {}]   ;;  %s5065_s8 = inlined_call_operand.vmem [shape: f32[1,128], index: 8, kind: input, shape index: {}]   ;;  %s5066_s9 = inlined_call_operand.hbm [shape: f32[256,128], index: 9, kind: output, shape index: {0}]   ;;  %s5067_s10 = inlined_call_operand.hbm [shape: bf16[256,128], index: 10, kind: output, shape index: {1}]   ;;  %s5068_s11 = inlined_call_operand.vmem [shape: f32[256,128], index: 11, kind: output, shape index: {2}]  }
   0x1   :  { %5069 = sst [smem:[#allocation16_spill]] %s5057_s0 }
   0x2   :  { %5070 = sst [smem:[#allocation17_spill]] %s5058_s1 }
   0x3   :  { %5071 = sst [smem:[#allocation18_spill]] %s5059_s2 }
   0x4   :  { %5072 = sst [smem:[#allocation19_spill]] %s5060_s3 }
   0x5   :  { %5073 = sst [smem:[#allocation20_spill]] %s5061_s4 }
   0x6   :  { %5074 = sst [smem:[#allocation21_spill]] %s5062_s5 }
   0x7   :  { %17 = vsyncpa [#allocation3], 0 }
   0x8   :  { %19 = vsyncpa [#allocation3 + $0x1], 0 }
   0x9   :  { %20 = vsyncpa [#allocation5], 0 }
   0xa   :  { %22 = vsyncpa [#allocation5 + $0x1], 0  ;;  %s3438_s17 = smov 0   ;;  %s3440_s18 = smov 0  }
   0xb   :  { %s3442_s19 = smov 0   ;;  %s3444_s20 = smov 0  }
   0xc LB: > { %s3459_s21 = sadd.s32 4294967295, %s3372_s20   ;;  %s2545_s22 = sadd.s32 4294967294, %s3372_s20   ;;  %s3372_s20 = sphi %s3444_s20, %s5164_s20   ;;  %s3368_s19 = sphi %s3442_s19, %s5163_s19   ;;  %s3364_s18 = sphi %s3440_s18, %s5162_s18   ;;  %s3360_s17 = sphi %s3438_s17, %s5161_s17  }
   0xd   : > { %s3463_s23 = sadd.s32 1, %s3372_s20   ;;  %s239_s24 = sadd.s32 1, %s3368_s19 }
   0xe   : > { %s236_s25 = ssub.s32 %s3372_s20, %s3463_s23  ;;  %p249_p0 = scmp.ne.s32.totalorder %s3368_s19, %s3364_s18 }
   0xf   : > { %p237_p1 = scmp.eq.s32.totalorder %s236_s25, 0  ;;  %p250_p2 = scmp.eq.s32.totalorder %s3459_s21, 1 }
  0x10   : > { %p255_p3 = scmp.ne.s32.totalorder %s3364_s18, %s3360_s17  ;;  %p256_p4 = scmp.eq.s32.totalorder %s2545_s22, 1 }
  0x11   : > { %s3474_s26 = scalar_select %p237_p1, %s3368_s19, %s239_s24  }
  0x12   : > { %p3476_p5 = por %p250_p2, %p249_p0  ;;  %p3480_p6 = por %p256_p4, %p255_p3 }
  0x13   : > { %5075 = sst [smem:[#allocation8_spill]] %s3474_s26  ;;  %p2548_p7 = scmp.ge.s32.totalorder %s3372_s20, 1 }
  0x14   : > { %p372_p8 = scmp.lt.s32.totalorder %s3372_s20, 3 }
  0x16   : > { %p373_p9 = pnand %p2548_p7, %p372_p8 }
  0x18   : > { %376 = sbr.rel (%p373_p9) target bundleno = 644 (0x284), region = 56 }
  0x1d   : > { %s5078_s0 = sld [smem:[#allocation16_spill]]  ;;  %s2551_s12 = sshll.u32 %s3459_s21, 4 }
  0x1e   : > { %p434_p10 = scmp.lt.s32.totalorder %s2551_s12, 31  ;;  %s5079_s1 = sld [smem:[#allocation17_spill]] }
  0x1f   : > { %s5080_s4 = sld [smem:[#allocation20_spill]]  ;;  %s4433_s25 = sand.u32 1, %s3364_s18  }
  0x20   : > { %s5166_s12 = smov (!%p434_p10, %s2551_s12), 31  ;;  %s5081_s5 = sld [smem:[#allocation21_spill]] }
  0x21   : > { %s3523_s16 = sshll.u32 %s5166_s12, 3  ;;  %s5082_s2 = sld [smem:[#allocation18_spill]] }
  0x22   : > { %s2549_s29 = sshll.u32 %s4433_s25, 7  ;;  %s5130_s3 = sld [smem:[#allocation19_spill]] }
  0x23   : > { %v2944_v0 = vld [vmem:[%s5078_s0 + $0x38] sm:$0xff]  ;;  %v2943_v2 = vld [vmem:[%s5078_s0 + $0x30] sm:$0xff]  ;;  %v2942_v4 = vld [vmem:[%s5078_s0 + $0x28] sm:$0xff]  ;;  %s4491_s12 = scalar_lea.vmem [#allocation2], %s2549_s29 }
  0x24   : > { %v2952_v1 = vld [vmem:[%s5078_s0 + $0x78] sm:$0xff]  ;;  %684 = vmatpush.bf16.msra.mxu0 %v2944_v0  ;;  %v2951_v3 = vld [vmem:[%s5078_s0 + $0x70] sm:$0xff]  ;;  %v2950_v5 = vld [vmem:[%s5078_s0 + $0x68] sm:$0xff]  ;;  %s3535_s13 = scalar_lea.vmem %s5079_s1, %s3523_s16  ;;  %s3002_s1 = sshll.u32 %s3459_s21, 6 }
  0x25   : > { %733 = vmatpush.bf16.msra.mxu1 %v2952_v1  ;;  %v2941_v6 = vld [vmem:[%s5078_s0 + $0x20] sm:$0xff]  ;;  %v2940_v8 = vld [vmem:[%s5078_s0 + $0x18] sm:$0xff]  ;;  %v2939_v10 = vld [vmem:[%s5078_s0 + $0x10] sm:$0xff]  ;;  %s2377_s30 = sshll.u32 %s4491_s12, 4  ;;  %s5001_s30 = int_to_ptr.vmem [resolvable:$true] %s2377_s30 }
  0x26   : > { %v2949_v7 = vld [vmem:[%s5078_s0 + $0x60] sm:$0xff]  ;;  %v2948_v9 = vld [vmem:[%s5078_s0 + $0x58] sm:$0xff]  ;;  %v2947_v11 = vld [vmem:[%s5078_s0 + $0x50] sm:$0xff] }
  0x27   : > { %v2938_v12 = vld [vmem:[%s5078_s0 + $0x8] sm:$0xff]  ;;  %v2937_v14 = vld [vmem:[%s5078_s0] sm:$0xff]  ;;  %v2570_v22 = vld [vmem:[%s3535_s13 + $0x10] sm:$0xf]  ;;  %s3777_s24 = scalar_lea.vmem %s5082_s2, %s3523_s16  ;;  %s2393_s2 = scalar_lea.hbm %s5067_s10, %s3002_s1 }
  0x28   : > { %685 = vmatpush.bf16.msra.mxu0 %v2943_v2  ;;  %v2946_v13 = vld [vmem:[%s5078_s0 + $0x48] sm:$0xff]  ;;  %v2945_v15 = vld [vmem:[%s5078_s0 + $0x40] sm:$0xff]  ;;  %v2924_v23 = vld [vmem:[%s3535_s13 + $0x14] sm:$0xf0]  ;;  %s4456_s15 = scalar_lea.vmem %s5130_s3, %s3523_s16  ;;  %s3001_s0 = sshll.u32 %s3459_s21, 7 }
  0x29   : > { %734 = vmatpush.bf16.msra.mxu1 %v2951_v3  ;;  %v2562_v16 = vld [vmem:[%s3535_s13] sm:$0xf]  ;;  %v2922_v17 = vld [vmem:[%s3535_s13 + $0x4] sm:$0xf0]  ;;  %v2921_v18 = vld [vmem:[%s3535_s13 + $0x4] sm:$0xf]  ;;  %v2571_v26 = vor.u32 %v2924_v23, %v2570_v22  ;;  %s2376_s29 = scalar_lea.hbm %s5066_s9, %s3001_s0 }
  0x2a   : > { %v2564_v19 = vld [vmem:[%s3535_s13 + $0x8] sm:$0xf0]  ;;  %v2563_v20 = vor.u32 %v2922_v17, %v2562_v16  ;;  %v2923_v24 = vld [vmem:[%s3535_s13 + $0x14] sm:$0xf]  ;;  %v2572_v25 = vld [vmem:[%s3535_s13 + $0x18] sm:$0xf0] }
  0x2b   : > { %v2567_v21 = vor.u32 %v2921_v18, %v2564_v19  ;;  %v2575_v27 = vor.u32 %v2923_v24, %v2572_v25  ;;  %v2578_v28 = vld [vmem:[%s3535_s13 + $0x20] sm:$0xf]  ;;  %v2926_v29 = vld [vmem:[%s3535_s13 + $0x24] sm:$0xf0]  ;;  %v2925_v30 = vld [vmem:[%s3535_s13 + $0x24] sm:$0xf] }
  0x2c   : > { %686 = vmatpush.bf16.msra.mxu0 %v2942_v4  ;;  %v2580_v31 = vld [vmem:[%s3535_s13 + $0x28] sm:$0xf0]  ;;  %v2579_v32 = vor.u32 %v2926_v29, %v2578_v28  ;;  %v2586_v34 = vld [vmem:[%s3535_s13 + $0x30] sm:$0xf]  ;;  %v2928_v35 = vld [vmem:[%s3535_s13 + $0x34] sm:$0xf0] }
  0x2d   : > { %735 = vmatpush.bf16.msra.mxu1 %v2950_v5  ;;  %v2583_v33 = vor.u32 %v2925_v30, %v2580_v31  ;;  %v2927_v36 = vld [vmem:[%s3535_s13 + $0x34] sm:$0xf]  ;;  %v2588_v37 = vld [vmem:[%s3535_s13 + $0x38] sm:$0xf0]  ;;  %v2587_v38 = vor.u32 %v2928_v35, %v2586_v34  ;;  %v2594_v40 = vld [vmem:[%s3535_s13 + $0x40] sm:$0xf] }
  0x2e   : > { %v2591_v39 = vor.u32 %v2927_v36, %v2588_v37  ;;  %v2930_v41 = vld [vmem:[%s3535_s13 + $0x44] sm:$0xf0]  ;;  %v2929_v42 = vld [vmem:[%s3535_s13 + $0x44] sm:$0xf]  ;;  %v2596_v43 = vld [vmem:[%s3535_s13 + $0x48] sm:$0xf0] }
  0x2f   : > { %v2595_v44 = vor.u32 %v2930_v41, %v2594_v40  ;;  %v2599_v45 = vor.u32 %v2929_v42, %v2596_v43  ;;  %v2774_v46 = vld [vmem:[%s5080_s4 + $0xa8] sm:$0xf]  ;;  %v2975_v47 = vld [vmem:[%s5080_s4 + $0xb0] sm:$0xf0]  ;;  %v2974_v48 = vld [vmem:[%s5080_s4 + $0xac] sm:$0xf] }
  0x30   : > { %687 = vmatpush.bf16.msra.mxu0 %v2941_v6  ;;  %v2775_v49 = vor.u32 %v2975_v47, %v2774_v46  ;;  %v2776_v50 = vld [vmem:[%s5080_s4 + $0xb4] sm:$0xf0]  ;;  %v2782_v51 = vld [vmem:[%s5080_s4 + $0xb0] sm:$0xf]  ;;  %v2976_v52 = vld [vmem:[%s5080_s4 + $0xb8] sm:$0xf0] }
  0x31   : > { %736 = vmatpush.bf16.msra.mxu1 %v2949_v7  ;;  %v2779_v53 = vor.u32 %v2974_v48, %v2776_v50  ;;  %v2783_v54 = vor.u32 %v2976_v52, %v2782_v51  ;;  %v2762_v55 = vld [vmem:[%s5080_s4 + $0x90] sm:$0xf]  ;;  %v2972_v56 = vld [vmem:[%s5080_s4 + $0x98] sm:$0xf0]  ;;  %v2971_v57 = vld [vmem:[%s5080_s4 + $0x94] sm:$0xf] }
  0x32   : > { %966 = vmatpush.bf16.msra.mxu2 %v2775_v49  ;;  %v2763_v58 = vor.u32 %v2972_v56, %v2762_v55  ;;  %v2764_v59 = vld [vmem:[%s5080_s4 + $0x9c] sm:$0xf0]  ;;  %v2770_v60 = vld [vmem:[%s5080_s4 + $0x98] sm:$0xf]  ;;  %v2973_v61 = vld [vmem:[%s5080_s4 + $0xa0] sm:$0xf0] }
  0x33   : > { %1015 = vmatpush.bf16.msra.mxu3 %v2779_v53  ;;  %v2767_v62 = vor.u32 %v2971_v57, %v2764_v59  ;;  %v2771_v63 = vor.u32 %v2973_v61, %v2770_v60  ;;  %v2602_v0 = vld [vmem:[%s3535_s13 + $0x50] sm:$0xf]  ;;  %v2932_v1 = vld [vmem:[%s3535_s13 + $0x54] sm:$0xf0]  ;;  %v2931_v2 = vld [vmem:[%s3535_s13 + $0x54] sm:$0xf] }
  0x34   : > { %688 = vmatpush.bf16.msra.mxu0 %v2940_v8  ;;  %v2604_v3 = vld [vmem:[%s3535_s13 + $0x58] sm:$0xf0]  ;;  %v2603_v4 = vor.u32 %v2932_v1, %v2602_v0  ;;  %v2870_v6 = vld [vmem:[%s5081_s5 + $0xa8] sm:$0xf]  ;;  %v2999_v7 = vld [vmem:[%s5081_s5 + $0xb0] sm:$0xf0] }
  0x35   : > { %737 = vmatpush.bf16.msra.mxu1 %v2948_v9  ;;  %v2607_v5 = vor.u32 %v2931_v2, %v2604_v3  ;;  %v2871_v8 = vor.u32 %v2999_v7, %v2870_v6  ;;  %v2750_v9 = vld [vmem:[%s5080_s4 + $0x78] sm:$0xf]  ;;  %v2858_v18 = vld [vmem:[%s5081_s5 + $0x90] sm:$0xf]  ;;  %v2996_v19 = vld [vmem:[%s5081_s5 + $0x98] sm:$0xf0] }
  0x36   : > { %967 = vmatpush.bf16.msra.mxu2 %v2763_v58  ;;  %v2966_v22 = vld [vmem:[%s5080_s4 + $0x68] sm:$0xf0]  ;;  %v2965_v23 = vld [vmem:[%s5080_s4 + $0x64] sm:$0xf]  ;;  %v2740_v24 = vld [vmem:[%s5080_s4 + $0x6c] sm:$0xf0] }
  0x37   : > { %1016 = vmatpush.bf16.msra.mxu3 %v2767_v62  ;;  %v2967_v28 = vld [vmem:[%s5080_s4 + $0x70] sm:$0xf0]  ;;  %v2846_v29 = vld [vmem:[%s5081_s5 + $0x78] sm:$0xf]  ;;  %v2993_v31 = vld [vmem:[%s5081_s5 + $0x80] sm:$0xf0] }
  0x38   : > { %689 = vmatpush.bf16.msra.mxu0 %v2939_v10  ;;  %v2969_v10 = vld [vmem:[%s5080_s4 + $0x80] sm:$0xf0]  ;;  %v2847_v34 = vor.u32 %v2993_v31, %v2846_v29  ;;  %v2962_v35 = vld [vmem:[%s5080_s4 + $0x4c] sm:$0xf]  ;;  %v2728_v36 = vld [vmem:[%s5080_s4 + $0x54] sm:$0xf0] }
  0x39   : > { %738 = vmatpush.bf16.msra.mxu1 %v2947_v11  ;;  %v2968_v11 = vld [vmem:[%s5080_s4 + $0x7c] sm:$0xf]  ;;  %v2734_v37 = vld [vmem:[%s5080_s4 + $0x50] sm:$0xf]  ;;  %v2610_v40 = vld [vmem:[%s3535_s13 + $0x60] sm:$0xf]  ;;  %v2731_v41 = vor.u32 %v2962_v35, %v2728_v36 }
  0x3a   : > { %v2934_v43 = vld [vmem:[%s3535_s13 + $0x64] sm:$0xf0]  ;;  %v2834_v46 = vld [vmem:[%s5081_s5 + $0x60] sm:$0xf]  ;;  %v2990_v47 = vld [vmem:[%s5081_s5 + $0x68] sm:$0xf0] }
  0x3b   : > { %v2835_v48 = vor.u32 %v2990_v47, %v2834_v46  ;;  %v2611_v49 = vor.u32 %v2934_v43, %v2610_v40  ;;  %v2714_v51 = vld [vmem:[%s5080_s4 + $0x30] sm:$0xf]  ;;  %v2960_v52 = vld [vmem:[%s5080_s4 + $0x38] sm:$0xf0]  ;;  %v2959_v53 = vld [vmem:[%s5080_s4 + $0x34] sm:$0xf] }
  0x3c   : > { %690 = vmatpush.bf16.msra.mxu0 %v2938_v12  ;;  %v2751_v12 = vor.u32 %v2969_v10, %v2750_v9  ;;  %v2716_v55 = vld [vmem:[%s5080_s4 + $0x3c] sm:$0xf0]  ;;  %v2722_v56 = vld [vmem:[%s5080_s4 + $0x38] sm:$0xf]  ;;  %v2961_v57 = vld [vmem:[%s5080_s4 + $0x40] sm:$0xf0] }
  0x3d   : > { %739 = vmatpush.bf16.msra.mxu1 %v2946_v13  ;;  %v2752_v13 = vld [vmem:[%s5080_s4 + $0x84] sm:$0xf0]  ;;  %v2719_v58 = vor.u32 %v2959_v53, %v2716_v55  ;;  %v2723_v59 = vor.u32 %v2961_v57, %v2722_v56  ;;  %v2987_v61 = vld [vmem:[%s5081_s5 + $0x50] sm:$0xf0]  ;;  %v2702_v62 = vld [vmem:[%s5080_s4 + $0x18] sm:$0xf] }
  0x3e   : > { %v2755_v16 = vor.u32 %v2968_v11, %v2752_v13  ;;  %968 = vmatpush.bf16.msra.mxu2 %v2751_v12  ;;  %v2822_v60 = vld [vmem:[%s5081_s5 + $0x48] sm:$0xf]  ;;  %v2957_v0 = vld [vmem:[%s5080_s4 + $0x20] sm:$0xf0]  ;;  %v2956_v1 = vld [vmem:[%s5080_s4 + $0x1c] sm:$0xf] }
  0x3f   : > { %v2704_v2 = vld [vmem:[%s5080_s4 + $0x24] sm:$0xf0]  ;;  %v2703_v3 = vor.u32 %v2957_v0, %v2702_v62  ;;  %v2984_v9 = vld [vmem:[%s5081_s5 + $0x38] sm:$0xf0]  ;;  %v2690_v11 = vld [vmem:[%s5080_s4] sm:$0xf] }
  0x40   : > { %691 = vmatpush.bf16.msra.mxu0 %v2937_v14  ;;  %v2758_v14 = vld [vmem:[%s5080_s4 + $0x80] sm:$0xf]  ;;  %1017 = vmatpush.bf16.msra.mxu3 %v2755_v16  ;;  %v2707_v6 = vor.u32 %v2956_v1, %v2704_v2  ;;  %v2954_v12 = vld [vmem:[%s5080_s4 + $0x8] sm:$0xf0]  ;;  %v2953_v13 = vld [vmem:[%s5080_s4 + $0x4] sm:$0xf] }
  0x41   : > { %740 = vmatpush.bf16.msra.mxu1 %v2945_v15  ;;  %v2970_v15 = vld [vmem:[%s5080_s4 + $0x88] sm:$0xf0]  ;;  %v2698_v16 = vld [vmem:[%s5080_s4 + $0x8] sm:$0xf]  ;;  %v2786_v29 = vld [vmem:[%s5081_s5] sm:$0xf] }
  0x42   : > { %v2759_v17 = vor.u32 %v2970_v15, %v2758_v14  ;;  %v2691_v14 = vor.u32 %v2954_v12, %v2690_v11  ;;  %v2692_v15 = vld [vmem:[%s5080_s4 + $0xc] sm:$0xf0]  ;;  %v782_v35 = vld [vmem:[%s3777_s24] sm:$0xff]  ;;  %v783_v36 = vld [vmem:[%s3777_s24 + $0x8] sm:$0xff]  ;;  %s2379_s3 = sshll.u32 %s2376_s29, 4  ;;  %s2355_s1 = scalar_lea.sflag [#allocation3], %s4433_s25  ;;  %s2380_s3 = int_to_ptr.hbm [resolvable:$true] %s2379_s3 }
  0x43   : > { %692 = vmatmul.bf16.vlgmr.msra.gmra.mxu0 %v2563_v20  ;;  %v2738_v20 = vld [vmem:[%s5080_s4 + $0x60] sm:$0xf]  ;;  %v2878_v43 = vld [vmem:[%s5081_s5 + $0xb0] sm:$0xf]  ;;  %v2992_v53 = vld [vmem:[%s5081_s5 + $0x7c] sm:$0xf] }
  0x44   : > { %741 = vmatmul.bf16.vlgmr.msra.gmra.mxu1 %v2567_v21  ;;  %1064 = vmatpush.bf16.msrb.mxu0 %v2783_v54  ;;  %v2859_v21 = vor.u32 %v2996_v19, %v2858_v18  ;;  %v2739_v25 = vor.u32 %v2966_v22, %v2738_v20  ;;  %v2715_v54 = vor.u32 %v2960_v52, %v2714_v51  ;;  %v2798_v20 = vld [vmem:[%s5081_s5 + $0x18] sm:$0xf]  ;;  %v784_v51 = vld [vmem:[%s3777_s24 + $0x10] sm:$0xff]  ;;  %v2854_v11 = vld [vmem:[%s5081_s5 + $0x80] sm:$0xf]  ;;  %s3292_s26 = sshra.s32 %s2380_s3, 4  ;;  %s3293_s26 = int_to_ptr.hbm [resolvable:$true] %s3292_s26 }
  0x45   : > { %1281 = vmatpush.bf16.msrb.mxu1 %v2871_v8  ;;  %v2810_v8 = vld [vmem:[%s5081_s5 + $0x30] sm:$0xf]  ;;  %v2695_v18 = vor.u32 %v2953_v13, %v2692_v15  ;;  %v785_v52 = vld [vmem:[%s3777_s24 + $0x18] sm:$0xff]  ;;  %v2994_v12 = vld [vmem:[%s5081_s5 + $0x88] sm:$0xf0]  ;;  %s3294_s29 = scalar_lea.hbm %s3293_s26, 128  ;;  %p3299_p0 = scmp.lt.s32.totalorder %s3293_s26, %s5066_s9 }
  0x46   : > { %969 = vmatpush.bf16.msra.mxu2 %v2739_v25  ;;  %v2811_v10 = vor.u32 %v2984_v9, %v2810_v8  ;;  %v2935_v25 = vld [vmem:[%s3535_s13 + $0x74] sm:$0xf]  ;;  %v3804_v55 = vpack.c.bf16 %v785_v52, %v784_v51  ;;  %v2855_v13 = vor.u32 %v2994_v12, %v2854_v11  ;;  %p3295_p11 = scmp.ne.s32.totalorder %s3293_s26, %s3294_s29 }
  0x47   : > { %v792_v52 = vld [vmem:[%s3777_s24 + $0x50] sm:$0xff] }
  0x48   : > { %1065 = vmatpush.bf16.msrb.mxu0 %v2771_v63  ;;  %v2823_v63 = vor.u32 %v2987_v61, %v2822_v60  ;;  %v2997_v60 = vld [vmem:[%s5081_s5 + $0xa0] sm:$0xf0]  ;;  %p3296_p12 = pnand %p3295_p11, %p3476_p5 }
  0x49   : > { %1282 = vmatpush.bf16.msrb.mxu1 %v2859_v21  ;;  %v2981_v21 = vld [vmem:[%s5081_s5 + $0x20] sm:$0xf0] }
  0x4a   : > { %v2799_v22 = vor.u32 %v2981_v21, %v2798_v20  ;;  %v789_v20 = vld [vmem:[%s3777_s24 + $0x38] sm:$0xff]  ;;  %v2986_v21 = vld [vmem:[%s5081_s5 + $0x4c] sm:$0xf]  ;;  %p3297_p13 = pneg %p3296_p12 }
  0x4c   : > { %1066 = vmatpush.bf16.msrb.mxu0 %v2759_v17  ;;  %v2955_v17 = vld [vmem:[%s5080_s4 + $0x10] sm:$0xf0] }
  0x4d   : > { %1283 = vmatpush.bf16.msrb.mxu1 %v2847_v34  ;;  %v2699_v19 = vor.u32 %v2955_v17, %v2698_v16 }
  0x51   : > { %1284 = vmatpush.bf16.msrb.mxu1 %v2835_v48 }
  0x53   : > { %697 = vmatmul.bf16.gmra.mxu0 %v2571_v26  ;;  %v2743_v26 = vor.u32 %v2965_v23, %v2740_v24  ;;  %v2618_v23 = vld [vmem:[%s3535_s13 + $0x70] sm:$0xf]  ;;  %v2936_v24 = vld [vmem:[%s3535_s13 + $0x74] sm:$0xf0] }
  0x54   : > { %746 = vmatmul.bf16.gmra.mxu1 %v2575_v27  ;;  %v2746_v27 = vld [vmem:[%s5080_s4 + $0x68] sm:$0xf] }
  0x55   : > { %v2747_v30 = vor.u32 %v2967_v28, %v2746_v27  ;;  %1018 = vmatpush.bf16.msra.mxu3 %v2743_v26  ;;  %1285 = vmatpush.bf16.msrb.mxu1 %v2823_v63  ;;  %v2620_v26 = vld [vmem:[%s3535_s13 + $0x78] sm:$0xf0]  ;;  %v2998_v27 = vld [vmem:[%s5081_s5 + $0xac] sm:$0xf]  ;;  %v2872_v28 = vld [vmem:[%s5081_s5 + $0xb4] sm:$0xf0] }
  0x56   : > { %v2623_v31 = vor.u32 %v2935_v25, %v2620_v26 }
  0x57   : > { %1067 = vmatpush.bf16.msrb.mxu0 %v2747_v30  ;;  %v2619_v30 = vor.u32 %v2936_v24, %v2618_v23 }
  0x59   : > { %1019 = vmatpush.bf16.msra.mxu3 %v2731_v41  ;;  %1286 = vmatpush.bf16.msrb.mxu1 %v2811_v10 }
  0x5d   : > { %1020 = vmatpush.bf16.msra.mxu3 %v2719_v58  ;;  %1287 = vmatpush.bf16.msrb.mxu1 %v2799_v22  ;;  %v2824_v22 = vld [vmem:[%s5081_s5 + $0x54] sm:$0xf0] }
  0x5e   : > { %v2827_v24 = vor.u32 %v2986_v21, %v2824_v22 }
  0x61   : > { %1021 = vmatpush.bf16.msra.mxu3 %v2707_v6  ;;  %v2836_v6 = vld [vmem:[%s5081_s5 + $0x6c] sm:$0xf0] }
  0x63   : > { %702 = vmatmul.bf16.gmra.mxu0 %v2579_v32  ;;  %v2726_v32 = vld [vmem:[%s5080_s4 + $0x48] sm:$0xf] }
  0x64   : > { %751 = vmatmul.bf16.gmra.mxu1 %v2583_v33  ;;  %v2963_v33 = vld [vmem:[%s5080_s4 + $0x50] sm:$0xf0] }
  0x65   : > { %1022 = vmatpush.bf16.msra.mxu3 %v2695_v18 }
  0x73   : > { %707 = vmatmul.bf16.gmra.mxu0 %v2587_v38  ;;  %v2727_v38 = vor.u32 %v2963_v33, %v2726_v32  ;;  %v2875_v32 = vor.u32 %v2998_v27, %v2872_v28  ;;  %v2978_v33 = vld [vmem:[%s5081_s5 + $0x8] sm:$0xf0]  ;;  %v2842_v27 = vld [vmem:[%s5081_s5 + $0x68] sm:$0xf]  ;;  %v2991_v28 = vld [vmem:[%s5081_s5 + $0x70] sm:$0xf0] }
  0x74   : > { %756 = vmatmul.bf16.gmra.mxu1 %v2591_v39  ;;  %v2964_v39 = vld [vmem:[%s5080_s4 + $0x58] sm:$0xf0]  ;;  %v2787_v34 = vor.u32 %v2978_v33, %v2786_v29  ;;  %v2843_v29 = vor.u32 %v2991_v28, %v2842_v27 }
  0x75   : > { %v2735_v42 = vor.u32 %v2964_v39, %v2734_v37  ;;  %970 = vmatpush.bf16.msra.mxu2 %v2727_v38  ;;  %v2995_v37 = vld [vmem:[%s5081_s5 + $0x94] sm:$0xf]  ;;  %v2860_v38 = vld [vmem:[%s5081_s5 + $0x9c] sm:$0xf0]  ;;  %v3787_v39 = vpack.c.bf16 %v783_v36, %v782_v35  ;;  %v791_v36 = vld [vmem:[%s3777_s24 + $0x48] sm:$0xff] }
  0x76   : > { %1288 = vmatpush.bf16.msrb.mxu1 %v2787_v34  ;;  %v2863_v40 = vor.u32 %v2995_v37, %v2860_v38  ;;  %v790_v35 = vld [vmem:[%s3777_s24 + $0x40] sm:$0xff]  ;;  %v2983_v37 = vld [vmem:[%s5081_s5 + $0x34] sm:$0xf]  ;;  %v797_v27 = vld [vmem:[%s3777_s24 + $0x78] sm:$0xff] }
  0x77   : > { %1068 = vmatpush.bf16.msrb.mxu0 %v2735_v42  ;;  %v2812_v38 = vld [vmem:[%s5081_s5 + $0x3c] sm:$0xf0] }
  0x79   : > { %971 = vmatpush.bf16.msra.mxu2 %v2715_v54  ;;  %v2848_v54 = vld [vmem:[%s5081_s5 + $0x84] sm:$0xf0] }
  0x7a   : > { %v2851_v56 = vor.u32 %v2992_v53, %v2848_v54  ;;  %v793_v53 = vld [vmem:[%s3777_s24 + $0x58] sm:$0xff] }
  0x7b   : > { %1069 = vmatpush.bf16.msrb.mxu0 %v2723_v59  ;;  %v2866_v59 = vld [vmem:[%s5081_s5 + $0x98] sm:$0xf]  ;;  %v2980_v54 = vld [vmem:[%s5081_s5 + $0x1c] sm:$0xf] }
  0x7c   : > { %v2867_v61 = vor.u32 %v2997_v60, %v2866_v59 }
  0x7d   : > { %972 = vmatpush.bf16.msra.mxu2 %v2703_v3  ;;  %v786_v3 = vld [vmem:[%s3777_s24 + $0x20] sm:$0xff] }
  0x81   : > { %973 = vmatpush.bf16.msra.mxu2 %v2691_v14 }
  0x83   : > { %712 = vmatmul.bf16.gmra.mxu0 %v2595_v44  ;;  %v2933_v44 = vld [vmem:[%s3535_s13 + $0x64] sm:$0xf] }
  0x84   : > { %761 = vmatmul.bf16.gmra.mxu1 %v2599_v45  ;;  %v2612_v45 = vld [vmem:[%s3535_s13 + $0x68] sm:$0xf0]  ;;  %s4482_s13 = scalar_lea.vmem %s5068_s11, %s3523_s16  ;;  %s2550_s16 = sshll.u32 %s4433_s25, 6 }
  0x85   : > { %v2615_v50 = vor.u32 %v2933_v44, %v2612_v45  ;;  %1330 = vmatpush.bf16.msrb.mxu2 %v2875_v32  ;;  %v3000_v44 = vld [vmem:[%s5081_s5 + $0xb8] sm:$0xf0]  ;;  %s4535_s22 = scalar_lea.vmem [#allocation4], %s2550_s16  ;;  %s2396_s16 = sshll.u32 %s2393_s2, 4  ;;  %s5009_s16 = int_to_ptr.hbm [resolvable:$true] %s2396_s16 }
  0x86   : > { %v2879_v45 = vor.u32 %v3000_v44, %v2878_v43  ;;  %v2830_v44 = vld [vmem:[%s5081_s5 + $0x50] sm:$0xf]  ;;  %s2394_s0 = sshll.u32 %s4535_s22, 4  ;;  %s5007_s0 = int_to_ptr.vmem [resolvable:$true] %s2394_s0 }
  0x88   : > { %1379 = vmatpush.bf16.msrb.mxu3 %v2879_v45  ;;  %v2988_v45 = vld [vmem:[%s5081_s5 + $0x58] sm:$0xf0] }
  0x89   : > { %1331 = vmatpush.bf16.msrb.mxu2 %v2863_v40  ;;  %v3855_v40 = vpack.c.bf16 %v791_v36, %v790_v35 }
  0x8c   : > { %1380 = vmatpush.bf16.msrb.mxu3 %v2867_v61  ;;  %v2818_v61 = vld [vmem:[%s5081_s5 + $0x38] sm:$0xf] }
  0x8d   : > { %1332 = vmatpush.bf16.msrb.mxu2 %v2851_v56  ;;  %v2800_v56 = vld [vmem:[%s5081_s5 + $0x24] sm:$0xf0] }
  0x90   : > { %1381 = vmatpush.bf16.msrb.mxu3 %v2855_v13  ;;  %v2982_v13 = vld [vmem:[%s5081_s5 + $0x28] sm:$0xf0] }
  0x93   : > { %717 = vmatmul.bf16.gmra.mxu0 %v2603_v4  ;;  %v2710_v4 = vld [vmem:[%s5080_s4 + $0x20] sm:$0xf] }
  0x94   : > { %766 = vmatmul.bf16.gmra.mxu1 %v2607_v5  ;;  %v2958_v5 = vld [vmem:[%s5080_s4 + $0x28] sm:$0xf0]  ;;  %1382 = vmatpush.bf16.msrb.mxu3 %v2843_v29 }
  0x95   : > { %v2711_v7 = vor.u32 %v2958_v5, %v2710_v4  ;;  %v787_v4 = vld [vmem:[%s3777_s24 + $0x28] sm:$0xff]  ;;  %v2989_v5 = vld [vmem:[%s5081_s5 + $0x64] sm:$0xf] }
  0x96   : > { %v2839_v8 = vor.u32 %v2989_v5, %v2836_v6  ;;  %v794_v5 = vld [vmem:[%s3777_s24 + $0x60] sm:$0xff]  ;;  %v795_v6 = vld [vmem:[%s3777_s24 + $0x68] sm:$0xff] }
  0x97   : > { %1070 = vmatpush.bf16.msrb.mxu0 %v2711_v7  ;;  %v3821_v7 = vpack.c.bf16 %v787_v4, %v786_v3  ;;  %v3892_v11 = vpack.c.bf16 %v795_v6, %v794_v5 }
  0x98   : > { %1333 = vmatpush.bf16.msrb.mxu2 %v2839_v8  ;;  %v2977_v8 = vld [vmem:[%s5081_s5 + $0x4] sm:$0xf] }
  0x9b   : > { %1071 = vmatpush.bf16.msrb.mxu0 %v2699_v19  ;;  %v788_v19 = vld [vmem:[%s3777_s24 + $0x30] sm:$0xff] }
  0x9c   : > { %v3838_v23 = vpack.c.bf16 %v789_v20, %v788_v19  ;;  %1334 = vmatpush.bf16.msrb.mxu2 %v2827_v24  ;;  %v2794_v19 = vld [vmem:[%s5081_s5 + $0x8] sm:$0xf]  ;;  %v2979_v20 = vld [vmem:[%s5081_s5 + $0x10] sm:$0xf0] }
  0x9d   : > { %v2795_v24 = vor.u32 %v2979_v20, %v2794_v19 }
  0xa3   : > { %722 = vmatmul.bf16.gmra.mxu0 %v2611_v49 }
  0xa4   : > { %771 = vmatmul.bf16.gmra.mxu1 %v2615_v50 }
  0xb3   : > { %727 = vmatmul.bf16.gmra.mxu0 %v2619_v30 }
  0xb4   : > { %776 = vmatmul.bf16.gmra.mxu1 %v2623_v31 }
  0xc0   : > { %v693_v41 = vpop.f32.mrf.mxu0 }
  0xc1   : > { %v742_v42 = vpop.f32.mrf.mxu1 }
  0xc2   : > { %v743_v48 = vadd.f32 %v742_v42, %v693_v41  ;;  %v2815_v41 = vor.u32 %v2983_v37, %v2812_v38 }
  0xc4   : > { %1289 = vmatmul.bf16.vlgmr.msrb.gmra.mxu1 %v3787_v39  ;;  %1335 = vmatpush.bf16.msrb.mxu2 %v2815_v41 }
  0xc8   : > { %v695_v46 = vpop.f32.mrf.mxu0 }
  0xc9   : > { %v744_v47 = vpop.f32.mrf.mxu1 }
  0xca   : > { %v745_v49 = vadd.f32 %v744_v47, %v695_v46  ;;  %v2831_v46 = vor.u32 %v2988_v45, %v2830_v44 }
  0xcc   : > { %v798_v50 = vpack.c.bf16 %v745_v49, %v743_v48  ;;  %1383 = vmatpush.bf16.msrb.mxu3 %v2831_v46 }
  0xce   : > { %974 = vmatmul.bf16.vlgmr.msra.gmra.mxu2 %v798_v50  ;;  %1023 = vmatmul.bf16.vlgmr.msra.gmra.mxu3 %v798_v50 }
  0xcf   : > { %1072 = vmatmul.bf16.vlgmr.msrb.gmra.mxu0 %v798_v50 }
  0xd0   : > { %v698_v57 = vpop.f32.mrf.mxu0 }
  0xd1   : > { %v747_v58 = vpop.f32.mrf.mxu1 }
  0xd2   : > { %v748_v0 = vadd.f32 %v747_v58, %v698_v57  ;;  %v3872_v57 = vpack.c.bf16 %v793_v53, %v792_v52  ;;  %v2803_v58 = vor.u32 %v2980_v54, %v2800_v56 }
  0xd4   : > { %1294 = vmatmul.bf16.gmra.mxu1 %v3804_v55  ;;  %1336 = vmatpush.bf16.msrb.mxu2 %v2803_v58 }
  0xd8   : > { %v700_v62 = vpop.f32.mrf.mxu0 }
  0xd9   : > { %v749_v63 = vpop.f32.mrf.mxu1 }
  0xda   : > { %v750_v1 = vadd.f32 %v749_v63, %v700_v62  ;;  %v2985_v62 = vld [vmem:[%s5081_s5 + $0x40] sm:$0xf0] }
  0xdb   : > { %v2819_v63 = vor.u32 %v2985_v62, %v2818_v61 }
  0xdc   : > { %v799_v2 = vpack.c.bf16 %v750_v1, %v748_v0 }
  0xdd   : > { %1384 = vmatpush.bf16.msrb.mxu3 %v2819_v63 }
  0xde   : > { %979 = vmatmul.bf16.gmra.mxu2 %v799_v2  ;;  %1028 = vmatmul.bf16.gmra.mxu3 %v799_v2 }
  0xdf   : > { %1077 = vmatmul.bf16.gmra.mxu0 %v799_v2 }
  0xe0   : > { %v703_v9 = vpop.f32.mrf.mxu0 }
  0xe1   : > { %v752_v10 = vpop.f32.mrf.mxu1 }
  0xe2   : > { %v753_v16 = vadd.f32 %v752_v10, %v703_v9  ;;  %v2788_v9 = vld [vmem:[%s5081_s5 + $0xc] sm:$0xf0]  ;;  %v2806_v10 = vld [vmem:[%s5081_s5 + $0x20] sm:$0xf] }
  0xe3   : > { %v2791_v12 = vor.u32 %v2977_v8, %v2788_v9 }
  0xe4   : > { %1299 = vmatmul.bf16.gmra.mxu1 %v3821_v7 }
  0xe5   : > { %1337 = vmatpush.bf16.msrb.mxu2 %v2791_v12 }
  0xe8   : > { %v705_v14 = vpop.f32.mrf.mxu0 }
  0xe9   : > { %v754_v15 = vpop.f32.mrf.mxu1 }
  0xea   : > { %v755_v17 = vadd.f32 %v754_v15, %v705_v14 }
  0xec   : > { %v800_v18 = vpack.c.bf16 %v755_v17, %v753_v16  ;;  %v2807_v16 = vor.u32 %v2982_v13, %v2806_v10 }
  0xee   : > { %984 = vmatmul.bf16.gmra.mxu2 %v800_v18  ;;  %1033 = vmatmul.bf16.gmra.mxu3 %v800_v18 }
  0xef   : > { %1082 = vmatmul.bf16.gmra.mxu0 %v800_v18  ;;  %1385 = vmatpush.bf16.msrb.mxu3 %v2807_v16 }
  0xf0   : > { %v708_v25 = vpop.f32.mrf.mxu0 }
  0xf1   : > { %v757_v26 = vpop.f32.mrf.mxu1 }
  0xf2   : > { %v758_v32 = vadd.f32 %v757_v26, %v708_v25  ;;  %v796_v26 = vld [vmem:[%s3777_s24 + $0x70] sm:$0xff] }
  0xf3   : > { %1386 = vmatpush.bf16.msrb.mxu3 %v2795_v24  ;;  %v3906_v28 = vpack.c.bf16 %v797_v27, %v796_v26 }
  0xf4   : > { %1304 = vmatmul.bf16.gmra.mxu1 %v3838_v23 }
  0xf8   : > { %v710_v30 = vpop.f32.mrf.mxu0 }
  0xf9   : > { %v759_v31 = vpop.f32.mrf.mxu1 }
  0xfa   : > { %v760_v33 = vadd.f32 %v759_v31, %v710_v30 }
  0xfc   : > { %v801_v34 = vpack.c.bf16 %v760_v33, %v758_v32 }
  0xfe   : > { %989 = vmatmul.bf16.gmra.mxu2 %v801_v34  ;;  %1038 = vmatmul.bf16.gmra.mxu3 %v801_v34 }
  0xff   : > { %1087 = vmatmul.bf16.gmra.mxu0 %v801_v34 }
 0x100   : > { %v713_v42 = vpop.f32.mrf.mxu0 }
 0x101   : > { %v762_v43 = vpop.f32.mrf.mxu1 }
 0x102   : > { %v763_v49 = vadd.f32 %v762_v43, %v713_v42 }
 0x104   : > { %1309 = vmatmul.bf16.gmra.mxu1 %v3855_v40 }
 0x108   : > { %v715_v47 = vpop.f32.mrf.mxu0 }
 0x109   : > { %v764_v48 = vpop.f32.mrf.mxu1 }
 0x10a   : > { %v765_v50 = vadd.f32 %v764_v48, %v715_v47 }
 0x10c   : > { %v802_v51 = vpack.c.bf16 %v765_v50, %v763_v49 }
 0x10e   : > { %994 = vmatmul.bf16.gmra.mxu2 %v802_v51  ;;  %1043 = vmatmul.bf16.gmra.mxu3 %v802_v51 }
 0x10f   : > { %1092 = vmatmul.bf16.gmra.mxu0 %v802_v51 }
 0x110   : > { %v718_v59 = vpop.f32.mrf.mxu0 }
 0x111   : > { %v767_v60 = vpop.f32.mrf.mxu1 }
 0x112   : > { %v768_v2 = vadd.f32 %v767_v60, %v718_v59 }
 0x114   : > { %1314 = vmatmul.bf16.gmra.mxu1 %v3872_v57 }
 0x118   : > { %v720_v0 = vpop.f32.mrf.mxu0 }
 0x119   : > { %v769_v1 = vpop.f32.mrf.mxu1 }
 0x11a   : > { %v770_v3 = vadd.f32 %v769_v1, %v720_v0 }
 0x11c   : > { %v803_v4 = vpack.c.bf16 %v770_v3, %v768_v2 }
 0x11e   : > { %999 = vmatmul.bf16.gmra.mxu2 %v803_v4  ;;  %1048 = vmatmul.bf16.gmra.mxu3 %v803_v4 }
 0x11f   : > { %1097 = vmatmul.bf16.gmra.mxu0 %v803_v4 }
 0x120   : > { %v723_v14 = vpop.f32.mrf.mxu0 }
 0x121   : > { %v772_v15 = vpop.f32.mrf.mxu1 }
 0x122   : > { %v773_v21 = vadd.f32 %v772_v15, %v723_v14 }
 0x124   : > { %1319 = vmatmul.bf16.gmra.mxu1 %v3892_v11 }
 0x128   : > { %v725_v17 = vpop.f32.mrf.mxu0 }
 0x129   : > { %v774_v18 = vpop.f32.mrf.mxu1 }
 0x12a   : > { %v775_v22 = vadd.f32 %v774_v18, %v725_v17 }
 0x12c   : > { %v804_v25 = vpack.c.bf16 %v775_v22, %v773_v21 }
 0x12e   : > { %1004 = vmatmul.bf16.gmra.mxu2 %v804_v25  ;;  %1053 = vmatmul.bf16.gmra.mxu3 %v804_v25 }
 0x12f   : > { %1102 = vmatmul.bf16.gmra.mxu0 %v804_v25 }
 0x130   : > { %v728_v29 = vpop.f32.mrf.mxu0 }
 0x131   : > { %v777_v30 = vpop.f32.mrf.mxu1 }
 0x132   : > { %v778_v33 = vadd.f32 %v777_v30, %v728_v29 }
 0x134   : > { %1324 = vmatmul.bf16.gmra.mxu1 %v3906_v28 }
 0x138   : > { %v730_v31 = vpop.f32.mrf.mxu0 }
 0x139   : > { %v779_v32 = vpop.f32.mrf.mxu1 }
 0x13a   : > { %v780_v34 = vadd.f32 %v779_v32, %v730_v31 }
 0x13c   : > { %v805_v35 = vpack.c.bf16 %v780_v34, %v778_v33 }
 0x13e   : > { %1009 = vmatmul.bf16.gmra.mxu2 %v805_v35  ;;  %1058 = vmatmul.bf16.gmra.mxu3 %v805_v35 }
 0x13f   : > { %1107 = vmatmul.bf16.gmra.mxu0 %v805_v35 }
 0x141   : > { %v1290_v42 = vpop.f32.mrf.mxu1 }
 0x14c   : > { %v3919_v45 = vpop.f32.mrf.mxu0 }
 0x14e   : > { %1338 = vmatmul.bf16.vlgmr.msrb.gmra.mxu2 %v3787_v39  ;;  %1387 = vmatmul.bf16.vlgmr.msrb.gmra.mxu3 %v3787_v39  ;;  %v1292_v39 = vpop.f32.mrf.mxu1 }
 0x151   : > { %v975_v36 = vpop.f32.mrf.mxu2  ;;  %v3911_v37 = vpop.f32.mrf.mxu3 }
 0x152   : > { %v1428_v2 = vadd.f32 %v1290_v42, %v975_v36 }
 0x154   : > { %v3927_v50 = vpop.f32.mrf.mxu0 }
 0x159   : > { %v977_v38 = vpop.f32.mrf.mxu2  ;;  %v3913_v41 = vpop.f32.mrf.mxu3 }
 0x15a   : > { %v1430_v4 = vadd.f32 %v1292_v39, %v977_v38 }
 0x15c   : > { %v3931_v53 = vpop.f32.mrf.mxu0 }
 0x15e   : > { %1343 = vmatmul.bf16.gmra.mxu2 %v3804_v55  ;;  %1392 = vmatmul.bf16.gmra.mxu3 %v3804_v55  ;;  %v1295_v55 = vpop.f32.mrf.mxu1 }
 0x161   : > { %v980_v43 = vpop.f32.mrf.mxu2  ;;  %v3917_v44 = vpop.f32.mrf.mxu3 }
 0x162   : > { %v1432_v5 = vadd.f32 %v1295_v55, %v980_v43 }
 0x166   : > { %v1297_v54 = vpop.f32.mrf.mxu1 }
 0x169   : > { %v982_v46 = vpop.f32.mrf.mxu2  ;;  %v3921_v47 = vpop.f32.mrf.mxu3 }
 0x16a   : > { %v1434_v16 = vadd.f32 %v1297_v54, %v982_v46 }
 0x16e   : > { %1348 = vmatmul.bf16.gmra.mxu2 %v3821_v7  ;;  %1397 = vmatmul.bf16.gmra.mxu3 %v3821_v7  ;;  %v3937_v7 = vpop.f32.mrf.mxu0  ;;  %v1300_v59 = vpop.f32.mrf.mxu1 }
 0x171   : > { %v985_v48 = vpop.f32.mrf.mxu2  ;;  %v3925_v49 = vpop.f32.mrf.mxu3 }
 0x172   : > { %v1436_v24 = vadd.f32 %v1300_v59, %v985_v48 }
 0x176   : > { %v3943_v62 = vpop.f32.mrf.mxu0  ;;  %v1302_v1 = vpop.f32.mrf.mxu1 }
 0x179   : > { %v987_v51 = vpop.f32.mrf.mxu2  ;;  %v3929_v52 = vpop.f32.mrf.mxu3 }
 0x17a   : > { %v1438_v27 = vadd.f32 %v1302_v1, %v987_v51 }
 0x17e   : > { %1353 = vmatmul.bf16.gmra.mxu2 %v3838_v23  ;;  %1402 = vmatmul.bf16.gmra.mxu3 %v3838_v23  ;;  %v3952_v23 = vld [vmem:[%s5063_s6] sm:$0x3]  ;;  %v3963_v10 = vpop.f32.mrf.mxu0  ;;  %v1305_v13 = vpop.f32.mrf.mxu1 }
 0x17f   : > { %v3955_v3 = vperm.slane %v3952_v23, 0 }
 0x181   : > { %v990_v56 = vpop.f32.mrf.mxu2  ;;  %v3935_v58 = vpop.f32.mrf.mxu3  ;;  %v1468_v9 = vadd.f32 %v3955_v3, %v1430_v4  ;;  %v1470_v12 = vadd.f32 %v3955_v3, %v1432_v5  ;;  %v1472_v20 = vadd.f32 %v3955_v3, %v1434_v16  ;;  %v1474_v33 = vadd.f32 %v3955_v3, %v1436_v24 }
 0x182   : > { %v1476_v35 = vadd.f32 %v3955_v3, %v1438_v27  ;;  %v1440_v36 = vadd.f32 %v1305_v13, %v990_v56 }
 0x183   : > { %v2882_v15 = vmul.f32 -1.442695, %v1468_v9  ;;  %v2884_v17 = vmul.f32 -1.442695, %v1470_v12  ;;  %v2886_v22 = vmul.f32 -1.442695, %v1472_v20 }
 0x184   : > { %v2888_v42 = vmul.f32 -1.442695, %v1474_v33  ;;  %v2890_v46 = vmul.f32 -1.442695, %v1476_v35  ;;  %v1478_v55 = vadd.f32 %v3955_v3, %v1440_v36 }
 0x186   : > { %v3973_v21 = vpop.f32.mrf.mxu0  ;;  %v1307_v25 = vpop.f32.mrf.mxu1 }
 0x189   : > { %v992_v60 = vpop.f32.mrf.mxu2  ;;  %v3939_v61 = vpop.f32.mrf.mxu3 }
 0x18a   : > { %v1442_v39 = vadd.f32 %v1307_v25, %v992_v60 }
 0x18e   : > { %1358 = vmatmul.bf16.gmra.mxu2 %v3855_v40  ;;  %1407 = vmatmul.bf16.gmra.mxu3 %v3855_v40  ;;  %v1466_v40 = vadd.f32 %v3955_v3, %v1428_v2  ;;  %v3988_v43 = vpop.f32.mrf.mxu0  ;;  %v1310_v51 = vpop.f32.mrf.mxu1  ;;  %v2892_v2 = vmul.f32 -1.442695, %v1478_v55 }
 0x190   : > { %v2880_v14 = vmul.f32 -1.442695, %v1466_v40 }
 0x191   : > { %v3945_v63 = vpop.f32.mrf.mxu2  ;;  %v3947_v0 = vpop.f32.mrf.mxu3 }
 0x192   : > { %3100 = vpow2.f32 %v2880_v14  ;;  %v1444_v4 = vadd.f32 %v1310_v51, %v3945_v63 }
 0x193   : > { %3102 = vpow2.f32 %v2882_v15 }
 0x194   : > { %3104 = vpow2.f32 %v2884_v17  ;;  %v1482_v16 = vadd.f32 %v3955_v3, %v1444_v4 }
 0x195   : > { %3106 = vpow2.f32 %v2886_v22  ;;  %v4024_v22 = vld [vmem:[%s5064_s7] ss:$0 sm:$0xff] }
 0x196   : > { %v4012_v13 = vpop.f32.mrf.mxu0  ;;  %v1312_v20 = vpop.f32.mrf.mxu1  ;;  %v2896_v33 = vmul.f32 -1.442695, %v1482_v16  ;;  %v4057_v4 = vadd.f32 %v4024_v22, %v3927_v50 }
 0x198   : > { %v3101_v26 = vpop.eup %3100 }
 0x199   : > { %v3958_v6 = vpop.f32.mrf.mxu2  ;;  %v3960_v8 = vpop.f32.mrf.mxu3  ;;  %v3979_v32 = vadd.f32 1.0, %v3101_v26 }
 0x19a   : > { %v3103_v29 = vpop.eup %3102  ;;  %v1446_v35 = vadd.f32 %v1312_v20, %v3958_v6  ;;  %v4149_v20 = vadd.f32 %v4024_v22, %v3963_v10 }
 0x19b   : > { %v3105_v31 = vpop.eup %3104  ;;  %v3982_v34 = vadd.f32 1.0, %v3103_v29  ;;  %3108 = vrcp.f32 %v3979_v32  ;;  %vm1631_vm0 = vweird.f32 %v3979_v32 }
 0x19c   : > { %v3985_v38 = vadd.f32 1.0, %v3105_v31  ;;  %v3107_v48 = vpop.eup %3106 }
 0x19d   : > { %3110 = vrcp.f32 %v3982_v34  ;;  %v3999_v59 = vadd.f32 1.0, %v3107_v48  ;;  %v1667_v16 = vand.u32 2147483648, %v3982_v34  ;;  %vm1661_vm5 = vweird.f32 %v3982_v34 }
 0x19e   : > { %1363 = vmatmul.bf16.gmra.mxu2 %v3872_v57  ;;  %1412 = vmatmul.bf16.gmra.mxu3 %v3872_v57  ;;  %3112 = vrcp.f32 %v3985_v38  ;;  %vm1691_vm9 = vweird.f32 %v3985_v38 }
 0x19f   : > { %3114 = vpow2.f32 %v2888_v42  ;;  %v4039_v42 = vadd.f32 %v4024_v22, %v3919_v45  ;;  %vm1721_vm13 = vweird.f32 %v3999_v59 }
 0x1a0   : > { %3116 = vpow2.f32 %v2890_v46 }
 0x1a1   : > { %v3968_v18 = vpop.f32.mrf.mxu2  ;;  %v3970_v19 = vpop.f32.mrf.mxu3  ;;  %3118 = vrcp.f32 %v3999_v59 }
 0x1a2   : > { %v4002_v1 = vpop.eup %3108  ;;  %3120 = vpow2.f32 %v2892_v2 }
 0x1a3   : > { %v4004_v60 = vpop.eup %3110  ;;  %v1627_v9 = vmul.f32 %v4002_v1, %v3979_v32  ;;  %vm1632_vm1 = vweird.f32 %v4002_v1 }
 0x1a4   : > { %v4007_v5 = vpop.eup %3112  ;;  %v1657_v14 = vmul.f32 %v4004_v60, %v3982_v34  ;;  %vm1662_vm3 = vweird.f32 %v4004_v60  ;;  %vm4089_vm4 = vmor %vm1631_vm0, %vm1632_vm1 }
 0x1a5   : > { %v3115_v12 = vpop.eup %3114  ;;  %v1628_v25 = vsub.f32 1.0, %v1627_v9  ;;  %v1687_v29 = vmul.f32 %v4007_v5, %v3985_v38  ;;  %v4063_v9 = vpop.f32.mrf.mxu0  ;;  %vm4106_vm7 = vmor %vm1661_vm5, %vm1662_vm3  ;;  %vm1692_vm8 = vweird.f32 %v4007_v5 }
 0x1a6   : > { %v3117_v15 = vpop.eup %3116  ;;  %v4026_v24 = vadd.f32 1.0, %v3115_v12  ;;  %v1658_v27 = vsub.f32 1.0, %v1657_v14  ;;  %v1637_v12 = vand.u32 2147483648, %v3979_v32  ;;  %v1665_v14 = vand.u32 2147483647, %v3982_v34  ;;  %vm4137_vm10 = vmor %vm1691_vm9, %vm1692_vm8 }
 0x1a7   : > { %v4028_v26 = vadd.f32 1.0, %v3117_v15  ;;  %v4032_v31 = vpop.eup %3118  ;;  %v1629_v46 = vmul.f32 %v4002_v1, %v1628_v25  ;;  %v1688_v6 = vsub.f32 1.0, %v1687_v29 }
 0x1a8   : > { %v3121_v36 = vpop.eup %3120  ;;  %v1659_v48 = vmul.f32 %v4004_v60, %v1658_v27  ;;  %v1717_v2 = vmul.f32 %v4032_v31, %v3999_v59  ;;  %vm4094_vm6 = vcmp.eq.f32.partialorder %v1665_v14, 8.507059e+37  ;;  %vm1722_vm12 = vweird.f32 %v4032_v31 }
 0x1a9   : > { %v3975_v30 = vpop.f32.mrf.mxu2  ;;  %v3977_v57 = vpop.f32.mrf.mxu3  ;;  %v4046_v51 = vadd.f32 1.0, %v3121_v36  ;;  %v1630_v15 = vadd.f32 %v4002_v1, %v1629_v46  ;;  %v1638_v46 = vor.u32 1.1754944e-38, %v1637_v12  ;;  %vm4186_vm15 = vmor %vm1721_vm13, %vm1722_vm12  ;;  %vm1751_vm0 = vweird.f32 %v4026_v24 }
 0x1aa   : > { %5083 = vst [vmem:[#allocation9_spill] sm:$0xff] %v3977_v57  ;;  %v1718_v29 = vsub.f32 1.0, %v1717_v2  ;;  %vm1781_vm3 = vweird.f32 %v4028_v26 }
 0x1ab   : > { %vm1811_vm9 = vweird.f32 %v4046_v51 }
 0x1ae   : > { %1368 = vmatmul.bf16.gmra.mxu2 %v3892_v11  ;;  %1417 = vmatmul.bf16.gmra.mxu3 %v3892_v11  ;;  %v1480_v11 = vadd.f32 %v3955_v3, %v1442_v39  ;;  %v1635_v39 = vand.u32 2147483647, %v3979_v32  ;;  %v1660_v32 = vadd.f32 %v4004_v60, %v1659_v48  ;;  %v1634_v48 = vsel %vm4089_vm4, %v4002_v1, %v1630_v15 }
 0x1b0   : > { %v2894_v40 = vmul.f32 -1.442695, %v1480_v11  ;;  %vm4073_vm2 = vcmp.eq.f32.partialorder %v1635_v39, 8.507059e+37  ;;  %v1664_v15 = vsel %vm4106_vm7, %v4004_v60, %v1660_v32  ;;  %v1755_v39 = vand.u32 2147483647, %v4026_v24 }
 0x1b1   : > { %v3995_v54 = vpop.f32.mrf.mxu2  ;;  %v3997_v56 = vpop.f32.mrf.mxu3 }
 0x1b2   : > { %5084 = vst [vmem:[#allocation10_spill] sm:$0xff] %v3997_v56  ;;  %3122 = vpow2.f32 %v2894_v40  ;;  %v4061_v40 = vadd.f32 %v4024_v22, %v3931_v53  ;;  %v1689_v53 = vmul.f32 %v4007_v5, %v1688_v6  ;;  %vm4203_vm1 = vcmp.eq.f32.partialorder %v1755_v39, 8.507059e+37 }
 0x1b3   : > { %3124 = vrcp.f32 %v4026_v24 }
 0x1b4   : > { %3126 = vrcp.f32 %v4028_v26  ;;  %v1690_v2 = vadd.f32 %v4007_v5, %v1689_v53  ;;  %v4126_v53 = vadd.f32 %v4024_v22, %v3943_v62 }
 0x1b5   : > { %3128 = vpow2.f32 %v2896_v33 }
 0x1b6   : > { %3130 = vrcp.f32 %v4046_v51 }
 0x1b8   : > { %v3123_v55 = vpop.eup %3122 }
 0x1b9   : > { %v4017_v17 = vpop.f32.mrf.mxu2  ;;  %v4019_v63 = vpop.f32.mrf.mxu3  ;;  %v4071_v50 = vadd.f32 1.0, %v3123_v55  ;;  %v1668_v55 = vor.u32 1.1754944e-38, %v1667_v16  ;;  %v1719_v16 = vmul.f32 %v4032_v31, %v1718_v29  ;;  %v1725_v29 = vand.u32 2147483647, %v3999_v59 }
 0x1ba   : > { %5085 = vst [vmem:[#allocation11_spill] sm:$0xff] %v4019_v63  ;;  %v4079_v25 = vpop.eup %3124  ;;  %v4132_v63 = vsel %vm4073_vm2, %v1638_v46, %v1634_v48  ;;  %v1694_v48 = vsel %vm4137_vm10, %v4007_v5, %v1690_v2 }
 0x1bb   : > { %v4083_v33 = vpop.eup %3126  ;;  %3132 = vrcp.f32 %v4071_v50  ;;  %v1747_v1 = vmul.f32 %v4079_v25, %v4026_v24  ;;  %v4155_v46 = vsel %vm4094_vm6, %v1668_v55, %v1664_v15  ;;  %vm4174_vm14 = vcmp.eq.f32.partialorder %v1725_v29, 8.507059e+37 }
 0x1bc   : > { %v3129_v6 = vpop.eup %3128  ;;  %v1777_v36 = vmul.f32 %v4083_v33, %v4028_v26  ;;  %v1757_v15 = vand.u32 2147483648, %v4026_v24  ;;  %vm1752_vm2 = vweird.f32 %v4079_v25  ;;  %vm1782_vm4 = vweird.f32 %v4083_v33 }
 0x1bd   : > { %v4135_v34 = vpop.eup %3130  ;;  %vm4242_vm6 = vmor %vm1751_vm0, %vm1752_vm2  ;;  %vm1841_vm12 = vweird.f32 %v4071_v50 }
 0x1be   : > { %1373 = vmatmul.bf16.gmra.mxu2 %v3906_v28  ;;  %1422 = vmatmul.bf16.gmra.mxu3 %v3906_v28  ;;  %v1484_v28 = vadd.f32 %v3955_v3, %v1446_v35  ;;  %v4087_v35 = vadd.f32 %v4024_v22, %v3937_v7  ;;  %v1695_v7 = vand.u32 2147483647, %v3985_v38  ;;  %v1778_v56 = vsub.f32 1.0, %v1777_v36  ;;  %vm4257_vm7 = vmor %vm1781_vm3, %vm1782_vm4 }
 0x1bf   : > { %v1807_v55 = vmul.f32 %v4135_v34, %v4046_v51  ;;  %v4211_v36 = vadd.f32 %v4024_v22, %v3988_v43  ;;  %vm1812_vm8 = vweird.f32 %v4135_v34 }
 0x1c0   : > { %v2898_v27 = vmul.f32 -1.442695, %v1484_v28  ;;  %v1697_v28 = vand.u32 2147483648, %v3985_v38  ;;  %vm4141_vm11 = vcmp.eq.f32.partialorder %v1695_v7, 8.507059e+37  ;;  %v4151_v38 = vpop.f32.mrf.mxu0  ;;  %v1748_v7 = vsub.f32 1.0, %v1747_v1 }
 0x1c1   : > { %v4049_v11 = vpop.f32.mrf.mxu2  ;;  %v4051_v45 = vpop.f32.mrf.mxu3  ;;  %v1779_v32 = vmul.f32 %v4083_v33, %v1778_v56  ;;  %v1758_v56 = vor.u32 1.1754944e-38, %v1757_v15 }
 0x1c2   : > { %5086 = vst [vmem:[#allocation12_spill] sm:$0xff] %v4051_v45  ;;  %3134 = vpow2.f32 %v2898_v27  ;;  %v4128_v45 = vadd.f32 1.0, %v3129_v6  ;;  %v1315_v27 = vpop.f32.mrf.mxu1  ;;  %v1698_v62 = vor.u32 1.1754944e-38, %v1697_v28  ;;  %v1727_v6 = vand.u32 2147483648, %v3999_v59  ;;  %v4163_v10 = vpop.eup %3132 }
 0x1c3   : > { %v1448_v28 = vadd.f32 %v1315_v27, %v3968_v18  ;;  %v4172_v18 = vadd.f32 %v4024_v22, %v3973_v21  ;;  %v1749_v21 = vmul.f32 %v4079_v25, %v1748_v7  ;;  %v1837_v57 = vmul.f32 %v4163_v10, %v4071_v50 }
 0x1c4   : > { %3136 = vrcp.f32 %v4128_v45  ;;  %v1728_v1 = vor.u32 1.1754944e-38, %v1727_v6  ;;  %v4184_v59 = vsel %vm4141_vm11, %v1698_v62, %v1694_v48  ;;  %v1785_v62 = vand.u32 2147483647, %v4028_v26  ;;  %vm4299_vm11 = vmor %vm1811_vm9, %vm1812_vm8 }
 0x1c5   : > { %v1486_v27 = vadd.f32 %v3955_v3, %v1448_v28  ;;  %v1808_v28 = vsub.f32 1.0, %v1807_v55  ;;  %v1750_v55 = vadd.f32 %v4079_v25, %v1749_v21  ;;  %v1838_v21 = vsub.f32 1.0, %v1837_v57 }
 0x1c6   : > { %vm4226_vm5 = vcmp.eq.f32.partialorder %v1785_v62, 8.507059e+37  ;;  %v1815_v62 = vand.u32 2147483647, %v4046_v51  ;;  %vm1871_vm0 = vweird.f32 %v4128_v45 }
 0x1c8   : > { %v3135_v5 = vpop.eup %3134  ;;  %vm4278_vm10 = vcmp.eq.f32.partialorder %v1815_v62, 8.507059e+37 }
 0x1c9   : > { %v4114_v12 = vpop.f32.mrf.mxu2  ;;  %v4116_v14 = vpop.f32.mrf.mxu3  ;;  %v4200_v6 = vadd.f32 1.0, %v3135_v5  ;;  %v2900_v5 = vmul.f32 -1.442695, %v1486_v27  ;;  %v4236_v27 = vadd.f32 %v4024_v22, %v4012_v13  ;;  %v1754_v13 = vsel %vm4242_vm6, %v4079_v25, %v1750_v55 }
 0x1ca   : > { %5095 = vst [vmem:[#allocation13_spill] sm:$0xff] %v4116_v14  ;;  %v1720_v14 = vadd.f32 %v4032_v31, %v1719_v16  ;;  %v4180_v16 = vperm.slane %v3952_v23, 1  ;;  %v1317_v43 = vpop.f32.mrf.mxu1  ;;  %v1845_v25 = vand.u32 2147483647, %v4071_v50  ;;  %v1847_v55 = vand.u32 2147483648, %v4071_v50 }
 0x1cb   : > { %3138 = vrcp.f32 %v4200_v6  ;;  %5108 = vst [vmem:[#allocation14_spill] sm:$0xff] %v4236_v27  ;;  %v1450_v57 = vadd.f32 %v1317_v43, %v3975_v30  ;;  %vm1901_vm3 = vweird.f32 %v4200_v6 }
 0x1cc   : > { %v1724_v23 = vsel %vm4186_vm15, %v4032_v31, %v1720_v14  ;;  %v1787_v31 = vand.u32 2147483648, %v4028_v26  ;;  %v4215_v14 = vpop.eup %3136  ;;  %vm4304_vm13 = vcmp.eq.f32.partialorder %v1845_v25, 8.507059e+37  ;;  %v1875_v25 = vand.u32 2147483647, %v4128_v45 }
 0x1cd   : > { %v4220_v39 = vsel %vm4174_vm14, %v1728_v1, %v1724_v23  ;;  %v1809_v1 = vmul.f32 %v4135_v34, %v1808_v28  ;;  %v1817_v28 = vand.u32 2147483648, %v4046_v51  ;;  %v4293_v51 = vld [vmem:[%s5065_s8] ss:$0 sm:$0xff]  ;;  %vm1842_vm14 = vweird.f32 %v4163_v10 }
 0x1ce   : > { %vm4337_vm15 = vmor %vm1841_vm12, %vm1842_vm14  ;;  %vm4351_vm2 = vcmp.eq.f32.partialorder %v1875_v25, 8.507059e+37 }
 0x1cf   : > { %v1810_v43 = vadd.f32 %v4135_v34, %v1809_v1  ;;  %v1488_v1 = vadd.f32 %v3955_v3, %v1450_v57  ;;  %v1818_v7 = vor.u32 1.1754944e-38, %v1817_v28 }
 0x1d1   : > { %v1339_v60 = vpop.f32.mrf.mxu2  ;;  %v4193_v29 = vpop.f32.mrf.mxu3  ;;  %v1814_v24 = vsel %vm4299_vm11, %v4135_v34, %v1810_v43  ;;  %v2902_v34 = vmul.f32 -1.442695, %v1488_v1 }
 0x1d2   : > { %v1429_v48 = vadd.f32 %v1339_v60, %v3911_v37  ;;  %v1780_v60 = vadd.f32 %v4083_v33, %v1779_v32  ;;  %v1788_v32 = vor.u32 1.1754944e-38, %v1787_v31  ;;  %v4282_v23 = vpop.eup %3138  ;;  %v1320_v28 = vpop.f32.mrf.mxu1 }
 0x1d4   : > { %v1467_v37 = vadd.f32 %v4180_v16, %v1429_v48  ;;  %v4231_v48 = vpop.f32.mrf.mxu0  ;;  %v1784_v30 = vsel %vm4257_vm7, %v4083_v33, %v1780_v60 }
 0x1d6   : > { %v2881_v2 = vmul.f32 -1.442695, %v1467_v37  ;;  %v1867_v37 = vmul.f32 %v4215_v14, %v4128_v45 }
 0x1d8   : > { %3140 = vpow2.f32 %v2881_v2  ;;  %v1839_v2 = vmul.f32 %v4163_v10, %v1838_v21  ;;  %v1868_v60 = vsub.f32 1.0, %v1867_v37  ;;  %v1848_v37 = vor.u32 1.1754944e-38, %v1847_v55 }
 0x1d9   : > { %3142 = vpow2.f32 %v2900_v5  ;;  %v1341_v31 = vpop.f32.mrf.mxu2  ;;  %v4262_v27 = vpop.f32.mrf.mxu3  ;;  %v4275_v5 = vsel %vm4203_vm1, %v1758_v56, %v1754_v13  ;;  %v4297_v56 = vsel %vm4226_vm5, %v1788_v32, %v1784_v30  ;;  %v1897_v55 = vmul.f32 %v4282_v23, %v4200_v6 }
 0x1da   : > { %v1431_v26 = vadd.f32 %v1341_v31, %v3913_v41  ;;  %v4286_v41 = vadd.f32 %v4024_v22, %v4063_v9  ;;  %v1840_v15 = vadd.f32 %v4163_v10, %v1839_v2  ;;  %v1869_v30 = vmul.f32 %v4215_v14, %v1868_v60 }
 0x1db   : > { %v1877_v2 = vand.u32 2147483648, %v4128_v45  ;;  %vm1872_vm1 = vweird.f32 %v4215_v14  ;;  %vm1902_vm5 = vweird.f32 %v4282_v23 }
 0x1dc   : > { %v1469_v21 = vadd.f32 %v4180_v16, %v1431_v26  ;;  %v4321_v26 = vadd.f32 %v4024_v22, %v4151_v38  ;;  %v1103_v43 = vpop.f32.mrf.mxu0  ;;  %v1844_v33 = vsel %vm4337_vm15, %v4163_v10, %v1840_v15  ;;  %vm4373_vm4 = vmor %vm1871_vm0, %vm1872_vm1 }
 0x1dd   : > { %v4364_v15 = vsel %vm4304_vm13, %v1848_v37, %v1844_v33  ;;  %vm4427_vm9 = vmor %vm1901_vm3, %vm1902_vm5 }
 0x1de   : > { %v3141_v57 = vpop.eup %3140  ;;  %v2883_v13 = vmul.f32 -1.442695, %v1469_v21  ;;  %5119 = vst [vmem:[#allocation15_spill] sm:$0xff] %v4321_v26  ;;  %v2130_v21 = vadd.f32 %v4293_v51, %v4193_v29  ;;  %v1452_v29 = vadd.f32 %v1320_v28, %v3995_v54  ;;  %v1878_v26 = vor.u32 1.1754944e-38, %v1877_v2 }
 0x1df   : > { %v3143_v32 = vpop.eup %3142  ;;  %v4313_v31 = vadd.f32 1.0, %v3141_v57  ;;  %v4331_v57 = vsel %vm4278_vm10, %v1818_v7, %v1814_v24  ;;  %v1870_v7 = vadd.f32 %v4215_v14, %v1869_v30  ;;  %v1898_v24 = vsub.f32 1.0, %v1897_v55 }
 0x1e0   : > { %3144 = vpow2.f32 %v2883_v13  ;;  %v4342_v1 = vadd.f32 1.0, %v3143_v32  ;;  %v1907_v54 = vand.u32 2147483648, %v4200_v6  ;;  %v2146_v10 = vmul.f32 %v2130_v21, %v4132_v63 }
 0x1e1   : > { %3146 = vrcp.f32 %v4313_v31  ;;  %v1344_v60 = vpop.f32.mrf.mxu2  ;;  %v4327_v62 = vpop.f32.mrf.mxu3  ;;  %v1490_v30 = vadd.f32 %v3955_v3, %v1452_v29  ;;  %v1905_v63 = vand.u32 2147483647, %v4200_v6  ;;  %v1874_v55 = vsel %vm4373_vm4, %v4215_v14, %v1870_v7 }
 0x1e2   : > { %v1433_v13 = vadd.f32 %v1344_v60, %v3917_v44  ;;  %3148 = vpow2.f32 %v2902_v34  ;;  %v4359_v44 = vadd.f32 %v4024_v22, %v4231_v48  ;;  %v1899_v34 = vmul.f32 %v4282_v23, %v1898_v24 }
 0x1e3   : > { %3150 = vrcp.f32 %v4342_v1  ;;  %v1937_v2 = vand.u32 2147483648, %v4342_v1  ;;  %v4386_v21 = vadd.f32 %v4024_v22, %v1103_v43  ;;  %v4389_v60 = vor.u32 1.1754944e-38, %v1907_v54 }
 0x1e4   : > { %v1471_v32 = vadd.f32 %v4180_v16, %v1433_v13  ;;  %v2162_v38 = vadd.f32 %v2146_v10, %v4039_v42  ;;  %v2131_v29 = vadd.f32 %v4293_v51, %v4262_v27  ;;  %v2904_v43 = vmul.f32 -1.442695, %v1490_v30  ;;  %v1105_v7 = vpop.f32.mrf.mxu0 }
 0x1e5   : > { %v4401_v54 = vsel %vm4351_vm2, %v1878_v26, %v1874_v55  ;;  %v1652_v42 = vand.u32 2147483648, %v4313_v31  ;;  %v1900_v10 = vadd.f32 %v4282_v23, %v1899_v34  ;;  %v1935_v27 = vand.u32 2147483647, %v4342_v1 }
 0x1e6   : > { %v3145_v28 = vpop.eup %3144  ;;  %v2885_v25 = vmul.f32 -1.442695, %v1471_v32  ;;  %v1650_v30 = vand.u32 2147483647, %v4313_v31  ;;  %vm4412_vm7 = vcmp.eq.f32.partialorder %v1905_v63, 8.507059e+37  ;;  %v4419_v55 = vadd.f32 %v4024_v22, %v1105_v7  ;;  %v1322_v22 = vpop.f32.mrf.mxu1 }
 0x1e7   : > { %v3147_v9 = vpop.eup %3146  ;;  %v4378_v37 = vadd.f32 1.0, %v3145_v28  ;;  %v4406_v28 = vor.u32 1.1754944e-38, %v1937_v2  ;;  %v2147_v34 = vmul.f32 %v2131_v29, %v4155_v46  ;;  %vm1646_vm8 = vweird.f32 %v4313_v31 }
 0x1e8   : > { %v1642_v45 = vmul.f32 %v3147_v9, %v4313_v31  ;;  %3152 = vpow2.f32 %v2885_v25  ;;  %v3149_v33 = vpop.eup %3148  ;;  %vm1647_vm6 = vweird.f32 %v3147_v9  ;;  %v1904_v31 = vsel %vm4427_vm9, %v4282_v23, %v1900_v10 }
 0x1e9   : > { %3154 = vrcp.f32 %v4378_v37  ;;  %v1346_v14 = vpop.f32.mrf.mxu2  ;;  %v4395_v13 = vpop.f32.mrf.mxu3  ;;  %v4416_v50 = vadd.f32 1.0, %v3149_v33  ;;  %vm1648_vm10 = vmor %vm1646_vm8, %vm1647_vm6  ;;  %vm1651_vm11 = vcmp.eq.f32.partialorder %v1650_v30, 8.507059e+37  ;;  %v1454_v23 = vadd.f32 %v1322_v22, %v4017_v17  ;;  %v2306_v22 = vld [vmem:[%s4456_s15] sm:$0xff] }
 0x1ea   : > { %v1643_v24 = vsub.f32 1.0, %v1642_v45  ;;  %v1435_v32 = vadd.f32 %v1346_v14, %v3921_v47  ;;  %v4408_v25 = vpop.eup %3150  ;;  %3156 = vtanh.f32 %v2162_v38  ;;  %v1653_v38 = vor.u32 1.1754944e-38, %v1652_v42 }
 0x1eb   : > { %3158 = vpow2.f32 %v2904_v43  ;;  %v1927_v6 = vmul.f32 %v4408_v25, %v4342_v1  ;;  %v1680_v30 = vand.u32 2147483647, %v4378_v37  ;;  %vm1676_vm13 = vweird.f32 %v4378_v37 }
 0x1ec   : > { %v1644_v48 = vmul.f32 %v3147_v9, %v1643_v24  ;;  %v1473_v47 = vadd.f32 %v4180_v16, %v1435_v32  ;;  %v2163_v24 = vadd.f32 %v2147_v34, %v4057_v4  ;;  %v2132_v32 = vadd.f32 %v4293_v51, %v4327_v62 }
 0x1ed   : > { %v1682_v62 = vand.u32 2147483648, %v4378_v37  ;;  %v1928_v34 = vsub.f32 1.0, %v1927_v6  ;;  %vm1681_vm15 = vcmp.eq.f32.partialorder %v1680_v30, 8.507059e+37  ;;  %vm1932_vm0 = vweird.f32 %v4408_v25 }
 0x1ee   : > { %v3153_v2 = vpop.eup %3152  ;;  %v1645_v45 = vadd.f32 %v3147_v9, %v1644_v48  ;;  %v2887_v14 = vmul.f32 -1.442695, %v1473_v47  ;;  %vm1931_vm2 = vweird.f32 %v4342_v1  ;;  %vm4544_vm6 = vcmp.eq.f32.partialorder %v1935_v27, 8.507059e+37 }
 0x1ef   : > { %v3155_v33 = vpop.eup %3154  ;;  %v4435_v46 = vadd.f32 1.0, %v3153_v2  ;;  %vm4563_vm8 = vmor %vm1931_vm2, %vm1932_vm0 }
 0x1f0   : > { %v1649_v29 = vsel %vm1648_vm10, %v3147_v9, %v1645_v45  ;;  %v1672_v43 = vmul.f32 %v3155_v33, %v4378_v37  ;;  %3160 = vpow2.f32 %v2887_v14  ;;  %v3157_v10 = vpop.eup %3156  ;;  %v3260_v45 = vld [vmem:[%s3777_s24] sm:$0xff]  ;;  %vm1677_vm12 = vweird.f32 %v3155_v33 }
 0x1f1   : > { %v1654_v7 = vsel %vm1651_vm11, %v1653_v38, %v1649_v29  ;;  %3162 = vrcp.f32 %v4435_v46  ;;  %v1349_v42 = vpop.f32.mrf.mxu2  ;;  %v4447_v48 = vpop.f32.mrf.mxu3  ;;  %v2148_v38 = vmul.f32 %v2132_v32, %v4184_v59  ;;  %vm1678_vm14 = vmor %vm1676_vm13, %vm1677_vm12  ;;  %v1683_v59 = vor.u32 1.1754944e-38, %v1682_v62 }
 0x1f2   : > { %3164 = vrcp.f32 %v4416_v50  ;;  %v2194_v4 = vsub.f32 1.0, %v1654_v7  ;;  %v1673_v9 = vsub.f32 1.0, %v1672_v43  ;;  %v1437_v47 = vadd.f32 %v1349_v42, %v3925_v49  ;;  %v4461_v2 = vpop.eup %3158 }
 0x1f3   : > { %v2226_v14 = vmul.f32 %v3260_v45, %v1654_v7  ;;  %3166 = vtanh.f32 %v2163_v24  ;;  %v4470_v49 = vsel %vm4412_vm7, %v4389_v60, %v1904_v31  ;;  %v1492_v43 = vadd.f32 %v3955_v3, %v1454_v23 }
 0x1f4   : > { %v2210_v17 = vmul.f32 %v3157_v10, %v2194_v4  ;;  %v1674_v63 = vmul.f32 %v3155_v33, %v1673_v9  ;;  %v1475_v29 = vadd.f32 %v4180_v16, %v1437_v47  ;;  %v1929_v31 = vmul.f32 %v4408_v25, %v1928_v34 }
 0x1f5   : > { %v2164_v10 = vadd.f32 %v2148_v38, %v4061_v40  ;;  %v2133_v62 = vadd.f32 %v4293_v51, %v4395_v13  ;;  %v1967_v45 = vand.u32 2147483648, %v4416_v50  ;;  %v3261_v38 = vld [vmem:[%s3777_s24 + $0x8] sm:$0xff]  ;;  %vm1706_vm3 = vweird.f32 %v4435_v46 }
 0x1f6   : > { %v3161_v6 = vpop.eup %3160  ;;  %v4473_v42 = vadd.f32 %v2226_v14, %v2210_v17  ;;  %v1675_v7 = vadd.f32 %v3155_v33, %v1674_v63  ;;  %v2889_v60 = vmul.f32 -1.442695, %v1475_v29  ;;  %v2906_v17 = vmul.f32 -1.442695, %v1492_v43  ;;  %v2307_v43 = vld [vmem:[%s4456_s15 + $0x8] sm:$0xff] }
 0x1f7   : > { %v4476_v4 = vpop.eup %3162  ;;  %v4484_v26 = vadd.f32 1.0, %v3161_v6  ;;  %v1712_v14 = vand.u32 2147483648, %v4435_v46  ;;  %v1710_v63 = vand.u32 2147483647, %v4435_v46  ;;  %v4555_v27 = vadd.f32 1.0, %v4461_v2 }
 0x1f8   : > { %v4487_v24 = vpop.eup %3164  ;;  %2258 = vst [vmem:[%s4491_s12] sm:$0xff] %v4473_v42  ;;  %v2322_v37 = vmax.f32 %v2306_v22, %v4473_v42  ;;  %v1679_v32 = vsel %vm1678_vm14, %v3155_v33, %v1675_v7  ;;  %v1702_v23 = vmul.f32 %v4476_v4, %v4435_v46  ;;  %vm1707_vm1 = vweird.f32 %v4476_v4 }
 0x1f9   : > { %v1684_v9 = vsel %vm1681_vm15, %v1683_v59, %v1679_v32  ;;  %3168 = vrcp.f32 %v4484_v26  ;;  %v1351_v47 = vpop.f32.mrf.mxu2  ;;  %v4502_v34 = vpop.f32.mrf.mxu3  ;;  %v2149_v7 = vmul.f32 %v2133_v62, %v4220_v39  ;;  %vm1708_vm4 = vmor %vm1706_vm3, %vm1707_vm1  ;;  %vm1711_vm5 = vcmp.eq.f32.partialorder %v1710_v63, 8.507059e+37 }
 0x1fa   : > { %2338 = vst [vmem:[%s4482_s13] sm:$0xff] %v2322_v37  ;;  %v2195_v33 = vsub.f32 1.0, %v1684_v9  ;;  %v1703_v30 = vsub.f32 1.0, %v1702_v23  ;;  %v3167_v40 = vpop.eup %3166  ;;  %3170 = vpow2.f32 %v2889_v60  ;;  %v1439_v13 = vadd.f32 %v1351_v47, %v3929_v52  ;;  %v1325_v52 = vpop.f32.mrf.mxu1 }
 0x1fb   : > { %v2227_v29 = vmul.f32 %v3261_v38, %v1684_v9  ;;  %3172 = vtanh.f32 %v2164_v10  ;;  %v4519_v60 = vadd.f32 %v4408_v25, %v1929_v31  ;;  %v1713_v9 = vor.u32 1.1754944e-38, %v1712_v14 }
 0x1fc   : > { %v2211_v22 = vmul.f32 %v3167_v40, %v2195_v33  ;;  %v1704_v6 = vmul.f32 %v4476_v4, %v1703_v30  ;;  %v1477_v59 = vadd.f32 %v4180_v16, %v1439_v13  ;;  %3174 = vpow2.f32 %v2906_v17 }
 0x1fd   : > { %v1957_v39 = vmul.f32 %v4487_v24, %v4416_v50  ;;  %v1456_v33 = vadd.f32 %v1325_v52, %v4049_v11  ;;  %v2165_v40 = vadd.f32 %v2149_v7, %v4087_v35  ;;  %v2134_v11 = vadd.f32 %v4293_v51, %v4447_v48 }
 0x1fe   : > { %v2243_v37 = vadd.f32 %v2227_v29, %v2211_v22  ;;  %v1705_v32 = vadd.f32 %v4476_v4, %v1704_v6  ;;  %v2891_v10 = vmul.f32 -1.442695, %v1477_v59  ;;  %v1742_v38 = vand.u32 2147483648, %v4484_v26  ;;  %v3262_v59 = vld [vmem:[%s3777_s24 + $0x10] sm:$0xff] }
 0x1ff   : > { %v3169_v23 = vpop.eup %3168  ;;  %v1740_v29 = vand.u32 2147483647, %v4484_v26  ;;  %vm1736_vm9 = vweird.f32 %v4484_v26  ;;  %vm1962_vm12 = vweird.f32 %v4487_v24  ;;  %vm1961_vm13 = vweird.f32 %v4416_v50 }
 0x200   : > { %2259 = vst [vmem:[%s4491_s12 + $0x8] sm:$0xff] %v2243_v37  ;;  %v3006_v31 = vpack.c.bf16 %v2243_v37, %v4473_v42  ;;  %v2323_v62 = vmax.f32 %v2307_v43, %v2243_v37  ;;  %v1709_v47 = vsel %vm1708_vm4, %v4476_v4, %v1705_v32  ;;  %v1732_v17 = vmul.f32 %v3169_v23, %v4484_v26  ;;  %v3171_v46 = vpop.eup %3170  ;;  %v2308_v37 = vld [vmem:[%s4456_s15 + $0x10] sm:$0xff] }
 0x201   : > { %v1714_v30 = vsel %vm1711_vm5, %v1713_v9, %v1709_v47  ;;  %3176 = vpow2.f32 %v2891_v10  ;;  %v1354_v14 = vpop.f32.mrf.mxu2  ;;  %v4531_v63 = vpop.f32.mrf.mxu3  ;;  %v4538_v13 = vadd.f32 1.0, %v3171_v46  ;;  %vm1737_vm7 = vweird.f32 %v3169_v23  ;;  %vm4650_vm5 = vmor %vm1961_vm13, %vm1962_vm12 }
 0x202   : > { %3007 = vst [vmem:[%s4535_s22] sm:$0xff] %v3006_v31   ;;  %v2196_v42 = vsub.f32 1.0, %v1714_v30  ;;  %v1733_v4 = vsub.f32 1.0, %v1732_v17  ;;  %v3173_v22 = vpop.eup %3172  ;;  %v1441_v6 = vadd.f32 %v1354_v14, %v3935_v58  ;;  %v2228_v52 = vmul.f32 %v3262_v59, %v1714_v30  ;;  %vm1738_vm10 = vmor %vm1736_vm9, %vm1737_vm7 }
 0x203   : > { %2339 = vst [vmem:[%s4482_s13 + $0x8] sm:$0xff] %v2323_v62  ;;  %v3175_v43 = vpop.eup %3174  ;;  %3178 = vrcp.f32 %v4538_v13  ;;  %v1958_v9 = vsub.f32 1.0, %v1957_v39  ;;  %v1934_v31 = vsel %vm4563_vm8, %v4408_v25, %v4519_v60  ;;  %v1494_v47 = vadd.f32 %v3955_v3, %v1456_v33 }
 0x204   : > { %v2212_v7 = vmul.f32 %v3173_v22, %v2196_v42  ;;  %v1734_v48 = vmul.f32 %v3169_v23, %v1733_v4  ;;  %3180 = vtanh.f32 %v2165_v40  ;;  %v1479_v32 = vadd.f32 %v4180_v16, %v1441_v6  ;;  %v3263_v6 = vld [vmem:[%s3777_s24 + $0x18] sm:$0xff] }
 0x205   : > { %v1743_v1 = vor.u32 1.1754944e-38, %v1742_v38  ;;  %v2150_v17 = vmul.f32 %v2134_v11, %v4275_v5  ;;  %vm1741_vm11 = vcmp.eq.f32.partialorder %v1740_v29, 8.507059e+37  ;;  %v2135_v25 = vadd.f32 %v4293_v51, %v4502_v34 }
 0x206   : > { %v4567_v10 = vadd.f32 %v2228_v52, %v2212_v7  ;;  %v1735_v2 = vadd.f32 %v3169_v23, %v1734_v48  ;;  %v2893_v39 = vmul.f32 -1.442695, %v1479_v32  ;;  %v1959_v5 = vmul.f32 %v4487_v24, %v1958_v9  ;;  %v2309_v48 = vld [vmem:[%s4456_s15 + $0x18] sm:$0xff] }
 0x207   : > { %v3177_v62 = vpop.eup %3176  ;;  %v4592_v4 = vor.u32 1.1754944e-38, %v1967_v45  ;;  %v2166_v22 = vadd.f32 %v2150_v17, %v4126_v53  ;;  %v4600_v38 = vsel %vm4544_vm6, %v4406_v28, %v1934_v31  ;;  %v1995_v45 = vand.u32 2147483647, %v4555_v27 }
 0x208   : > { %2260 = vst [vmem:[%s4491_s12 + $0x10] sm:$0xff] %v4567_v10  ;;  %v2324_v26 = vmax.f32 %v2308_v37, %v4567_v10  ;;  %v1739_v46 = vsel %vm1738_vm10, %v3169_v23, %v1735_v2  ;;  %v4580_v30 = vadd.f32 1.0, %v3177_v62  ;;  %3182 = vpow2.f32 %v2893_v39 }
 0x209   : > { %v1744_v40 = vsel %vm1741_vm11, %v1743_v1, %v1739_v46  ;;  %v1356_v60 = vpop.f32.mrf.mxu2  ;;  %v4584_v33 = vpop.f32.mrf.mxu3  ;;  %v1965_v23 = vand.u32 2147483647, %v4416_v50  ;;  %v2908_v52 = vmul.f32 -1.442695, %v1494_v47  ;;  %v2151_v53 = vmul.f32 %v2135_v25, %v4297_v56 }
 0x20a   : > { %v3179_v14 = vpop.eup %3178  ;;  %2340 = vst [vmem:[%s4482_s13 + $0x10] sm:$0xff] %v2324_v26  ;;  %v2197_v42 = vsub.f32 1.0, %v1744_v40  ;;  %3184 = vrcp.f32 %v4580_v30  ;;  %v2229_v7 = vmul.f32 %v3263_v6, %v1744_v40  ;;  %v1443_v59 = vadd.f32 %v1356_v60, %v3939_v61 }
 0x20b   : > { %v3181_v34 = vpop.eup %3180  ;;  %3186 = vrcp.f32 %v4555_v27  ;;  %v1762_v11 = vmul.f32 %v3179_v14, %v4538_v13  ;;  %v4609_v32 = vadd.f32 %v4487_v24, %v1959_v5  ;;  %v1772_v35 = vand.u32 2147483648, %v4538_v13 }
 0x20c   : > { %v2213_v29 = vmul.f32 %v3181_v34, %v2197_v42  ;;  %v1770_v58 = vand.u32 2147483647, %v4538_v13  ;;  %v1481_v61 = vadd.f32 %v4180_v16, %v1443_v59  ;;  %v4615_v2 = vadd.f32 1.0, %v3175_v43 }
 0x20d   : > { %v1763_v37 = vsub.f32 1.0, %v1762_v11  ;;  %vm1767_vm14 = vweird.f32 %v3179_v14  ;;  %3188 = vtanh.f32 %v2166_v22  ;;  %vm1766_vm15 = vweird.f32 %v4538_v13 }
 0x20e   : > { %v2245_v28 = vadd.f32 %v2229_v7, %v2213_v29  ;;  %v3183_v9 = vpop.eup %3182  ;;  %v2895_v17 = vmul.f32 -1.442695, %v1481_v61  ;;  %v2167_v46 = vadd.f32 %v2151_v53, %v4149_v20  ;;  %vm1768_vm0 = vmor %vm1766_vm15, %vm1767_vm14  ;;  %vm1771_vm1 = vcmp.eq.f32.partialorder %v1770_v58, 8.507059e+37 }
 0x20f   : > { %v1764_v31 = vmul.f32 %v3179_v14, %v1763_v37  ;;  %v4619_v1 = vadd.f32 1.0, %v3183_v9  ;;  %v2136_v60 = vadd.f32 %v4293_v51, %v4531_v63  ;;  %v1802_v34 = vand.u32 2147483648, %v4580_v30 }
 0x210   : > { %v3185_v56 = vpop.eup %3184  ;;  %2261 = vst [vmem:[%s4491_s12 + $0x18] sm:$0xff] %v2245_v28  ;;  %v3011_v62 = vpack.c.bf16 %v2245_v28, %v4567_v10  ;;  %v2325_v47 = vmax.f32 %v2309_v48, %v2245_v28  ;;  %v1773_v10 = vor.u32 1.1754944e-38, %v1772_v35  ;;  %v1800_v11 = vand.u32 2147483647, %v4580_v30 }
 0x211   : > { %v4621_v39 = vpop.eup %3186  ;;  %v1765_v26 = vadd.f32 %v3179_v14, %v1764_v31  ;;  %v1792_v43 = vmul.f32 %v3185_v56, %v4580_v30  ;;  %v1359_v40 = vpop.f32.mrf.mxu2  ;;  %3190 = vrcp.f32 %v4619_v1  ;;  %vm1797_vm2 = vweird.f32 %v3185_v56 }
 0x212   : > { %v4626_v25 = vpop.f32.mrf.mxu3  ;;  %3043 = vst [vmem:[%s4535_s22 + $0x8] sm:$0xff] %v3011_v62   ;;  %3192 = vpow2.f32 %v2895_v17  ;;  %v1445_v42 = vadd.f32 %v1359_v40, %v3947_v0  ;;  %vm4638_vm3 = vcmp.eq.f32.partialorder %v1965_v23, 8.507059e+37  ;;  %vm1796_vm4 = vweird.f32 %v4580_v30  ;;  %v2310_v30 = vld [vmem:[%s4456_s15 + $0x20] sm:$0xff] }
 0x213   : > { %2341 = vst [vmem:[%s4482_s13 + $0x18] sm:$0xff] %v2325_v47  ;;  %v1769_v13 = vsel %vm1768_vm0, %v3179_v14, %v1765_v26  ;;  %v1793_v5 = vsub.f32 1.0, %v1792_v43  ;;  %3194 = vpow2.f32 %v2908_v52  ;;  %v3189_v22 = vpop.eup %3188  ;;  %v2152_v0 = vmul.f32 %v2136_v60, %v4331_v57  ;;  %v3264_v52 = vld [vmem:[%s3777_s24 + $0x20] sm:$0xff]  ;;  %vm1798_vm6 = vmor %vm1796_vm4, %vm1797_vm2 }
 0x214   : > { %v1774_v20 = vsel %vm1771_vm1, %v1773_v10, %v1769_v13  ;;  %v1483_v63 = vadd.f32 %v4180_v16, %v1445_v42  ;;  %3196 = vtanh.f32 %v2167_v46  ;;  %v1997_v7 = vand.u32 2147483648, %v4555_v27  ;;  %v3265_v42 = vld [vmem:[%s3777_s24 + $0x28] sm:$0xff] }
 0x215   : > { %v2198_v29 = vsub.f32 1.0, %v1774_v20  ;;  %v1794_v6 = vmul.f32 %v3185_v56, %v1793_v5  ;;  %v2230_v48 = vmul.f32 %v3264_v52, %v1774_v20  ;;  %3198 = vrcp.f32 %v4615_v2 }
 0x216   : > { %v2897_v53 = vmul.f32 -1.442695, %v1483_v63  ;;  %v1803_v57 = vor.u32 1.1754944e-38, %v1802_v34  ;;  %v1964_v35 = vsel %vm4650_vm5, %v4487_v24, %v4609_v32  ;;  %v4663_v50 = vmul.f32 %v4621_v39, %v4555_v27  ;;  %v1327_v24 = vpop.f32.mrf.mxu1 }
 0x217   : > { %v2214_v59 = vmul.f32 %v3189_v22, %v2198_v29  ;;  %v1795_v37 = vadd.f32 %v3185_v56, %v1794_v6  ;;  %v3191_v28 = vpop.eup %3190  ;;  %vm1801_vm7 = vcmp.eq.f32.partialorder %v1800_v11, 8.507059e+37  ;;  %v2168_v26 = vadd.f32 %v2152_v0, %v4172_v18  ;;  %v2311_v29 = vld [vmem:[%s4456_s15 + $0x28] sm:$0xff] }
 0x218   : > { %v3193_v58 = vpop.eup %3192  ;;  %v1822_v31 = vmul.f32 %v3191_v28, %v4619_v1  ;;  %3200 = vpow2.f32 %v2897_v53  ;;  %vm1827_vm8 = vweird.f32 %v3191_v28  ;;  %v1832_v13 = vand.u32 2147483648, %v4619_v1 }
 0x219   : > { %v2246_v61 = vadd.f32 %v2230_v48, %v2214_v59  ;;  %v1799_v9 = vsel %vm1798_vm6, %v3185_v56, %v1795_v37  ;;  %v1361_v62 = vpop.f32.mrf.mxu2  ;;  %v4666_v47 = vpop.eup %3194  ;;  %v4669_v43 = vadd.f32 1.0, %v3193_v58  ;;  %v2137_v56 = vadd.f32 %v4293_v51, %v4584_v33 }
 0x21a   : > { %v1804_v17 = vsel %vm1801_vm7, %v1803_v57, %v1799_v9  ;;  %v1823_v40 = vsub.f32 1.0, %v1822_v31  ;;  %v4674_v10 = vpop.f32.mrf.mxu3  ;;  %v3197_v60 = vpop.eup %3196  ;;  %v1830_v18 = vand.u32 2147483647, %v4619_v1  ;;  %v1447_v11 = vadd.f32 %v1361_v62, %v3960_v8  ;;  %v3266_v31 = vld [vmem:[%s3777_s24 + $0x30] sm:$0xff] }
 0x21b   : > { %2262 = vst [vmem:[%s4491_s12 + $0x20] sm:$0xff] %v2246_v61  ;;  %v2326_v32 = vmax.f32 %v2310_v30, %v2246_v61  ;;  %v2199_v46 = vsub.f32 1.0, %v1804_v17  ;;  %3202 = vrcp.f32 %v4669_v43  ;;  %v2231_v20 = vmul.f32 %v3265_v42, %v1804_v17  ;;  %v4682_v22 = vpop.eup %3198 }
 0x21c   : > { %v1824_v34 = vmul.f32 %v3191_v28, %v1823_v40  ;;  %v1458_v33 = vadd.f32 %v1327_v24, %v4114_v12  ;;  %3204 = vtanh.f32 %v2168_v26  ;;  %v4689_v6 = vsel %vm4638_vm3, %v4592_v4, %v1964_v35 }
 0x21d   : > { %2342 = vst [vmem:[%s4482_s13 + $0x20] sm:$0xff] %v2326_v32  ;;  %v2215_v5 = vmul.f32 %v3197_v60, %v2199_v46  ;;  %v4691_v63 = vor.u32 1.1754944e-38, %v1997_v7  ;;  %vm1826_vm9 = vweird.f32 %v4619_v1  ;;  %v1485_v8 = vadd.f32 %v4180_v16, %v1447_v11  ;;  %v2312_v46 = vld [vmem:[%s4456_s15 + $0x30] sm:$0xff] }
 0x21e   : > { %v1825_v59 = vadd.f32 %v3191_v28, %v1824_v34  ;;  %v3201_v52 = vpop.eup %3200  ;;  %vm1828_vm10 = vmor %vm1826_vm9, %vm1827_vm8  ;;  %v1833_v48 = vor.u32 1.1754944e-38, %v1832_v13  ;;  %vm1831_vm11 = vcmp.eq.f32.partialorder %v1830_v18, 8.507059e+37  ;;  %v2153_v12 = vmul.f32 %v2137_v56, %v4364_v15 }
 0x21f   : > { %v2247_v0 = vadd.f32 %v2231_v20, %v2215_v5  ;;  %v1988_v14 = vsub.f32 1.0, %v4663_v50  ;;  %v4699_v1 = vadd.f32 1.0, %v3201_v52  ;;  %v2899_v57 = vmul.f32 -1.442695, %v1485_v8 }
 0x220   : > { %v1829_v37 = vsel %vm1828_vm10, %v3191_v28, %v1825_v59  ;;  %v2027_v58 = vand.u32 2147483648, %v4615_v2  ;;  %v1496_v15 = vadd.f32 %v3955_v3, %v1458_v33  ;;  %v2025_v9 = vand.u32 2147483647, %v4615_v2  ;;  %v5139_v59 = vld [vmem:[#allocation9_spill] sm:$0xff] }
 0x221   : > { %2263 = vst [vmem:[%s4491_s12 + $0x28] sm:$0xff] %v2247_v0  ;;  %v3016_v4 = vpack.c.bf16 %v2247_v0, %v2246_v61  ;;  %v2327_v7 = vmax.f32 %v2311_v29, %v2247_v0  ;;  %v1364_v53 = vpop.f32.mrf.mxu2  ;;  %v3203_v23 = vpop.eup %3202  ;;  %v1834_v30 = vsel %vm1831_vm11, %v1833_v48, %v1829_v37  ;;  %v2169_v17 = vadd.f32 %v2153_v12, %v4211_v36 }
 0x222   : > { %v1449_v35 = vadd.f32 %v1364_v53, %v3970_v19  ;;  %v2200_v50 = vsub.f32 1.0, %v1834_v30  ;;  %v1852_v61 = vmul.f32 %v3203_v23, %v4669_v43  ;;  %v3205_v28 = vpop.eup %3204  ;;  %v2232_v62 = vmul.f32 %v3266_v31, %v1834_v30  ;;  %v4715_v32 = vpop.f32.mrf.mxu3 }
 0x223   : > { %3044 = vst [vmem:[%s4535_s22 + $0x10] sm:$0xff] %v3016_v4   ;;  %3206 = vrcp.f32 %v4699_v1  ;;  %v2138_v19 = vadd.f32 %v4293_v51, %v4626_v25  ;;  %vm1992_vm12 = vweird.f32 %v4621_v39  ;;  %v1862_v40 = vand.u32 2147483648, %v4669_v43  ;;  %v5142_v4 = vld [vmem:[#allocation14_spill] sm:$0xff] }
 0x224   : > { %2343 = vst [vmem:[%s4482_s13 + $0x28] sm:$0xff] %v2327_v7  ;;  %v2216_v3 = vmul.f32 %v3205_v28, %v2200_v50  ;;  %v1853_v26 = vsub.f32 1.0, %v1852_v61  ;;  %3208 = vpow2.f32 %v2899_v57  ;;  %v1487_v24 = vadd.f32 %v4180_v16, %v1449_v35  ;;  %v3267_v61 = vld [vmem:[%s3777_s24 + $0x38] sm:$0xff] }
 0x225   : > { %v1860_v36 = vand.u32 2147483647, %v4669_v43  ;;  %v1989_v56 = vmul.f32 %v4621_v39, %v1988_v14  ;;  %vm1991_vm13 = vweird.f32 %v4555_v27  ;;  %v4722_v25 = vor.u32 1.1754944e-38, %v2027_v58 }
 0x226   : > { %v4724_v60 = vadd.f32 %v2232_v62, %v2216_v3  ;;  %v1854_v13 = vmul.f32 %v3203_v23, %v1853_v26  ;;  %vm1857_vm14 = vweird.f32 %v3203_v23  ;;  %v2901_v18 = vmul.f32 -1.442695, %v1487_v24  ;;  %vm4761_vm4 = vmor %vm1991_vm13, %vm1992_vm12 }
 0x227   : > { %v2910_v5 = vmul.f32 -1.442695, %v1496_v15  ;;  %vm1856_vm15 = vweird.f32 %v4669_v43  ;;  %3210 = vtanh.f32 %v2169_v17  ;;  %v2154_v42 = vmul.f32 %v2138_v19, %v4401_v54  ;;  %v2313_v19 = vld [vmem:[%s4456_s15 + $0x38] sm:$0xff] }
 0x228   : > { %2264 = vst [vmem:[%s4491_s12 + $0x30] sm:$0xff] %v4724_v60  ;;  %v2328_v20 = vmax.f32 %v2312_v46, %v4724_v60  ;;  %v1855_v34 = vadd.f32 %v3203_v23, %v1854_v13  ;;  %v2139_v11 = vadd.f32 %v4293_v51, %v4674_v10  ;;  %3212 = vpow2.f32 %v2901_v18  ;;  %vm1858_vm0 = vmor %vm1856_vm15, %vm1857_vm14 }
 0x229   : > { %v1366_v33 = vpop.f32.mrf.mxu2  ;;  %v3207_v29 = vpop.eup %3206  ;;  %v4734_v0 = vadd.f32 1.0, %v4666_v47  ;;  %v1863_v43 = vor.u32 1.1754944e-38, %v1862_v40  ;;  %v1990_v54 = vadd.f32 %v4621_v39, %v1989_v56  ;;  %vm1861_vm1 = vcmp.eq.f32.partialorder %v1860_v36, 8.507059e+37 }
 0x22a   : > { %v1451_v8 = vadd.f32 %v1366_v33, %v5139_v59  ;;  %v3209_v52 = vpop.eup %3208  ;;  %2344 = vst [vmem:[%s4482_s13 + $0x30] sm:$0xff] %v2328_v20  ;;  %v1859_v48 = vsel %vm1858_vm0, %v3203_v23, %v1855_v34  ;;  %v1882_v12 = vmul.f32 %v3207_v29, %v4699_v1  ;;  %vm4742_vm2 = vcmp.eq.f32.partialorder %v1995_v45, 8.507059e+37  ;;  %v1415_v17 = vpop.f32.mrf.mxu3  ;;  %v5145_v34 = vld [vmem:[#allocation10_spill] sm:$0xff] }
 0x22b   : > { %v2017_v47 = vmul.f32 %v4682_v22, %v4615_v2  ;;  %v1864_v14 = vsel %vm1861_vm1, %v1863_v43, %v1859_v48  ;;  %v2170_v7 = vadd.f32 %v2154_v42, %v5142_v4  ;;  %v4749_v37 = vadd.f32 1.0, %v3209_v52 }
 0x22c   : > { %v1489_v53 = vadd.f32 %v4180_v16, %v1451_v8  ;;  %3214 = vpow2.f32 %v2910_v5  ;;  %v2201_v23 = vsub.f32 1.0, %v1864_v14  ;;  %v1883_v30 = vsub.f32 1.0, %v1882_v12  ;;  %v3268_v12 = vld [vmem:[%s3777_s24 + $0x40] sm:$0xff] }
 0x22d   : > { %v2155_v45 = vmul.f32 %v2139_v11, %v4470_v49  ;;  %v3211_v57 = vpop.eup %3210  ;;  %vm1887_vm3 = vweird.f32 %v3207_v29  ;;  %v1892_v35 = vand.u32 2147483648, %v4699_v1  ;;  %v1890_v58 = vand.u32 2147483647, %v4699_v1 }
 0x22e   : > { %3216 = vrcp.f32 %v4749_v37  ;;  %v3213_v15 = vpop.eup %3212  ;;  %v2217_v50 = vmul.f32 %v3211_v57, %v2201_v23  ;;  %v2233_v28 = vmul.f32 %v3267_v61, %v1864_v14  ;;  %v1884_v31 = vmul.f32 %v3207_v29, %v1883_v30 }
 0x22f   : > { %v2903_v62 = vmul.f32 -1.442695, %v1489_v53  ;;  %3218 = vtanh.f32 %v2170_v7  ;;  %v4766_v3 = vadd.f32 1.0, %v3213_v15  ;;  %v1994_v26 = vsel %vm4761_vm4, %v4621_v39, %v1990_v54  ;;  %v5146_v15 = vld [vmem:[#allocation15_spill] sm:$0xff] }
 0x230   : > { %v2018_v24 = vsub.f32 1.0, %v2017_v47  ;;  %v2249_v46 = vadd.f32 %v2233_v28, %v2217_v50  ;;  %vm1886_vm5 = vweird.f32 %v4699_v1  ;;  %v1885_v40 = vadd.f32 %v3207_v29, %v1884_v31  ;;  %v2314_v47 = vld [vmem:[%s4456_s15 + $0x40] sm:$0xff] }
 0x231   : > { %3220 = vpow2.f32 %v2903_v62  ;;  %v1369_v27 = vpop.f32.mrf.mxu2  ;;  %vm1888_vm6 = vmor %vm1886_vm5, %vm1887_vm3  ;;  %v1893_v36 = vor.u32 1.1754944e-38, %v1892_v35  ;;  %v2171_v56 = vadd.f32 %v2155_v45, %v4286_v41  ;;  %v2140_v13 = vadd.f32 %v4293_v51, %v4715_v32 }
 0x232   : > { %3222 = vrcp.f32 %v4766_v3  ;;  %v3215_v18 = vpop.eup %3214  ;;  %2265 = vst [vmem:[%s4491_s12 + $0x38] sm:$0xff] %v2249_v46  ;;  %v3021_v39 = vpack.c.bf16 %v2249_v46, %v4724_v60  ;;  %v2329_v1 = vmax.f32 %v2313_v19, %v2249_v46  ;;  %v1889_v5 = vsel %vm1888_vm6, %v3207_v29, %v1885_v40  ;;  %v1418_v57 = vpop.f32.mrf.mxu3 }
 0x233   : > { %vm1891_vm7 = vcmp.eq.f32.partialorder %v1890_v58, 8.507059e+37  ;;  %3224 = vrcp.f32 %v4734_v0  ;;  %v1453_v41 = vadd.f32 %v1369_v27, %v5145_v34  ;;  %v4784_v11 = vsel %vm4742_vm2, %v4691_v63, %v1994_v26  ;;  %v3269_v34 = vld [vmem:[%s3777_s24 + $0x48] sm:$0xff] }
 0x234   : > { %v3217_v42 = vpop.eup %3216  ;;  %v1894_v20 = vsel %vm1891_vm7, %v1893_v36, %v1889_v5  ;;  %3045 = vst [vmem:[%s4535_s22 + $0x18] sm:$0xff] %v3021_v39   ;;  %v4789_v33 = vmul.f32 %v4682_v22, %v2018_v24  ;;  %v2055_v29 = vand.u32 2147483647, %v4734_v0  ;;  %v4792_v59 = vadd.f32 1.0, %v3215_v18 }
 0x235   : > { %v2202_v32 = vsub.f32 1.0, %v1894_v20  ;;  %v1912_v60 = vmul.f32 %v3217_v42, %v4749_v37  ;;  %v3219_v43 = vpop.eup %3218  ;;  %2345 = vst [vmem:[%s4482_s13 + $0x38] sm:$0xff] %v2329_v1  ;;  %v2156_v8 = vmul.f32 %v2140_v13, %v4600_v38  ;;  %v2141_v54 = vadd.f32 %v4293_v51, %v1415_v17 }
 0x236   : > { %v1491_v63 = vadd.f32 %v4180_v16, %v1453_v41  ;;  %v2234_v10 = vmul.f32 %v3268_v12, %v1894_v20  ;;  %3226 = vtanh.f32 %v2171_v56  ;;  %v1922_v7 = vand.u32 2147483648, %v4749_v37 }
 0x237   : > { %v3221_v52 = vpop.eup %3220  ;;  %v2218_v48 = vmul.f32 %v3219_v43, %v2202_v32  ;;  %v1913_v14 = vsub.f32 1.0, %v1912_v60  ;;  %v1920_v53 = vand.u32 2147483647, %v4749_v37  ;;  %vm1917_vm8 = vweird.f32 %v3217_v42  ;;  %v2315_v43 = vld [vmem:[%s4456_s15 + $0x48] sm:$0xff] }
 0x238   : > { %v3223_v4 = vpop.eup %3222  ;;  %v4802_v23 = vadd.f32 1.0, %v3221_v52  ;;  %v2905_v38 = vmul.f32 -1.442695, %v1491_v63  ;;  %vm1916_vm9 = vweird.f32 %v4749_v37  ;;  %v2172_v50 = vadd.f32 %v2156_v8, %v5146_v15  ;;  %v5147_v37 = vld [vmem:[#allocation11_spill] sm:$0xff] }
 0x239   : > { %v4804_v30 = vadd.f32 %v2234_v10, %v2218_v48  ;;  %v1914_v51 = vmul.f32 %v3217_v42, %v1913_v14  ;;  %v1942_v45 = vmul.f32 %v3223_v4, %v4766_v3  ;;  %v1371_v35 = vpop.f32.mrf.mxu2  ;;  %v4807_v58 = vpop.eup %3224  ;;  %v2157_v61 = vmul.f32 %v2141_v54, %v4689_v6  ;;  %vm1918_vm10 = vmor %vm1916_vm9, %vm1917_vm8 }
 0x23a   : > { %3228 = vrcp.f32 %v4802_v23  ;;  %v1923_v17 = vor.u32 1.1754944e-38, %v1922_v7  ;;  %v1952_v49 = vand.u32 2147483648, %v4766_v3  ;;  %v1950_v19 = vand.u32 2147483647, %v4766_v3 }
 0x23b   : > { %2266 = vst [vmem:[%s4491_s12 + $0x40] sm:$0xff] %v4804_v30  ;;  %v2330_v28 = vmax.f32 %v2314_v47, %v4804_v30  ;;  %v1915_v31 = vadd.f32 %v3217_v42, %v1914_v51  ;;  %v1943_v62 = vsub.f32 1.0, %v1942_v45  ;;  %3230 = vpow2.f32 %v2905_v38  ;;  %v1420_v47 = vpop.f32.mrf.mxu3 }
 0x23c   : > { %v1455_v26 = vadd.f32 %v1371_v35, %v5147_v37  ;;  %v3227_v24 = vpop.eup %3226  ;;  %vm1921_vm11 = vcmp.eq.f32.partialorder %v1920_v53, 8.507059e+37  ;;  %vm1947_vm12 = vweird.f32 %v3223_v4  ;;  %3232 = vtanh.f32 %v2172_v50  ;;  %v2316_v50 = vld [vmem:[%s4456_s15 + $0x50] sm:$0xff] }
 0x23d   : > { %2346 = vst [vmem:[%s4482_s13 + $0x40] sm:$0xff] %v2330_v28  ;;  %v1919_v46 = vsel %vm1918_vm10, %v3217_v42, %v1915_v31  ;;  %v1944_v6 = vmul.f32 %v3223_v4, %v1943_v62  ;;  %v4823_v36 = vmul.f32 %v4807_v58, %v4734_v0  ;;  %3234 = vrcp.f32 %v4792_v59 }
 0x23e   : > { %v1924_v40 = vsel %vm1921_vm11, %v1923_v17, %v1919_v46  ;;  %v1493_v27 = vadd.f32 %v4180_v16, %v1455_v26  ;;  %vm1946_vm13 = vweird.f32 %v4766_v3  ;;  %vm2022_vm14 = vweird.f32 %v4682_v22 }
 0x23f   : > { %v2203_v56 = vsub.f32 1.0, %v1924_v40  ;;  %v1945_v13 = vadd.f32 %v3223_v4, %v1944_v6  ;;  %vm1948_vm15 = vmor %vm1946_vm13, %vm1947_vm12  ;;  %v1953_v39 = vor.u32 1.1754944e-38, %v1952_v49  ;;  %vm1951_vm0 = vcmp.eq.f32.partialorder %v1950_v19, 8.507059e+37 }
 0x240   : > { %v4828_v18 = vpop.eup %3228  ;;  %v2173_v1 = vadd.f32 %v2157_v61, %v4359_v44  ;;  %v2907_v5 = vmul.f32 -1.442695, %v1493_v27  ;;  %v2235_v41 = vmul.f32 %v3269_v34, %v1924_v40  ;;  %vm2021_vm1 = vweird.f32 %v4615_v2  ;;  %v4841_v44 = vld [vmem:[%s5065_s8] ss:$0 sm:$0xff]  ;;  %v5150_v61 = vld [vmem:[#allocation12_spill] sm:$0xff] }
 0x241   : > { %v3231_v42 = vpop.eup %3230  ;;  %v2219_v20 = vmul.f32 %v3227_v24, %v2203_v56  ;;  %v1949_v32 = vsel %vm1948_vm15, %v3223_v4, %v1945_v13  ;;  %v1972_v3 = vmul.f32 %v4828_v18, %v4802_v23  ;;  %v1374_v60 = vpop.f32.mrf.mxu2  ;;  %v2142_v63 = vadd.f32 %v4841_v44, %v1418_v57  ;;  %v3271_v4 = vld [vmem:[%s3777_s24 + $0x50] sm:$0xff]  ;;  %vm4888_vm7 = vmor %vm2021_vm1, %vm2022_vm14  ;;  %v5153_v13 = vld [vmem:[#allocation13_spill] sm:$0xff] }
 0x242   : > { %v1954_v8 = vsel %vm1951_vm0, %v1953_v39, %v1949_v32  ;;  %v4836_v54 = vadd.f32 1.0, %v3231_v42  ;;  %3236 = vpow2.f32 %v2907_v5  ;;  %v1982_v10 = vand.u32 2147483648, %v4802_v23  ;;  %v3233_v14 = vpop.eup %3232  ;;  %v3272_v32 = vld [vmem:[%s3777_s24 + $0x58] sm:$0xff] }
 0x243   : > { %v2251_v52 = vadd.f32 %v2235_v41, %v2219_v20  ;;  %v2204_v48 = vsub.f32 1.0, %v1954_v8  ;;  %v1973_v12 = vsub.f32 1.0, %v1972_v3  ;;  %v2236_v7 = vmul.f32 %v3271_v4, %v1954_v8  ;;  %v4849_v38 = vpop.eup %3234  ;;  %v2317_v8 = vld [vmem:[%s4456_s15 + $0x58] sm:$0xff] }
 0x244   : > { %vm1977_vm2 = vweird.f32 %v4828_v18  ;;  %v1980_v53 = vand.u32 2147483647, %v4802_v23  ;;  %3238 = vrcp.f32 %v4836_v54  ;;  %vm4856_vm3 = vcmp.eq.f32.partialorder %v2025_v9, 8.507059e+37 }
 0x245   : > { %2267 = vst [vmem:[%s4491_s12 + $0x48] sm:$0xff] %v2251_v52  ;;  %v3026_v51 = vpack.c.bf16 %v2251_v52, %v4804_v30  ;;  %v2331_v45 = vmax.f32 %v2315_v43, %v2251_v52  ;;  %v2220_v57 = vmul.f32 %v3233_v14, %v2204_v48  ;;  %v1974_v35 = vmul.f32 %v4828_v18, %v1973_v12  ;;  %v1423_v43 = vpop.f32.mrf.mxu3 }
 0x246   : > { %3240 = vtanh.f32 %v2173_v1  ;;  %v1457_v28 = vadd.f32 %v1374_v60, %v5150_v61  ;;  %v2048_v31 = vsub.f32 1.0, %v4823_v36  ;;  %v2057_v30 = vand.u32 2147483648, %v4734_v0 }
 0x247   : > { %3046 = vst [vmem:[%s4535_s22 + $0x20] sm:$0xff] %v3026_v51   ;;  %v4865_v62 = vadd.f32 %v2236_v7, %v2220_v57  ;;  %vm1976_vm4 = vweird.f32 %v4802_v23  ;;  %v1975_v17 = vadd.f32 %v4828_v18, %v1974_v35  ;;  %v2020_v9 = vadd.f32 %v4682_v22, %v4789_v33  ;;  %v1108_v35 = vpop.f32.mrf.mxu0 }
 0x248   : > { %v3237_v49 = vpop.eup %3236  ;;  %2347 = vst [vmem:[%s4482_s13 + $0x48] sm:$0xff] %v2331_v45  ;;  %vm1978_vm5 = vmor %vm1976_vm4, %vm1977_vm2  ;;  %v1983_v19 = vor.u32 1.1754944e-38, %v1982_v10  ;;  %v2158_v37 = vmul.f32 %v2142_v63, %v4784_v11  ;;  %v1495_v26 = vadd.f32 %v4180_v16, %v1457_v28  ;;  %v2077_v24 = vmul.f32 %v4849_v38, %v4792_v59 }
 0x249   : > { %2268 = vst [vmem:[%s4491_s12 + $0x50] sm:$0xff] %v4865_v62  ;;  %v2332_v23 = vmax.f32 %v2316_v50, %v4865_v62  ;;  %v1979_v33 = vsel %vm1978_vm5, %v4828_v18, %v1975_v17  ;;  %vm1981_vm6 = vcmp.eq.f32.partialorder %v1980_v53, 8.507059e+37  ;;  %v4882_v46 = vadd.f32 1.0, %v3237_v49  ;;  %v1376_v6 = vpop.f32.mrf.mxu2 }
 0x24a   : > { %v3239_v40 = vpop.eup %3238  ;;  %v1984_v27 = vsel %vm1981_vm6, %v1983_v19, %v1979_v33  ;;  %v2909_v36 = vmul.f32 -1.442695, %v1495_v26  ;;  %v2049_v56 = vmul.f32 %v4807_v58, %v2048_v31  ;;  %vm2051_vm8 = vweird.f32 %v4734_v0 }
 0x24b   : > { %v1459_v18 = vadd.f32 %v1376_v6, %v5153_v13  ;;  %2348 = vst [vmem:[%s4482_s13 + $0x50] sm:$0xff] %v2332_v23  ;;  %v2205_v39 = vsub.f32 1.0, %v1984_v27  ;;  %v2002_v1 = vmul.f32 %v3239_v40, %v4836_v54  ;;  %v2024_v2 = vsel %vm4888_vm7, %v4682_v22, %v2020_v9 }
 0x24c   : > { %vm2052_vm9 = vweird.f32 %v4807_v58  ;;  %v3241_v5 = vpop.eup %3240  ;;  %v2174_v42 = vadd.f32 %v2158_v37, %v4386_v21  ;;  %3242 = vrcp.f32 %v4882_v46  ;;  %v2143_v20 = vadd.f32 %v4841_v44, %v1420_v47 }
 0x24d   : > { %v2078_v34 = vsub.f32 1.0, %v2077_v24  ;;  %v2221_v41 = vmul.f32 %v3241_v5, %v2205_v39  ;;  %v2237_v3 = vmul.f32 %v3272_v32, %v1984_v27  ;;  %v2003_v60 = vsub.f32 1.0, %v2002_v1  ;;  %vm4932_vm0 = vmor %vm2051_vm8, %vm2052_vm9  ;;  %v3273_v24 = vld [vmem:[%s3777_s24 + $0x60] sm:$0xff]  ;;  %v1425_v33 = vpop.f32.mrf.mxu3 }
 0x24e   : > { %3244 = vpow2.f32 %v2909_v36  ;;  %v2012_v22 = vand.u32 2147483648, %v4836_v54  ;;  %v2029_v63 = vsel %vm4856_vm3, %v4722_v25, %v2024_v2  ;;  %v2050_v21 = vadd.f32 %v4807_v58, %v2049_v56 }
 0x24f   : > { %v1497_v52 = vadd.f32 %v4180_v16, %v1459_v18  ;;  %v2253_v48 = vadd.f32 %v2237_v3, %v2221_v41  ;;  %v2004_v12 = vmul.f32 %v3239_v40, %v2003_v60  ;;  %vm2007_vm10 = vweird.f32 %v3239_v40  ;;  %v1110_v3 = vpop.f32.mrf.mxu0 }
 0x250   : > { %v2010_v10 = vand.u32 2147483647, %v4836_v54  ;;  %vm4915_vm11 = vcmp.eq.f32.partialorder %v2055_v29, 8.507059e+37  ;;  %3246 = vtanh.f32 %v2174_v42  ;;  %v2159_v14 = vmul.f32 %v2143_v20, %v2029_v63 }
 0x251   : > { %v2911_v4 = vmul.f32 -1.442695, %v1497_v52  ;;  %v2079_v25 = vmul.f32 %v4849_v38, %v2078_v34  ;;  %2269 = vst [vmem:[%s4491_s12 + $0x58] sm:$0xff] %v2253_v48  ;;  %v3031_v16 = vpack.c.bf16 %v2253_v48, %v4865_v62  ;;  %v2333_v7 = vmax.f32 %v2317_v8, %v2253_v48  ;;  %v3274_v34 = vld [vmem:[%s5064_s7] ss:$0 sm:$0xff] }
 0x252   : > { %vm2006_vm12 = vweird.f32 %v4836_v54  ;;  %v2005_v53 = vadd.f32 %v3239_v40, %v2004_v12  ;;  %v3243_v51 = vpop.eup %3242  ;;  %v2013_v29 = vor.u32 1.1754944e-38, %v2012_v22  ;;  %v2058_v45 = vor.u32 1.1754944e-38, %v2057_v30 }
 0x253   : > { %vm2008_vm13 = vmor %vm2006_vm12, %vm2007_vm10  ;;  %3248 = vpow2.f32 %v2911_v4  ;;  %vm2081_vm14 = vweird.f32 %v4792_v59  ;;  %3047 = vst [vmem:[%s4535_s22 + $0x28] sm:$0xff] %v3031_v16   ;;  %vm2011_vm15 = vcmp.eq.f32.partialorder %v2010_v10, 8.507059e+37  ;;  %v2032_v50 = vmul.f32 %v3243_v51, %v4882_v46  ;;  %v2319_v10 = vld [vmem:[%s4456_s15 + $0x68] sm:$0xff] }
 0x254   : > { %v3245_v57 = vpop.eup %3244  ;;  %v2009_v15 = vsel %vm2008_vm13, %v3239_v40, %v2005_v53  ;;  %v2087_v61 = vand.u32 2147483648, %v4792_v59  ;;  %2349 = vst [vmem:[%s4482_s13 + $0x58] sm:$0xff] %v2333_v7  ;;  %v2175_v31 = vadd.f32 %v2159_v14, %v4419_v55  ;;  %v2054_v62 = vsel %vm4932_vm0, %v4807_v58, %v2050_v21  ;;  %v2318_v40 = vld [vmem:[%s4456_s15 + $0x60] sm:$0xff]  ;;  %v3275_v21 = vld [vmem:[%s3777_s24 + $0x68] sm:$0xff] }
 0x255   : > { %v2014_v28 = vsel %vm2011_vm15, %v2013_v29, %v2009_v15  ;;  %v4939_v30 = vadd.f32 1.0, %v3245_v57  ;;  %v2033_v0 = vsub.f32 1.0, %v2032_v50  ;;  %v2080_v9 = vadd.f32 %v4849_v38, %v2079_v25 }
 0x256   : > { %v2206_v17 = vsub.f32 1.0, %v2014_v28  ;;  %vm2082_vm1 = vweird.f32 %v4849_v38  ;;  %v3247_v49 = vpop.eup %3246  ;;  %v2042_v19 = vand.u32 2147483648, %v4882_v46  ;;  %v2040_v37 = vand.u32 2147483647, %v4882_v46 }
 0x257   : > { %3250 = vrcp.f32 %v4939_v30  ;;  %v2144_v55 = vadd.f32 %v4841_v44, %v1423_v43  ;;  %v2238_v23 = vmul.f32 %v3273_v24, %v2014_v28  ;;  %v2034_v58 = vmul.f32 %v3243_v51, %v2033_v0  ;;  %vm4962_vm4 = vmor %vm2081_vm14, %vm2082_vm1  ;;  %v3276_v0 = vld [vmem:[%s3777_s24 + $0x70] sm:$0xff] }
 0x258   : > { %v2222_v26 = vmul.f32 %v3247_v49, %v2206_v17  ;;  %vm2037_vm2 = vweird.f32 %v3243_v51  ;;  %3252 = vtanh.f32 %v2175_v31  ;;  %v2059_v27 = vsel %vm4915_vm11, %v2058_v45, %v2054_v62 }
 0x259   : > { %v3249_v6 = vpop.eup %3248  ;;  %v2085_v11 = vand.u32 2147483647, %v4792_v59  ;;  %v2088_v36 = vor.u32 1.1754944e-38, %v2087_v61  ;;  %vm2036_vm3 = vweird.f32 %v4882_v46  ;;  %v2035_v13 = vadd.f32 %v3243_v51, %v2034_v58 }
 0x25a   : > { %v2254_v56 = vadd.f32 %v2238_v23, %v2222_v26  ;;  %v4956_v18 = vadd.f32 1.0, %v3249_v6  ;;  %vm2038_vm5 = vmor %vm2036_vm3, %vm2037_vm2  ;;  %v2043_v1 = vor.u32 1.1754944e-38, %v2042_v19  ;;  %v2160_v2 = vmul.f32 %v2144_v55, %v2059_v27  ;;  %v2320_v19 = vld [vmem:[%s4456_s15 + $0x70] sm:$0xff]  ;;  %v3277_v6 = vld [vmem:[%s3777_s24 + $0x78] sm:$0xff] }
 0x25b   : > { %v2084_v5 = vsel %vm4962_vm4, %v4849_v38, %v2080_v9  ;;  %v2145_v46 = vadd.f32 %v4841_v44, %v1425_v33  ;;  %v2039_v20 = vsel %vm2038_vm5, %v3243_v51, %v2035_v13  ;;  %vm2041_vm6 = vcmp.eq.f32.partialorder %v2040_v37, 8.507059e+37  ;;  %v2321_v27 = vld [vmem:[%s4456_s15 + $0x78] sm:$0xff]  ;;  %s3298_s15 = scalar_lea.hbm %s5066_s9, 256 }
 0x25c   : > { %2270 = vst [vmem:[%s4491_s12 + $0x60] sm:$0xff] %v2254_v56  ;;  %v2334_v42 = vmax.f32 %v2318_v40, %v2254_v56  ;;  %3254 = vrcp.f32 %v4956_v18  ;;  %v2124_v41 = vadd.f32 %v3274_v34, %v1108_v35  ;;  %v2044_v32 = vsel %vm2041_vm6, %v2043_v1, %v2039_v20  ;;  %p3300_p1 = scmp.lt.s32.totalorder %s3298_s15, %s3294_s29 }
 0x25d   : > { %v3251_v59 = vpop.eup %3250  ;;  %vm2086_vm7 = vcmp.eq.f32.partialorder %v2085_v11, 8.507059e+37  ;;  %v2207_v38 = vsub.f32 1.0, %v2044_v32  ;;  %v2239_v52 = vmul.f32 %v3275_v21, %v2044_v32  ;;  %v2125_v12 = vadd.f32 %v3274_v34, %v1110_v3 }
 0x25e   : > { %2350 = vst [vmem:[%s4482_s13 + $0x60] sm:$0xff] %v2334_v42  ;;  %v2062_v44 = vmul.f32 %v3251_v59, %v4939_v30  ;;  %v2089_v60 = vsel %vm2086_vm7, %v2088_v36, %v2084_v5  ;;  %v3253_v43 = vpop.eup %3252  ;;  %v2176_v8 = vadd.f32 %v2160_v2, %v2124_v41  ;;  %v2072_v47 = vand.u32 2147483648, %v4939_v30  ;;  %p3301_p2 = por %p3300_p1, %p3299_p0 }
 0x25f   : > { %v2161_v22 = vmul.f32 %v2145_v46, %v2089_v60  ;;  %v2223_v63 = vmul.f32 %v3253_v43, %v2207_v38  ;;  %vm2067_vm8 = vweird.f32 %v3251_v59  ;;  %v2070_v16 = vand.u32 2147483647, %v4939_v30 }
 0x260   : > { %v2063_v48 = vsub.f32 1.0, %v2062_v44  ;;  %3256 = vtanh.f32 %v2176_v8  ;;  %vm2066_vm9 = vweird.f32 %v4939_v30  ;;  %v2073_v57 = vor.u32 1.1754944e-38, %v2072_v47  ;;  %p3302_p3 = pnand %p3301_p2, %p3297_p13 }
 0x261   : > { %v2255_v4 = vadd.f32 %v2239_v52, %v2223_v63  ;;  %v2177_v53 = vadd.f32 %v2161_v22, %v2125_v12  ;;  %vm2068_vm10 = vmor %vm2066_vm9, %vm2067_vm8  ;;  %vm2071_vm11 = vcmp.eq.f32.partialorder %v2070_v16, 8.507059e+37  ;;  %v2102_v50 = vand.u32 2147483648, %v4956_v18 }
 0x262   : > { %v3255_v14 = vpop.eup %3254  ;;  %v2064_v25 = vmul.f32 %v3251_v59, %v2063_v48  ;;  %v2100_v28 = vand.u32 2147483647, %v4956_v18  ;;  %vm2096_vm13 = vweird.f32 %v4956_v18 }
 0x263   : > { %v2092_v7 = vmul.f32 %v3255_v14, %v4956_v18  ;;  %2271 = vst [vmem:[%s4491_s12 + $0x68] sm:$0xff] %v2255_v4  ;;  %v3036_v51 = vpack.c.bf16 %v2255_v4, %v2254_v56  ;;  %v2335_v29 = vmax.f32 %v2319_v10, %v2255_v4  ;;  %vm2097_vm12 = vweird.f32 %v3255_v14 }
 0x264   : > { %v2065_v45 = vadd.f32 %v3251_v59, %v2064_v25  ;;  %3258 = vtanh.f32 %v2177_v53  ;;  %vm2098_vm14 = vmor %vm2096_vm13, %vm2097_vm12  ;;  %v2103_v49 = vor.u32 1.1754944e-38, %v2102_v50  ;;  %vm2101_vm15 = vcmp.eq.f32.partialorder %v2100_v28, 8.507059e+37 }
 0x265   : > { %v2093_v35 = vsub.f32 1.0, %v2092_v7  ;;  %3048 = vst [vmem:[%s4535_s22 + $0x30] sm:$0xff] %v3036_v51  }
 0x266   : > { %v2069_v15 = vsel %vm2068_vm10, %v3251_v59, %v2065_v45  ;;  %2351 = vst [vmem:[%s4482_s13 + $0x68] sm:$0xff] %v2335_v29  ;;  %v3257_v30 = vpop.eup %3256 }
 0x267   : > { %v2074_v54 = vsel %vm2071_vm11, %v2073_v57, %v2069_v15  ;;  %v2094_v61 = vmul.f32 %v3255_v14, %v2093_v35 }
 0x268   : > { %v2208_v31 = vsub.f32 1.0, %v2074_v54  ;;  %v2240_v9 = vmul.f32 %v3276_v0, %v2074_v54 }
 0x269   : > { %v2095_v62 = vadd.f32 %v3255_v14, %v2094_v61 }
 0x26a   : > { %v2224_v17 = vmul.f32 %v3257_v30, %v2208_v31  ;;  %v3259_v23 = vpop.eup %3258 }
 0x26b   : > { %v2099_v37 = vsel %vm2098_vm14, %v3255_v14, %v2095_v62 }
 0x26c   : > { %v2256_v55 = vadd.f32 %v2240_v9, %v2224_v17  ;;  %v2104_v26 = vsel %vm2101_vm15, %v2103_v49, %v2099_v37 }
 0x26d   : > { %v2209_v24 = vsub.f32 1.0, %v2104_v26  ;;  %v2241_v40 = vmul.f32 %v3277_v6, %v2104_v26 }
 0x26e   : > { %2272 = vst [vmem:[%s4491_s12 + $0x70] sm:$0xff] %v2256_v55  ;;  %v2336_v58 = vmax.f32 %v2320_v19, %v2256_v55 }
 0x26f   : > { %v2225_v33 = vmul.f32 %v3259_v23, %v2209_v24 }
 0x270   : > { %2352 = vst [vmem:[%s4482_s13 + $0x70] sm:$0xff] %v2336_v58 }
 0x271   : > { %v2257_v11 = vadd.f32 %v2241_v40, %v2225_v33 }
 0x273   : > { %2273 = vst [vmem:[%s4491_s12 + $0x78] sm:$0xff] %v2257_v11  ;;  %v3041_v36 = vpack.c.bf16 %v2257_v11, %v2256_v55  ;;  %v2337_v56 = vmax.f32 %v2321_v27, %v2257_v11 }
 0x274   : > { %3305 = shalt.err (!%p3302_p3)
}
 0x275   : > { %s3374_s12 = smov 128   ;;  %s3375_s4 = smov 8   ;;  %3049 = vst [vmem:[%s4535_s22 + $0x38] sm:$0xff] %v3041_v36  }
 0x276   : > { %3050 = dma.vmem_to_hbm [thread:$0]  (%p3476_p5), %s5001_s30, 2048, %s2380_s3, %s2355_s1, %s3374_s12, %s3374_s12, %s3375_s4  }
 0x277   : > { %2353 = vst [vmem:[%s4482_s13 + $0x78] sm:$0xff] %v2337_v56  ;;  %s2360_s2 = scalar_lea.sflag [#allocation5], %s4433_s25  ;;  %s3320_s24 = sshra.s32 %s5009_s16, 4  ;;  %s3321_s24 = int_to_ptr.hbm [resolvable:$true] %s3320_s24 }
 0x278   : > { %s3322_s26 = scalar_lea.hbm %s3321_s24, 64  ;;  %s3326_s21 = scalar_lea.hbm %s5067_s10, 128 }
 0x279   : > { %p3323_p4 = scmp.ne.s32.totalorder %s3321_s24, %s3322_s26  ;;  %p3327_p9 = scmp.lt.s32.totalorder %s3321_s24, %s5067_s10 }
 0x27a   : > { %p3328_p10 = scmp.lt.s32.totalorder %s3326_s21, %s3322_s26 }
 0x27b   : > { %p3324_p7 = pnand %p3323_p4, %p3476_p5 }
 0x27c   : > { %p3329_p11 = por %p3328_p10, %p3327_p9 }
 0x27d   : > { %p3325_p8 = pneg %p3324_p7 }
 0x27f   : > { %p3330_p12 = pnand %p3329_p11, %p3325_p8 }
 0x281   : > { %3333 = shalt.err (!%p3330_p12)
}
 0x282   : > { %s3376_s3 = smov 64   ;;  %s3377_s4 = smov 4  }
 0x283   : > { %3051 = dma.vmem_to_hbm [thread:$0]  (%p3476_p5), %s5007_s0, 1024, %s5009_s16, %s2360_s2, %s3376_s3, %s3376_s3, %s3377_s4  }
 0x284 PF: > { %p3061_p13 = scmp.ge.s32.totalorder %s3372_s20, 2  ;;  %s2415_s25 = sand.u32 1, %s3360_s17  }
 0x285   : > { %s2416_s5 = scalar_lea.sflag [#allocation3], %s2415_s25 }
 0x286   : > { %p3055_p0 = pnand %p3061_p13, %p3480_p6 }
 0x288   : > { %p3056_p1 = pneg %p3055_p0 }
 0x28a   : > { %3351 = dma.done.wait (%p3056_p1), %s2416_s5, 2048  }
 0x28b   : > { %3353 = vsyncadd (%p3056_p1), %s2416_s5, 4294965248  ;;  %s2426_s13 = scalar_lea.sflag [#allocation5], %s2415_s25 }
 0x28c   : > { %3355 = dma.done.wait (%p3056_p1), %s2426_s13, 1024  }
 0x28d   : > { %3357 = vsyncadd (%p3056_p1), %s2426_s13, 4294966272  ;;  %s5160_s27 = sld [smem:[#allocation8_spill]]  ;;  %p25_p5 = scmp.ge.s32.totalorder %s3463_s23, 4  }
 0x28e   : > { %s5161_s17 = smov %s3364_s18  ;;  %s5162_s18 = smov %s3368_s19 }
 0x28f   : > { %s5164_s20 = smov %s3463_s23  ;;  %27 = sbr.rel (!%p25_p5) target bundleno = 12 (0xc), region = 126 }
 0x293   : > { %s5163_s19 = smov %s5160_s27 }
 0x294   :  { %2440 = vsyncpa [#allocation3], 1 }
 0x295   :  { %2442 = vsyncpa [#allocation3 + $0x1], 1 }
 0x296   :  { %2443 = vsyncpa [#allocation5], 1 }
 0x297   :  { %2445 = vsyncpa [#allocation5 + $0x1], 1 }

</bundles_post_ra>
